<compile_context>
chip_gen: v7x
topology: tpu7x:2x2x1
jax: 0.10.0
libtpu: 0.0.40
codegen_flags: <defaults>
</compile_context>

<pallas_src>
import math

import jax
import jax.numpy as jnp
from jax import lax
from jax.experimental import pallas as pl
from jax.experimental.pallas import tpu as pltpu

EPS = 1e-6


# ---------------------------------------------------------------------------
# helpers
# ---------------------------------------------------------------------------

def _pick_block_rows(rows, w, kp, c2, dtype, *, target=256, budget_bytes=6 * 2**20):
    """Largest row-block (in image rows; each image row = W pixels) under a VMEM byte budget."""
    isz = jnp.dtype(dtype).itemsize
    # double-buffered input + output blocks plus f32 temporaries of the fused LayerNorm
    per_row = w * (2 * (kp + c2) * isz + 3 * c2 * 4)
    cap = max(budget_bytes // max(per_row, 1), 1)
    bn = int(min(rows, target, cap))
    if bn >= 8:
        bn = (bn // 8) * 8          # keep the sublane-adjacent dim a multiple of 8 when possible
    return max(bn, 1)


def _compiler_params(semantics, vmem_need_bytes):
    # explicit scoped-VMEM limit: at least the smallest default (16 MiB), never more than
    # 48 MiB so we keep headroom under v7x's 64 MiB physical VMEM.
    limit = int(min(max(2 * vmem_need_bytes, 16 * 2**20), 48 * 2**20))
    return pltpu.CompilerParams(dimension_semantics=semantics, vmem_limit_bytes=limit)


# ---------------------------------------------------------------------------
# fused kernel: conv-3x3-as-GEMM (+bias)  +  LayerNorm over the W axis
# ---------------------------------------------------------------------------

def _fused_conv_ln_kernel(p_ref, w_ref, b_ref, g_ref, e_ref, o_ref):
    # p_ref: (bn, W, Kp)   w_ref: (Kp, C2)   b_ref: (1, C2)
    # g_ref/e_ref: (W, C2) (per-branch affine, broadcast over channels)
    # o_ref: (bn, W, C2)
    bn, W, Kp = p_ref.shape
    C2 = w_ref.shape[1]

    # conv as one GEMM over every pixel of the block (MXU), f32 accumulation.
    acc = jnp.dot(p_ref[...].reshape(bn * W, Kp), w_ref[...],
                  preferred_element_type=jnp.float32,
                  precision=lax.Precision.HIGHEST)
    y = acc.reshape(bn, W, C2) + b_ref[...].astype(jnp.float32)

    # LayerNorm over the W axis (== the NCHW last dim in the PyTorch module), independently
    # per (image-row, output-channel).  Biased variance, eps=1e-6 — matches torch LayerNorm.
    mean = jnp.mean(y, axis=1, keepdims=True)
    yc = y - mean
    var = jnp.mean(yc * yc, axis=1, keepdims=True)
    yn = yc * lax.rsqrt(var + EPS)
    out = yn * g_ref[...].astype(jnp.float32) + e_ref[...].astype(jnp.float32)
    o_ref[...] = out.astype(o_ref.dtype)


def patch_embed_parallel_pallas(x, conv_w, conv_b, gamma, beta, *, target_block_rows=256):
    """x: (P, B, C1, H, W) -> (P, B, C2, H, W) = LayerNorm_p(Conv3x3_s1_p1(x_p)).

    The im2col gather and the final NHWC->NCHW transpose are plain-JAX layout plumbing; all
    FLOPs (GEMM + bias + LayerNorm) run in one fused Pallas kernel for BOTH branches."""
    P, B, C1, H, W = x.shape
    C2 = conv_w.shape[0]
    dtype = x.dtype

    # ---- im2col (layout plumbing only) --------------------------------------------------
    xp = jnp.pad(x, ((0, 0), (0, 0), (0, 0), (1, 1), (1, 1)))      # zero pad, like Conv2d
    taps = jnp.stack([xp[..., dy:dy + H, dx:dx + W]
                      for dy in range(3) for dx in range(3)], axis=2)   # (P,B,9,C1,H,W)
    K = 9 * C1
    patches = taps.transpose(0, 1, 4, 5, 2, 3).reshape(P, B * H, W, K)  # (dy,dx,ci) order
    Kp = max(((K + 7) // 8) * 8, 8)                                 # pad contraction dim
    if Kp != K:
        patches = jnp.pad(patches, ((0, 0), (0, 0), (0, 0), (0, Kp - K)))

    wmat = conv_w.transpose(2, 3, 1, 0).reshape(K, C2)              # rows in (dy, dx, ci) order
    if Kp != K:
        wmat = jnp.pad(wmat, ((0, Kp - K), (0, 0)))
    wmat = wmat.astype(dtype)
    bias = conv_b.reshape(1, C2).astype(jnp.float32)
    # gamma/beta index the normalized axis (w); broadcast across output channels (lanes)
    gam = jnp.broadcast_to(gamma[:, :, None].astype(jnp.float32), (P, W, C2))
    bet = jnp.broadcast_to(beta[:, :, None].astype(jnp.float32), (P, W, C2))

    rows = B * H
    bn = _pick_block_rows(rows, W, Kp, C2, dtype, target=target_block_rows)
    grid = (P, pl.cdiv(rows, bn))
    isz = jnp.dtype(dtype).itemsize
    vmem_need = bn * W * (2 * (Kp + C2) * isz + 3 * C2 * 4) + Kp * C2 * isz + 3 * W * C2 * 4

    out = pl.pallas_call(
        _fused_conv_ln_kernel,
        out_shape=jax.ShapeDtypeStruct((P, rows, W, C2), dtype),
        grid=grid,
        in_specs=[
            pl.BlockSpec((None, bn, W, Kp), lambda p, i: (p, i, 0, 0)),   # patches
            pl.BlockSpec((Kp, C2), lambda p, i: (0, 0)),                  # shared conv weight
            pl.BlockSpec((1, C2), lambda p, i: (0, 0)),                   # shared conv bias
            pl.BlockSpec((None, W, C2), lambda p, i: (p, 0, 0)),          # per-branch gamma
            pl.BlockSpec((None, W, C2), lambda p, i: (p, 0, 0)),          # per-branch beta
        ],
        out_specs=pl.BlockSpec((None, bn, W, C2), lambda p, i: (p, i, 0, 0)),
        compiler_params=_compiler_params(("parallel", "parallel"), vmem_need),
        cost_estimate=pl.CostEstimate(
            flops=2 * P * rows * W * Kp * C2 + 8 * P * rows * W * C2,
            transcendentals=P * rows * C2,
            bytes_accessed=P * rows * W * (Kp + C2) * isz + Kp * C2 * isz + 2 * P * W * C2 * 4,
        ),
    )(patches, wmat, bias, gam, bet)

    # back to the PyTorch NCHW layout (layout plumbing only)
    return out.reshape(P, B, H, W, C2).transpose(0, 1, 4, 2, 3)


# ---------------------------------------------------------------------------
# the module
# ---------------------------------------------------------------------------

class PatchEmbedParallel:
    """JAX/Pallas port of PatchEmbedParallel: shared Conv2d(c1, c2, 3, 1, 1) projection
    followed by two independent LayerNorm(c2, eps=1e-6) layers (one per parallel branch),
    LayerNorm applied — exactly as in the PyTorch spec — over the LAST axis of the NCHW
    conv output (which therefore requires W == c2)."""

    def __init__(self, c1=3, c2=32, patch_size=7, stride=4, padding=0, num_modals=4, *, key):
        # patch_size / stride / padding / num_modals are accepted but unused, mirroring the
        # PyTorch module (proj is hard-coded to Conv2d(c1, c2, 3, 1, 1); LayerNormParallel
        # hard-codes num_parallel = 2).
        self.num_parallel = 2
        self.c1, self.c2 = c1, c2

        k_w, k_b, key = jax.random.split(key, 3)
        fan_in = c1 * 9
        bound = 1.0 / math.sqrt(fan_in)                 # PyTorch Conv2d default-init scale
        self.conv_w = jax.random.uniform(k_w, (c2, c1, 3, 3), jnp.float32, -bound, bound)
        self.conv_b = jax.random.uniform(k_b, (c2,), jnp.float32, -bound, bound)

        gammas, betas = [], []
        for _ in range(self.num_parallel):
            k_g, k_e, key = jax.random.split(key, 3)
            # nn.LayerNorm init is (ones, zeros); perturb deterministically so the two
            # parallel layers are distinguishable in the test.
            gammas.append(jnp.ones((c2,), jnp.float32)
                          + 0.1 * jax.random.normal(k_g, (c2,), jnp.float32))
            betas.append(0.1 * jax.random.normal(k_e, (c2,), jnp.float32))
        self.ln_gamma = jnp.stack(gammas)               # (num_parallel, c2)
        self.ln_beta = jnp.stack(betas)                 # (num_parallel, c2)

    def __call__(self, x_parallel):
        assert len(x_parallel) == self.num_parallel, "LayerNormParallel has exactly 2 branches"
        x = jnp.stack(x_parallel, axis=0)               # (P, B, C1, H, W)
        P, B, C1, H, W = x.shape
        # Same runtime constraint nn.LayerNorm(c2) imposes on an NCHW tensor in PyTorch.
        assert W == self.c2, "PyTorch LayerNorm(c2) over NCHW's last dim requires W == c2"

        y = patch_embed_parallel_pallas(x, self.conv_w, self.conv_b,
                                        self.ln_gamma, self.ln_beta)    # (P, B, C2, H, W)
        return [y[i] for i in range(P)], H, W


# ---------------------------------------------------------------------------
# pure-JAX reference + self-test
# ---------------------------------------------------------------------------

def _ref_forward(x, conv_w, conv_b, gamma, beta):
    conv = lax.conv_general_dilated(
        x, conv_w, window_strides=(1, 1), padding=((1, 1), (1, 1)),
        dimension_numbers=("NCHW", "OIHW", "NCHW"),
        precision=lax.Precision.HIGHEST)
    conv = conv + conv_b[None, :, None, None]
    x32 = conv.astype(jnp.float32)
    mean = jnp.mean(x32, axis=-1, keepdims=True)
    var = jnp.mean((x32 - mean) ** 2, axis=-1, keepdims=True)
    y = (x32 - mean) * lax.rsqrt(var + EPS)
    return (y * gamma + beta).astype(x.dtype)


if __name__ == "__main__":
    key = jax.random.PRNGKey(0)
    k0, k1, k_mod = jax.random.split(key, 3)

    batch, c1, c2, height = 2, 3, 32, 8
    width = c2   # required by the module's LayerNorm-over-last-dim semantics

    x0 = jax.random.normal(k0, (batch, c1, height, width), jnp.float32)
    x1 = jax.random.normal(k1, (batch, c1, height, width), jnp.float32)

    module = PatchEmbedParallel(c1=c1, c2=c2, key=k_mod)
    outs, H, W = module([x0, x1])
    outs = [jax.block_until_ready(o) for o in outs]

    assert (H, W) == (height, width)
    for i, (xin, o) in enumerate(zip([x0, x1], outs)):
        ref = _ref_forward(xin, module.conv_w, module.conv_b,
                           module.ln_gamma[i], module.ln_beta[i])
        assert o.shape == (batch, c2, height, width) and o.dtype == xin.dtype
        err = float(jnp.max(jnp.abs(o - ref)))
        assert err < 1e-3, f"branch {i}: max abs err {err}"

    print("KERNEL_OK")
</pallas_src>

<mosaic_0001>
module attributes {stable_mosaic.version = 11 : i64} {
  func.func @_fused_conv_ln_kernel(%arg0: i32, %arg1: i32, %arg2: memref<1x16x32x32xf32, #tpu.memory_space<vmem>>, %arg3: memref<32x32xf32, #tpu.memory_space<vmem>>, %arg4: memref<1x32xf32, #tpu.memory_space<vmem>>, %arg5: memref<1x32x32xf32, #tpu.memory_space<vmem>>, %arg6: memref<1x32x32xf32, #tpu.memory_space<vmem>>, %arg7: memref<1x16x32x32xf32, #tpu.memory_space<vmem>>) attributes {dimension_semantics = [#tpu.dimension_semantics<parallel>, #tpu.dimension_semantics<parallel>], iteration_bounds = array<i64: 2, 1>, scalar_prefetch = 0 : i64, scratch_operands = 0 : i64, tpu.core_type = #tpu.core_type<tc>, window_params = [{transform_indices = @transform_0, window_bounds = array<i64: 1, 16, 32, 32>}, {pipeline_mode = #tpu.pipeline_mode<synchronous>, transform_indices = @transform_1, window_bounds = array<i64: 32, 32>}, {pipeline_mode = #tpu.pipeline_mode<synchronous>, transform_indices = @transform_2, window_bounds = array<i64: 1, 32>}, {transform_indices = @transform_3, window_bounds = array<i64: 1, 32, 32>}, {transform_indices = @transform_4, window_bounds = array<i64: 1, 32, 32>}, {transform_indices = @transform_5, window_bounds = array<i64: 1, 16, 32, 32>}]} {
    %c0 = arith.constant 0 : index
    %c0_0 = arith.constant 0 : index
    %c0_1 = arith.constant 0 : index
    %c0_2 = arith.constant 0 : index
    %0 = vector.load %arg2[%c0, %c0_0, %c0_1, %c0_2] : memref<1x16x32x32xf32, #tpu.memory_space<vmem>>, vector<1x16x32x32xf32>
    %1 = vector.shape_cast %0 : vector<1x16x32x32xf32> to vector<16x32x32xf32>
    %2 = vector.shape_cast %1 : vector<16x32x32xf32> to vector<512x32xf32>
    %c0_3 = arith.constant 0 : index
    %c0_4 = arith.constant 0 : index
    %3 = vector.load %arg3[%c0_3, %c0_4] : memref<32x32xf32, #tpu.memory_space<vmem>>, vector<32x32xf32>
    %cst = arith.constant dense<0.000000e+00> : vector<512x32xf32>
    %4 = tpu.matmul %2, %3, %cst {dimension_numbers = #tpu.dot_dimension_numbers<[1], [0], [0], [1], [0, 0, 1, 1], [], []>, precision = #tpu.contract_precision<fp32>} : vector<512x32xf32>, vector<32x32xf32>, vector<512x32xf32> -> vector<512x32xf32>
    %5 = vector.shape_cast %4 : vector<512x32xf32> to vector<16x32x32xf32>
    %c0_5 = arith.constant 0 : index
    %c0_6 = arith.constant 0 : index
    %6 = vector.load %arg4[%c0_5, %c0_6] : memref<1x32xf32, #tpu.memory_space<vmem>>, vector<1x32xf32>
    %7 = vector.shape_cast %6 : vector<1x32xf32> to vector<1x1x32xf32>
    %8 = vector.broadcast %7 : vector<1x1x32xf32> to vector<16x32x32xf32>
    %9 = arith.addf %5, %8 : vector<16x32x32xf32>
    %cst_7 = arith.constant dense<0.000000e+00> : vector<16x32xf32>
    %10 = vector.multi_reduction <add>, %9, %cst_7 [1] : vector<16x32x32xf32> to vector<16x32xf32>
    %11 = vector.shape_cast %10 : vector<16x32xf32> to vector<16x1x32xf32>
    %cst_8 = arith.constant 3.200000e+01 : f32
    %12 = vector.broadcast %cst_8 : f32 to vector<16x1x32xf32>
    %13 = arith.divf %11, %12 : vector<16x1x32xf32>
    %14 = vector.broadcast %13 : vector<16x1x32xf32> to vector<16x32x32xf32>
    %15 = arith.subf %9, %14 : vector<16x32x32xf32>
    %16 = arith.mulf %15, %15 : vector<16x32x32xf32>
    %cst_9 = arith.constant dense<0.000000e+00> : vector<16x32xf32>
    %17 = vector.multi_reduction <add>, %16, %cst_9 [1] : vector<16x32x32xf32> to vector<16x32xf32>
    %18 = vector.shape_cast %17 : vector<16x32xf32> to vector<16x1x32xf32>
    %cst_10 = arith.constant 3.200000e+01 : f32
    %19 = vector.broadcast %cst_10 : f32 to vector<16x1x32xf32>
    %20 = arith.divf %18, %19 : vector<16x1x32xf32>
    %cst_11 = arith.constant 9.99999997E-7 : f32
    %21 = vector.broadcast %cst_11 : f32 to vector<16x1x32xf32>
    %22 = arith.addf %20, %21 : vector<16x1x32xf32>
    %23 = math.rsqrt %22 : vector<16x1x32xf32>
    %24 = vector.broadcast %23 : vector<16x1x32xf32> to vector<16x32x32xf32>
    %25 = arith.mulf %15, %24 : vector<16x32x32xf32>
    %c0_12 = arith.constant 0 : index
    %c0_13 = arith.constant 0 : index
    %c0_14 = arith.constant 0 : index
    %26 = vector.load %arg5[%c0_12, %c0_13, %c0_14] : memref<1x32x32xf32, #tpu.memory_space<vmem>>, vector<1x32x32xf32>
    %27 = vector.shape_cast %26 : vector<1x32x32xf32> to vector<32x32xf32>
    %28 = vector.shape_cast %27 : vector<32x32xf32> to vector<1x32x32xf32>
    %29 = vector.broadcast %28 : vector<1x32x32xf32> to vector<16x32x32xf32>
    %30 = arith.mulf %25, %29 : vector<16x32x32xf32>
    %c0_15 = arith.constant 0 : index
    %c0_16 = arith.constant 0 : index
    %c0_17 = arith.constant 0 : index
    %31 = vector.load %arg6[%c0_15, %c0_16, %c0_17] : memref<1x32x32xf32, #tpu.memory_space<vmem>>, vector<1x32x32xf32>
    %32 = vector.shape_cast %31 : vector<1x32x32xf32> to vector<32x32xf32>
    %33 = vector.shape_cast %32 : vector<32x32xf32> to vector<1x32x32xf32>
    %34 = vector.broadcast %33 : vector<1x32x32xf32> to vector<16x32x32xf32>
    %35 = arith.addf %30, %34 : vector<16x32x32xf32>
    %c0_18 = arith.constant 0 : index
    %c0_19 = arith.constant 0 : index
    %c0_20 = arith.constant 0 : index
    %c0_21 = arith.constant 0 : index
    %36 = vector.load %arg7[%c0_18, %c0_19, %c0_20, %c0_21] : memref<1x16x32x32xf32, #tpu.memory_space<vmem>>, vector<1x16x32x32xf32>
    %37 = vector.shape_cast %36 : vector<1x16x32x32xf32> to vector<16x32x32xf32>
    %38 = vector.shape_cast %35 : vector<16x32x32xf32> to vector<1x16x32x32xf32>
    tpu.vector_store %arg7[%c0_18, %c0_19, %c0_20, %c0_21], %38 {strides = array<i32>} : memref<1x16x32x32xf32, #tpu.memory_space<vmem>>, vector<1x16x32x32xf32>,
    return
  }
  func.func @transform_0(%arg0: i32, %arg1: i32) -> (i32, i32, i32, i32) {
    %c0_i32 = arith.constant 0 : i32
    %c0_i32_0 = arith.constant 0 : i32
    %c0_i32_1 = arith.constant 0 : i32
    return %arg0, %arg1, %c0_i32, %c0_i32_0 : i32, i32, i32, i32
  }
  func.func @transform_1(%arg0: i32, %arg1: i32) -> (i32, i32) {
    %c0_i32 = arith.constant 0 : i32
    %c0_i32_0 = arith.constant 0 : i32
    %c0_i32_1 = arith.constant 0 : i32
    return %c0_i32, %c0_i32_0 : i32, i32
  }
  func.func @transform_2(%arg0: i32, %arg1: i32) -> (i32, i32) {
    %c0_i32 = arith.constant 0 : i32
    %c0_i32_0 = arith.constant 0 : i32
    %c0_i32_1 = arith.constant 0 : i32
    return %c0_i32, %c0_i32_0 : i32, i32
  }
  func.func @transform_3(%arg0: i32, %arg1: i32) -> (i32, i32, i32) {
    %c0_i32 = arith.constant 0 : i32
    %c0_i32_0 = arith.constant 0 : i32
    %c0_i32_1 = arith.constant 0 : i32
    return %arg0, %c0_i32, %c0_i32_0 : i32, i32, i32
  }
  func.func @transform_4(%arg0: i32, %arg1: i32) -> (i32, i32, i32) {
    %c0_i32 = arith.constant 0 : i32
    %c0_i32_0 = arith.constant 0 : i32
    %c0_i32_1 = arith.constant 0 : i32
    return %arg0, %c0_i32, %c0_i32_0 : i32, i32, i32
  }
  func.func @transform_5(%arg0: i32, %arg1: i32) -> (i32, i32, i32, i32) {
    %c0_i32 = arith.constant 0 : i32
    %c0_i32_0 = arith.constant 0 : i32
    %c0_i32_1 = arith.constant 0 : i32
    return %arg0, %arg1, %c0_i32, %c0_i32_0 : i32, i32, i32, i32
  }
}

</mosaic_0001>

<bundles_post_ra>
// kernel: tpu_custom_call.1
= control target key start
LH: loop header
LB: loop body
LE: loop exit
PB: predicated region body
PF: predicated region fallthrough
CT: control target
= control target key end

     0   :  { %s9267_s0 = inlined_call_operand.hbm [shape: f32[2,16,32,32], index: 0, kind: input, shape index: {}]   ;;  %s9268_s1 = inlined_call_operand.hbm [shape: f32[32,32], index: 1, kind: input, shape index: {}]   ;;  %s9269_s2 = inlined_call_operand.vmem [shape: f32[1,32], index: 2, kind: input, shape index: {}]   ;;  %s9270_s3 = inlined_call_operand.hbm [shape: f32[2,32,32], index: 3, kind: input, shape index: {}]   ;;  %s9271_s4 = inlined_call_operand.hbm [shape: f32[2,32,32], index: 4, kind: input, shape index: {}]   ;;  %s9272_s5 = inlined_call_operand.hbm [shape: f32[2,16,32,32], index: 5, kind: output, shape index: {}]  }
   0x1   :  { %9423 = sst [smem:[#allocation112_spill]] %s9267_s0 }
   0x2   :  { %9424 = sst [smem:[#allocation113_spill]] %s9270_s3 }
   0x3   :  { %10 = vsyncpa [#allocation3], 0 }
   0x4   :  { %12 = vsyncpa [#allocation3 + $0x1], 0 }
   0x5   :  { %13 = vsyncpa [#allocation6], 0 }
   0x6   :  { %14 = vsyncpa [#allocation4], 0 }
   0x7   :  { %16 = vsyncpa [#allocation4 + $0x1], 0  ;;  %s6713_s18 = smov 0   ;;  %s6715_s19 = smov 0  }
   0x8   :  { %s6717_s20 = smov 0   ;;  %s6719_s21 = smov 0  }
   0x9   :  { %s6721_s22 = smov 0   ;;  %s6723_s23 = smov 0  }
   0xa LB: > { %s34_s24 = sadd.s32 1, %s6668_s22  ;;  %s43_s25 = sadd.s32 1, %s6660_s20  ;;  %s6672_s23 = sphi %s6723_s23, %s22_s23   ;;  %s6668_s22 = sphi %s6721_s22, %s9755_s22   ;;  %s6664_s21 = sphi %s6719_s21, %s9754_s21   ;;  %s6660_s20 = sphi %s6717_s20, %s9753_s20   ;;  %s6656_s19 = sphi %s6715_s19, %s9752_s19   ;;  %s6652_s18 = sphi %s6713_s18, %s9751_s18  }
   0xb   : > { %p36_p0 = scmp.ge.s32.totalorder %s34_s24, 2  ;;  %p9273_p1 = scmp.ne.s32.totalorder %s6660_s20, %s6656_s19 }
   0xc   : > { %p51_p2 = scmp.eq.s32.totalorder %s6672_s23, 0  ;;  %p6367_p6 = scmp.lt.s32.totalorder %s6672_s23, 2 }
   0xd   : > { %s9757_s24 = smov (%p36_p0, %s34_s24), 0  ;;  %s218_s28 = sand.u32 1, %s6672_s23  }
   0xe   : > { %9425 = sst [smem:[#allocation14_spill]] %s9757_s24  ;;  %p6753_p3 = por %p51_p2, %p9273_p1 }
   0xf   : > { %s38_s27 = ssub.s32 %s6668_s22, %s9757_s24  ;;  %s220_s29 = sand.u32 1, %s6660_s20  }
  0x10   : > { %p41_p5 = scmp.eq.s32.totalorder %s38_s27, 0  ;;  %s4911_s6 = sshll.u32 %s220_s29, 9 }
  0x11   : > { %s4932_s7 = sshll.u32 %s6668_s22, 13  ;;  %s9427_s0 = sld [smem:[#allocation112_spill]] }
  0x12   : > { %s6764_s30 = scalar_select %p41_p5, %s6660_s20, %s43_s25  }
  0x13   : > { %s222_s11 = scalar_lea.vmem [#allocation2], %s4911_s6  ;;  %p6776_p7 = pnand %p6367_p6, %p6753_p3 }
  0x14   : > { %s232_s12 = sshll.u32 %s222_s11, 4  ;;  %s6780_s14 = sshll.u32 %s220_s29, 5  ;;  %s6772_s12 = int_to_ptr.vmem [resolvable:$true] %s232_s12 }
  0x15   : > { %s4933_s15 = sshll.u32 %s6668_s22, 9  ;;  %s6783_s16 = scalar_lea.sflag [#allocation3], %s218_s28 }
  0x16   : > { %p6789_p9 = pneg %p6776_p7 }
  0x17   : > { %s6770_s10 = scalar_lea.hbm %s9427_s0, %s4932_s7  ;;  %s6469_s6 = scalar_lea.hbm %s9427_s0, 16384 }
  0x18   : > { %s6464_s17 = scalar_lea.hbm %s6770_s10, 8192  ;;  %p6470_p12 = scmp.lt.u32.totalorder %s6770_s10, %s9427_s0 }
  0x19   : > { %p6465_p8 = scmp.ne.s32.totalorder %s6770_s10, %s6464_s17  ;;  %p6471_p13 = scmp.lt.u32.totalorder %s6469_s6, %s6464_s17 }
  0x1a   : > { %p6473_p2 = scmp.lt.u32.totalorder %s6464_s17, %s6770_s10 }
  0x1b   : > { %p6467_p10 = pnand %p6789_p9, %p6465_p8  ;;  %p6472_p0 = por %p6471_p13, %p6470_p12 }
  0x1d   : > { %p6468_p11 = pneg %p6467_p10  ;;  %p6474_p3 = por %p6473_p2, %p6472_p0 }
  0x1f   : > { %p6475_p5 = pnand %p6474_p3, %p6468_p11 }
  0x21   : > { %6478 = shalt.err (!%p6475_p5)
}
  0x22   : > { %s6479_s28 = scalar_lea.vmem %s6772_s12, 8192  ;;  %s6674_s8 = smov [#allocation2]  }
  0x23   : > { %p6480_p6 = scmp.ne.s32.totalorder %s6772_s12, %s6479_s28  ;;  %s6484_s9 = sshll.u32 %s6674_s8, 4  ;;  %s6485_s9 = int_to_ptr.vmem [resolvable:$false] %s6484_s9 }
  0x24   : > { %s6486_s11 = scalar_lea.vmem %s6485_s9, 16384  ;;  %p6487_p4 = scmp.lt.s32.totalorder %s6772_s12, %s6485_s9 }
  0x25   : > { %p6482_p8 = pnand %p6480_p6, %p6789_p9  ;;  %p6488_p1 = scmp.lt.s32.totalorder %s6486_s11, %s6479_s28 }
  0x27   : > { %p6483_p10 = pneg %p6482_p8  ;;  %p6489_p12 = por %p6488_p1, %p6487_p4 }
  0x29   : > { %p6490_p13 = pnand %p6489_p12, %p6483_p10 }
  0x2b   : > { %6493 = shalt.err (!%p6490_p13)
}
  0x2c   : > { %s9274_s17 = smov 128   ;;  %s9276_s26 = smov 8  }
  0x2d   : > { %6355 = dma.hbm_to_vmem [thread:$0]  (!%p6776_p7), %s6770_s10, 8192, %s6772_s12, %s6783_s16, %s9274_s17, %s9274_s17, %s9276_s26  }
  0x2e   : > { %s9430_s3 = sld [smem:[#allocation113_spill]]  ;;  %s246_s7 = scalar_lea.vmem [#allocation7], %s6780_s14 }
  0x2f   : > { %s253_s28 = sshll.u32 %s246_s7, 4  ;;  %s6824_s28 = int_to_ptr.vmem [resolvable:$true] %s253_s28 }
  0x34   : > { %s6821_s29 = scalar_lea.hbm %s9430_s3, %s4933_s15  ;;  %s6499_s9 = scalar_lea.hbm %s9430_s3, 1024 }
  0x35   : > { %s6494_s8 = scalar_lea.hbm %s6821_s29, 512  ;;  %p6500_p0 = scmp.lt.u32.totalorder %s6821_s29, %s9430_s3 }
  0x36   : > { %p6495_p1 = scmp.ne.s32.totalorder %s6821_s29, %s6494_s8  ;;  %p6501_p2 = scmp.lt.u32.totalorder %s6499_s9, %s6494_s8 }
  0x37   : > { %p6503_p5 = scmp.lt.u32.totalorder %s6494_s8, %s6821_s29 }
  0x38   : > { %p6497_p4 = pnand %p6495_p1, %p6789_p9  ;;  %p6502_p3 = por %p6501_p2, %p6500_p0 }
  0x3a   : > { %p6498_p11 = pneg %p6497_p4  ;;  %p6504_p6 = por %p6503_p5, %p6502_p3 }
  0x3c   : > { %p6505_p8 = pnand %p6504_p6, %p6498_p11 }
  0x3e   : > { %6508 = shalt.err (!%p6505_p8)
}
  0x3f   : > { %s6509_s6 = scalar_lea.vmem %s6824_s28, 512  ;;  %s6677_s7 = smov [#allocation7]  }
  0x40   : > { %p6510_p10 = scmp.ne.s32.totalorder %s6824_s28, %s6509_s6  ;;  %s6514_s10 = sshll.u32 %s6677_s7, 4  ;;  %s6515_s10 = int_to_ptr.vmem [resolvable:$false] %s6514_s10 }
  0x41   : > { %s6516_s12 = scalar_lea.vmem %s6515_s10, 1024  ;;  %p6517_p1 = scmp.lt.s32.totalorder %s6824_s28, %s6515_s10 }
  0x42   : > { %p6512_p12 = pnand %p6510_p10, %p6789_p9  ;;  %p6518_p4 = scmp.lt.s32.totalorder %s6516_s12, %s6509_s6 }
  0x44   : > { %p6513_p13 = pneg %p6512_p12  ;;  %p6519_p0 = por %p6518_p4, %p6517_p1 }
  0x46   : > { %p6520_p2 = pnand %p6519_p0, %p6513_p13 }
  0x48   : > { %6523 = shalt.err (!%p6520_p2)
}
  0x49   : > { %6358 = dma.hbm_to_vmem [thread:$0]  (!%p6776_p7), %s6821_s29, 512, %s6824_s28, %s6783_s16, %s9274_s17, %s9274_s17, %s9276_s26  }
  0x4a   : > { %s6852_s8 = sadd.s32 4294967295, %s6672_s23   ;;  %s4907_s9 = sadd.s32 4294967294, %s6672_s23  }
  0x4b   : > { %p56_p11 = scmp.ne.s32.totalorder %s6656_s19, %s6652_s18  ;;  %p9279_p3 = scmp.eq.s32.totalorder %s6852_s8, 0 }
  0x4c   : > { %p176_p5 = scmp.eq.s32.totalorder %s6852_s8, 1  ;;  %p182_p6 = scmp.eq.s32.totalorder %s4907_s9, 1 }
  0x4d   : > { %p4908_p8 = scmp.ge.s32.totalorder %s6672_s23, 1  ;;  %p6862_p10 = por %p9279_p3, %p56_p11 }
  0x4e   : > { %p9432_p12 = scmp.ne.s32.totalorder %s6660_s20, %s6656_s19  ;;  %p6873_p1 = por %p182_p6, %p56_p11 }
  0x4f   : > { %s9431_s11 = scalar_select %p6862_p10, 1, 0 }
  0x50   : > { %p6869_p13 = por %p176_p5, %p9432_p12  ;;  %p189_p4 = scmp.lt.s32.totalorder %s6672_s23, 3 }
  0x51   : > { %s9434_s28 = scalar_select %p6873_p1, 1, 0 }
  0x52   : > { %s9433_s29 = scalar_select %p6869_p13, 1, 0 }
  0x53   : > { %p6878_p0 = pnand %p4908_p8, %p189_p4  ;;  %s6678_s6 = smov [#allocation5]  }
  0x54   : > { %s201_s7 = sshll.u32 %s6678_s6, 4  ;;  %s6889_s9 = scalar_lea.hbm %s9271_s4, %s4933_s15  ;;  %s6891_s7 = int_to_ptr.vmem [resolvable:$true] %s201_s7 }
  0x55   : > { %s9435_s27 = scalar_select %p6878_p0, 1, 0 }
  0x56   : > { %p6348_p2 = pneg %p6878_p0  ;;  %s267_s17 = scalar_lea.vmem [#allocation8], %s6780_s14 }
  0x57   : > { %s274_s26 = sshll.u32 %s267_s17, 4  ;;  %s6524_s6 = scalar_lea.hbm %s6889_s9, 512  ;;  %s6900_s26 = int_to_ptr.vmem [resolvable:$true] %s274_s26 }
  0x58   : > { %p6896_p11 = pnand %p6348_p2, %p9279_p3  ;;  %p6525_p5 = scmp.ne.s32.totalorder %s6889_s9, %s6524_s6 }
  0x59   : > { %s6529_s12 = scalar_lea.hbm %s9271_s4, 1024  ;;  %p6530_p12 = scmp.lt.u32.totalorder %s6889_s9, %s9271_s4 }
  0x5a   : > { %s9436_s0 = scalar_select %p6896_p11, 1, 0 }
  0x5b   : > { %p6527_p6 = pnand %p6525_p5, %p6789_p9  ;;  %p6531_p4 = scmp.lt.u32.totalorder %s6529_s12, %s6524_s6 }
  0x5c   : > { %p6533_p3 = scmp.lt.u32.totalorder %s6524_s6, %s6889_s9 }
  0x5d   : > { %p6528_p8 = pneg %p6527_p6  ;;  %p6532_p2 = por %p6531_p4, %p6530_p12 }
  0x5f   : > { %p6534_p1 = por %p6533_p3, %p6532_p2 }
  0x61   : > { %p6535_p13 = pnand %p6534_p1, %p6528_p8 }
  0x63   : > { %6538 = shalt.err (!%p6535_p13)
}
  0x64   : > { %s6539_s14 = scalar_lea.vmem %s6900_s26, 512  ;;  %s6679_s17 = smov [#allocation8]  }
  0x65   : > { %p6540_p5 = scmp.ne.s32.totalorder %s6900_s26, %s6539_s14  ;;  %s6544_s15 = sshll.u32 %s6679_s17, 4  ;;  %s6545_s15 = int_to_ptr.vmem [resolvable:$false] %s6544_s15 }
  0x66   : > { %s6546_s3 = scalar_lea.vmem %s6545_s15, 1024  ;;  %p6547_p0 = scmp.lt.s32.totalorder %s6900_s26, %s6545_s15 }
  0x67   : > { %p6542_p6 = pnand %p6540_p5, %p6789_p9  ;;  %p6548_p11 = scmp.lt.s32.totalorder %s6546_s3, %s6539_s14 }
  0x69   : > { %p6543_p10 = pneg %p6542_p6  ;;  %p6549_p12 = por %p6548_p11, %p6547_p0 }
  0x6b   : > { %p6550_p4 = pnand %p6549_p12, %p6543_p10 }
  0x6d   : > { %6553 = shalt.err (!%p6550_p4)
}
  0x6e   : > { %s9437_s24 = smov 8   ;;  %s9438_s6 = smov 128  }
  0x6f   : > { %6361 = dma.hbm_to_vmem [thread:$0]  (!%p6776_p7), %s6889_s9, 512, %s6900_s26, %s6783_s16, %s9438_s6, %s9438_s6, %s9437_s24  }
  0x70   : > { %s6554_s12 = scalar_lea.hbm %s9268_s1, 512  ;;  %p9439_p3 = scmp.ne.s32.totalorder %s9436_s0, 0 }
  0x71   : > { %p6555_p9 = scmp.ne.s32.totalorder %s9268_s1, %s6554_s12  ;;  %p6561_p0 = scmp.lt.u32.totalorder %s6554_s12, %s9268_s1 }
  0x72   : > { %p6556_p10 = pneg %p9439_p3 }
  0x74   : > { %p6557_p13 = pnand %p6556_p10, %p6555_p9 }
  0x76   : > { %p6558_p1 = pneg %p6557_p13 }
  0x78   : > { %p6563_p11 = pnand %p6561_p0, %p6558_p1 }
  0x7a   : > { %6566 = shalt.err (!%p6563_p11)
}
  0x7b   : > { %s6567_s16 = scalar_lea.vmem %s6891_s7, 512  ;;  %p6575_p5 = scmp.lt.s32.totalorder %s6891_s7, %s6891_s7 }
  0x7c   : > { %p6568_p7 = scmp.ne.s32.totalorder %s6891_s7, %s6567_s16  ;;  %p6576_p6 = scmp.lt.s32.totalorder %s6567_s16, %s6567_s16 }
  0x7e   : > { %p6570_p8 = pnand %p6568_p7, %p6556_p10  ;;  %p6577_p12 = por %p6576_p6, %p6575_p5 }
  0x80   : > { %p6571_p2 = pneg %p6570_p8 }
  0x82   : > { %p6578_p4 = pnand %p6577_p12, %p6571_p2 }
  0x84   : > { %6581 = shalt.err (!%p6578_p4)
}
  0x85   : > { %6351 = dma.hbm_to_vmem [thread:$0]  (!%p9439_p3), %s9268_s1, 512, %s6891_s7, [#allocation6], %s9438_s6, %s9438_s6, %s9437_s24  }
  0x86   : > { %p9440_p9 = scmp.ne.s32.totalorder %s9435_s27, 0 }
  0x88   : > { %286 = sbr.rel (%p9440_p9) target bundleno = 926 (0x39e), region = 40 }
  0x8f   : > { %s288_s3 = sand.u32 1, %s6852_s8   ;;  %s6955_s25 = sand.u32 1, %s6656_s19  }
  0x90   : > { %s4921_s0 = sshll.u32 %s6955_s25, 9  ;;  %s289_s10 = scalar_lea.sflag [#allocation3], %s288_s3 }
  0x91   : > { %s6960_s12 = scalar_lea.vmem [#allocation2], %s4921_s0  ;;  %p9441_p10 = scmp.ne.s32.totalorder %s9431_s11, 0 }
  0x93   : > { %6635 = dma.done.wait (%p9441_p10), %s289_s10, 8192  }
  0x94   : > { %6637 = vsyncadd (%p9441_p10), %s289_s10, 4294959104  ;;  %p9442_p3 = scmp.eq.s32.totalorder %s6852_s8, 0 }
  0x96   : > { %6639 = dma.done.wait (%p9442_p3), [#allocation6], 512   ;;  %p9443_p13 = pmov %p9442_p3 }
  0x97   : > { %s4923_s27 = sshll.u32 %s6955_s25, 5 }
  0x98   : > { %6641 = vsyncadd (%p9443_p13), [#allocation6], 4294966784  ;;  %s6973_s7 = scalar_lea.vmem [#allocation7], %s4923_s27 }
  0x99   : > { %6643 = dma.done.wait (%p9441_p10), %s289_s10, 1024  }
  0x9a   : > { %6645 = vsyncadd (%p9441_p10), %s289_s10, 4294966272  ;;  %vm421_vm0 = vcmask 261120   ;;  %v417_v0 = vld [vmem:[#allocation5] sm:$0xff]  ;;  %v418_v1 = vld [vmem:[#allocation5 + $0x8] sm:$0xff]  ;;  %s8167_s24 = scalar_lea.vmem [#allocation8], %s4923_s27  ;;  %s8217_s6 = scalar_lea.vmem [#allocation9], %s4921_s0 }
  0x9b   : > { %v6979_v2 = vld [vmem:[#allocation5 + $0x10] sm:$0xff]  ;;  %v615_v3 = vand.u32 4294901760, %v417_v0  ;;  %v618_v4 = vand.u32 4294901760, %v418_v1  ;;  %v6981_v5 = vld [vmem:[#allocation5 + $0x18] sm:$0xff]  ;;  %v353_v7 = vld [vmem:[%s6960_s12] sm:$0xff]  ;;  %s4935_s13 = sshll.u32 %s6664_s21, 13 }
  0x9c   : > { %v9285_v6 = vand.u32 4294901760, %v6979_v2  ;;  %v354_v8 = vld [vmem:[%s6960_s12 + $0x8] sm:$0xff]  ;;  %v9284_v9 = vand.u32 4294901760, %v6981_v5  ;;  %v423_v10 = vsel %vm421_vm0, %v353_v7, 0  ;;  %v355_v12 = vld [vmem:[%s6960_s12 + $0x10] sm:$0xff]  ;;  %v356_v13 = vld [vmem:[%s6960_s12 + $0x18] sm:$0xff]  ;;  %s9204_s9 = scalar_lea.hbm %s9272_s5, %s4935_s13 }
  0x9d   : > { %v426_v11 = vsel %vm421_vm0, %v354_v8, 0  ;;  %v6991_v14 = vpack.c.bf16 %v618_v4, %v615_v3  ;;  %v6993_v15 = vand.u32 4294901760, %v423_v10  ;;  %v6997_v17 = vsub.f32 %v417_v0, %v615_v3  ;;  %v357_v18 = vld [vmem:[%s6960_s12 + $0x20] sm:$0xff]  ;;  %v358_v19 = vld [vmem:[%s6960_s12 + $0x28] sm:$0xff]  ;;  %v359_v40 = vld [vmem:[%s6960_s12 + $0x30] sm:$0xff]  ;;  %s4769_s14 = sshll.u32 %s8217_s6, 4  ;;  %s9206_s14 = int_to_ptr.vmem [resolvable:$true] %s4769_s14 }
  0x9e   : > { %v6995_v16 = vand.u32 4294901760, %v426_v11  ;;  %v7005_v20 = vpack.c.bf16 %v9284_v9, %v9285_v6  ;;  %v7007_v21 = vsub.f32 %v418_v1, %v618_v4  ;;  %v429_v22 = vsel %vm421_vm0, %v355_v12, 0  ;;  %v360_v49 = vld [vmem:[%s6960_s12 + $0x38] sm:$0xff]  ;;  %v361_v50 = vld [vmem:[%s6960_s12 + $0x40] sm:$0xff]  ;;  %v362_v59 = vld [vmem:[%s6960_s12 + $0x48] sm:$0xff]  ;;  %s4753_s21 = scalar_lea.sflag [#allocation4], %s6955_s25 }
  0x9f   : > { %v432_v23 = vsel %vm421_vm0, %v356_v13, 0  ;;  %5969 = vmatprep.subr.bf16.mxu1 %v6991_v14  ;;  %5993 = vmatprep.subr.bf16.mxu0 %v6991_v14  ;;  %v7014_v24 = vsub.f32 %v423_v10, %v6993_v15  ;;  %v1326_v26 = vand.u32 4294901760, %v6997_v17  ;;  %v7020_v27 = vand.u32 4294901760, %v429_v22  ;;  %v363_v60 = vld [vmem:[%s6960_s12 + $0x50] sm:$0xff]  ;;  %v364_v8 = vld [vmem:[%s6960_s12 + $0x58] sm:$0xff]  ;;  %s6582_s3 = scalar_lea.vmem %s9206_s14, 8192 }
  0xa0   : > { %v7017_v25 = vsub.f32 %v426_v11, %v6995_v16  ;;  %5971 = vmatpush3.bf16.msra.mxu1 %v6991_v14  ;;  %5995 = vmatpush3.bf16.msra.mxu0 %v6991_v14  ;;  %v1333_v28 = vand.u32 4294901760, %v7007_v21  ;;  %v7025_v29 = vand.u32 4294901760, %v432_v23  ;;  %v435_v30 = vsel %vm421_vm0, %v357_v18, 0  ;;  %v375_v6 = vld [vmem:[%s6960_s12 + $0xb0] sm:$0xff]  ;;  %p6583_p1 = scmp.ne.s32.totalorder %s9206_s14, %s6582_s3  ;;  %p9747_p0 = scmp.ne.s32.totalorder %s9433_s29, 0 }
  0xa1   : > { %9444 = vst [vmem:[#allocation15_spill] sm:$0xff] %v7014_v24  ;;  %v438_v31 = vsel %vm421_vm0, %v358_v19, 0  ;;  %5973 = vmatprep.subr.bf16.mxu1 %v7005_v20  ;;  %5997 = vmatprep.subr.bf16.mxu0 %v7005_v20  ;;  %v685_v32 = vand.u32 4294901760, %v7014_v24  ;;  %v1327_v34 = vsub.f32 %v6997_v17, %v1326_v26  ;;  %v7035_v35 = vsub.f32 %v429_v22, %v7020_v27  ;;  %s6680_s0 = smov [#allocation9]  }
  0xa2   : > { %9445 = vst [vmem:[#allocation16_spill] sm:$0xff] %v7017_v25  ;;  %v695_v33 = vand.u32 4294901760, %v7017_v25  ;;  %v1334_v36 = vsub.f32 %v7007_v21, %v1333_v28  ;;  %v6000_v37 = vpack.c.bf16 %v1333_v28, %v1326_v26  ;;  %v7039_v38 = vsub.f32 %v432_v23, %v7025_v29  ;;  %v365_v26 = vld [vmem:[%s6960_s12 + $0x60] sm:$0xff]  ;;  %p6584_p11 = pnand %p6583_p1, %p9747_p0  ;;  %s6586_s10 = sshll.u32 %s6680_s0, 4  ;;  %s6587_s10 = int_to_ptr.vmem [resolvable:$false] %s6586_s10 }
  0xa3   : > { %9446 = vst [vmem:[#allocation17_spill] sm:$0xff] %v7035_v35  ;;  %v7041_v39 = vand.u32 4294901760, %v435_v30  ;;  %v686_v41 = vsub.f32 %v7014_v24, %v685_v32  ;;  %5664 = vmatprep.mubr.f32.mxu0 %v685_v32  ;;  %v1328_v43 = vand.u32 4294901760, %v1327_v34  ;;  %v705_v44 = vand.u32 4294901760, %v7035_v35  ;;  %v385_v24 = vld [vmem:[%s6960_s12 + $0x100] sm:$0xff]  ;;  %p6589_p8 = scmp.lt.s32.totalorder %s9206_s14, %s6587_s10 }
  0xa4   : > { %9447 = vst [vmem:[#allocation18_spill] sm:$0xff] %v7039_v38  ;;  %v696_v42 = vsub.f32 %v7017_v25, %v695_v33  ;;  %5975 = vmatpush3.bf16.msra.mxu1 %v7005_v20  ;;  %5999 = vmatpush3.bf16.msra.mxu0 %v7005_v20  ;;  %v1335_v45 = vand.u32 4294901760, %v1334_v36  ;;  %v715_v46 = vand.u32 4294901760, %v7039_v38  ;;  %v7053_v48 = vand.u32 4294901760, %v438_v31  ;;  %p6585_p7 = pneg %p6584_p11 }
  0xa5   : > { %v7051_v47 = vsub.f32 %v435_v30, %v7041_v39  ;;  %v687_v51 = vand.u32 4294901760, %v686_v41  ;;  %6001 = vmatprep.subr.bf16.mxu0 %v6000_v37  ;;  %v706_v53 = vsub.f32 %v7035_v35, %v705_v44  ;;  %v441_v54 = vsel %vm421_vm0, %v359_v40, 0  ;;  %v366_v40 = vld [vmem:[%s6960_s12 + $0x68] sm:$0xff] }
  0xa6   : > { %v697_v52 = vand.u32 4294901760, %v696_v42  ;;  %v5976_v55 = vpack.c.bf16 %v1335_v45, %v1328_v43  ;;  %v716_v56 = vsub.f32 %v7039_v38, %v715_v46  ;;  %v7062_v58 = vsub.f32 %v438_v31, %v7053_v48 }
  0xa7   : > { %9448 = vst [vmem:[#allocation19_spill] sm:$0xff] %v7051_v47  ;;  %v725_v57 = vand.u32 4294901760, %v7051_v47  ;;  %5352 = vmatprep.mubr.f32.mxu1 %v687_v51  ;;  %5665 = vmatmul.mubr.f32.vlgmr.msra.gmra.mrb[0].mxu0 %v695_v33  ;;  %v707_v61 = vand.u32 4294901760, %v706_v53  ;;  %v7066_v62 = vand.u32 4294901760, %v441_v54  ;;  %v444_v63 = vsel %vm421_vm0, %v360_v49, 0  ;;  %v367_v51 = vld [vmem:[%s6960_s12 + $0x70] sm:$0xff] }
  0xa8   : > { %9449 = vst [vmem:[#allocation20_spill] sm:$0xff] %v7062_v58  ;;  %v447_v0 = vsel %vm421_vm0, %v361_v50, 0  ;;  %5353 = vmatmul.mubr.f32.vlgmr.msra.gmra.mrb[0].mxu1 %v697_v52  ;;  %5977 = vmatprep.subr.bf16.mxu1 %v5976_v55  ;;  %v717_v1 = vand.u32 4294901760, %v716_v56  ;;  %v735_v4 = vand.u32 4294901760, %v7062_v58  ;;  %v7072_v7 = vand.u32 4294901760, %v444_v63 }
  0xa9   : > { %v726_v3 = vsub.f32 %v7051_v47, %v725_v57  ;;  %5979 = vmatpush3.bf16.msra.mxu1 %v5976_v55  ;;  %6003 = vmatpush3.bf16.msra.mxu0 %v6000_v37  ;;  %v7076_v10 = vsub.f32 %v441_v54, %v7066_v62  ;;  %v7078_v11 = vand.u32 4294901760, %v447_v0  ;;  %v450_v12 = vsel %vm421_vm0, %v362_v59, 0 }
  0xaa   : > { %v453_v13 = vsel %vm421_vm0, %v363_v60, 0  ;;  %5355 = vmatprep.mubr.f32.mxu1 %v707_v61  ;;  %5667 = vmatprep.mubr.f32.mxu0 %v705_v44  ;;  %v736_v19 = vsub.f32 %v7062_v58, %v735_v4  ;;  %v7084_v22 = vsub.f32 %v444_v63, %v7072_v7  ;;  %v7086_v23 = vand.u32 4294901760, %v450_v12  ;;  %v368_v61 = vld [vmem:[%s6960_s12 + $0x78] sm:$0xff]  ;;  %v369_v63 = vld [vmem:[%s6960_s12 + $0x80] sm:$0xff] }
  0xab   : > { %9450 = vst [vmem:[#allocation21_spill] sm:$0xff] %v7076_v10  ;;  %v727_v18 = vand.u32 4294901760, %v726_v3  ;;  %5668 = vmatmul.mubr.f32.gmra.mrb[2].mxu0 %v715_v46  ;;  %v745_v28 = vand.u32 4294901760, %v7076_v10  ;;  %v7091_v30 = vsub.f32 %v447_v0, %v7078_v11  ;;  %v7093_v31 = vand.u32 4294901760, %v453_v13 }
  0xac   : > { %9451 = vst [vmem:[#allocation22_spill] sm:$0xff] %v7084_v22  ;;  %v456_v32 = vsel %vm421_vm0, %v364_v8, 0  ;;  %5356 = vmatmul.mubr.f32.gmra.mrb[2].mxu1 %v717_v1  ;;  %5670 = vmatprep.mubr.f32.mxu0 %v725_v57  ;;  %v737_v33 = vand.u32 4294901760, %v736_v19  ;;  %v755_v34 = vand.u32 4294901760, %v7084_v22  ;;  %v7098_v36 = vsub.f32 %v450_v12, %v7086_v23  ;;  %v371_v19 = vld [vmem:[%s6960_s12 + $0x90] sm:$0xff] }
  0xad   : > { %9452 = vst [vmem:[#allocation23_spill] sm:$0xff] %v7091_v30  ;;  %v7100_v37 = vand.u32 4294901760, %v456_v32  ;;  %5358 = vmatprep.mubr.f32.mxu1 %v727_v18  ;;  %v746_v41 = vsub.f32 %v7076_v10, %v745_v28  ;;  %v765_v42 = vand.u32 4294901760, %v7091_v30  ;;  %v7106_v43 = vsub.f32 %v453_v13, %v7093_v31  ;;  %v370_v18 = vld [vmem:[%s6960_s12 + $0x88] sm:$0xff] }
  0xae   : > { %9453 = vst [vmem:[#allocation24_spill] sm:$0xff] %v7098_v36  ;;  %v459_v44 = vsel %vm421_vm0, %v365_v26, 0  ;;  %v756_v45 = vsub.f32 %v7084_v22, %v755_v34  ;;  %v775_v46 = vand.u32 4294901760, %v7098_v36  ;;  %v462_v55 = vsel %vm421_vm0, %v366_v40, 0 }
  0xaf   : > { %9454 = vst [vmem:[#allocation25_spill] sm:$0xff] %v7106_v43  ;;  %v7112_v49 = vsub.f32 %v456_v32, %v7100_v37  ;;  %v7114_v50 = vand.u32 4294901760, %v459_v44  ;;  %5671 = vmatmul.mubr.f32.gmra.mrb[4].mxu0 %v735_v4  ;;  %v747_v52 = vand.u32 4294901760, %v746_v41  ;;  %v766_v53 = vsub.f32 %v7091_v30, %v765_v42 }
  0xb0   : > { %v785_v54 = vand.u32 4294901760, %v7106_v43  ;;  %5359 = vmatmul.mubr.f32.gmra.mrb[4].mxu1 %v737_v33  ;;  %5673 = vmatprep.mubr.f32.mxu0 %v745_v28  ;;  %v757_v56 = vand.u32 4294901760, %v756_v45  ;;  %v776_v57 = vsub.f32 %v7098_v36, %v775_v46  ;;  %v7128_v3 = vand.u32 4294901760, %v462_v55 }
  0xb1   : > { %9455 = vst [vmem:[#allocation26_spill] sm:$0xff] %v7112_v49  ;;  %v795_v59 = vand.u32 4294901760, %v7112_v49  ;;  %v7123_v60 = vsub.f32 %v459_v44, %v7114_v50  ;;  %5361 = vmatprep.mubr.f32.mxu1 %v747_v52  ;;  %v767_v0 = vand.u32 4294901760, %v766_v53  ;;  %v465_v4 = vsel %vm421_vm0, %v367_v51, 0 }
  0xb2   : > { %v786_v1 = vsub.f32 %v7106_v43, %v785_v54  ;;  %v7133_v13 = vand.u32 4294901760, %v465_v4  ;;  %v777_v26 = vand.u32 4294901760, %v776_v57  ;;  %v7138_v28 = vsub.f32 %v462_v55, %v7128_v3 }
  0xb3   : > { %9456 = vst [vmem:[#allocation27_spill] sm:$0xff] %v7123_v60  ;;  %v796_v8 = vsub.f32 %v7112_v49, %v795_v59  ;;  %v805_v12 = vand.u32 4294901760, %v7123_v60  ;;  %5674 = vmatmul.mubr.f32.gmra.mrb[6].mxu0 %v755_v34  ;;  %v468_v32 = vsel %vm421_vm0, %v368_v61, 0  ;;  %v471_v33 = vsel %vm421_vm0, %v369_v63, 0  ;;  %v372_v34 = vld [vmem:[%s6960_s12 + $0x98] sm:$0xff]  ;;  %v373_v63 = vld [vmem:[%s6960_s12 + $0xa0] sm:$0xff] }
  0xb4   : > { %9457 = vst [vmem:[#allocation28_spill] sm:$0xff] %v7138_v28  ;;  %5362 = vmatmul.mubr.f32.gmra.mrb[6].mxu1 %v757_v56  ;;  %5676 = vmatprep.mubr.f32.mxu0 %v765_v42  ;;  %v787_v40 = vand.u32 4294901760, %v786_v1  ;;  %v7144_v44 = vsub.f32 %v465_v4, %v7133_v13  ;;  %v7146_v45 = vand.u32 4294901760, %v468_v32  ;;  %v815_v51 = vand.u32 4294901760, %v7138_v28  ;;  %v376_v49 = vld [vmem:[%s6960_s12 + $0xb8] sm:$0xff] }
  0xb5   : > { %v806_v41 = vsub.f32 %v7123_v60, %v805_v12  ;;  %5364 = vmatprep.mubr.f32.mxu1 %v767_v0  ;;  %v7150_v52 = vand.u32 4294901760, %v471_v33  ;;  %v474_v53 = vsel %vm421_vm0, %v370_v18, 0  ;;  %v477_v55 = vsel %vm421_vm0, %v371_v19, 0 }
  0xb6   : > { %9458 = vst [vmem:[#allocation29_spill] sm:$0xff] %v7144_v44  ;;  %v797_v56 = vand.u32 4294901760, %v796_v8  ;;  %v825_v42 = vand.u32 4294901760, %v7144_v44  ;;  %v7156_v57 = vsub.f32 %v468_v32, %v7146_v45  ;;  %v7158_v61 = vand.u32 4294901760, %v474_v53 }
  0xb7   : > { %5677 = vmatmul.mubr.f32.gmra.mrb[8].mxu0 %v775_v46  ;;  %v807_v0 = vand.u32 4294901760, %v806_v41  ;;  %v7162_v1 = vsub.f32 %v471_v33, %v7150_v52  ;;  %v7164_v4 = vand.u32 4294901760, %v477_v55  ;;  %v480_v18 = vsel %vm421_vm0, %v372_v34, 0  ;;  %v374_v46 = vld [vmem:[%s6960_s12 + $0xa8] sm:$0xff] }
  0xb8   : > { %9459 = vst [vmem:[#allocation30_spill] sm:$0xff] %v7156_v57  ;;  %5365 = vmatmul.mubr.f32.gmra.mrb[8].mxu1 %v777_v26  ;;  %5679 = vmatprep.mubr.f32.mxu0 %v785_v54  ;;  %v816_v8 = vsub.f32 %v7138_v28, %v815_v51  ;;  %v835_v19 = vand.u32 4294901760, %v7156_v57  ;;  %v7170_v32 = vsub.f32 %v474_v53, %v7158_v61  ;;  %v7172_v9 = vand.u32 4294901760, %v480_v18 }
  0xb9   : > { %9460 = vst [vmem:[#allocation31_spill] sm:$0xff] %v7162_v1  ;;  %5367 = vmatprep.mubr.f32.mxu1 %v787_v40  ;;  %v826_v33 = vsub.f32 %v7144_v44, %v825_v42  ;;  %v845_v41 = vand.u32 4294901760, %v7162_v1  ;;  %v7178_v34 = vsub.f32 %v477_v55, %v7164_v4  ;;  %v483_v54 = vsel %vm421_vm0, %v373_v63, 0 }
  0xba   : > { %9461 = vst [vmem:[#allocation32_spill] sm:$0xff] %v7170_v32  ;;  %v836_v26 = vsub.f32 %v7156_v57, %v835_v19  ;;  %v855_v53 = vand.u32 4294901760, %v7170_v32  ;;  %v7185_v28 = vsub.f32 %v480_v18, %v7172_v9  ;;  %v7187_v40 = vand.u32 4294901760, %v483_v54 }
  0xbb   : > { %9462 = vst [vmem:[#allocation33_spill] sm:$0xff] %v7178_v34  ;;  %5680 = vmatmul.mubr.f32.gmra.mrb[10].mxu0 %v795_v59  ;;  %v486_v44 = vsel %vm421_vm0, %v374_v46, 0  ;;  %v817_v55 = vand.u32 4294901760, %v816_v8  ;;  %v846_v63 = vsub.f32 %v7162_v1, %v845_v41  ;;  %v865_v57 = vand.u32 4294901760, %v7178_v34  ;;  %v377_v59 = vld [vmem:[%s6960_s12 + $0xc0] sm:$0xff]  ;;  %v378_v8 = vld [vmem:[%s6960_s12 + $0xc8] sm:$0xff] }
  0xbc   : > { %9463 = vst [vmem:[#allocation34_spill] sm:$0xff] %v7185_v28  ;;  %5368 = vmatmul.mubr.f32.gmra.mrb[10].mxu1 %v797_v56  ;;  %5682 = vmatprep.mubr.f32.mxu0 %v805_v12  ;;  %v7192_v60 = vand.u32 4294901760, %v486_v44  ;;  %v827_v18 = vand.u32 4294901760, %v826_v33  ;;  %v7197_v43 = vsub.f32 %v483_v54, %v7187_v40  ;;  %v489_v46 = vsel %vm421_vm0, %v375_v6, 0  ;;  %v379_v1 = vld [vmem:[%s6960_s12 + $0xd0] sm:$0xff] }
  0xbd   : > { %5370 = vmatprep.mubr.f32.mxu1 %v807_v0  ;;  %v837_v36 = vand.u32 4294901760, %v836_v26  ;;  %v856_v12 = vsub.f32 %v7170_v32, %v855_v53  ;;  %v7201_v56 = vand.u32 4294901760, %v489_v46  ;;  %v875_v30 = vand.u32 4294901760, %v7185_v28 }
  0xbe   : > { %9464 = vst [vmem:[#allocation35_spill] sm:$0xff] %v7197_v43  ;;  %v7207_v22 = vsub.f32 %v486_v44, %v7192_v60  ;;  %v492_v0 = vsel %vm421_vm0, %v376_v49, 0  ;;  %v495_v33 = vsel %vm421_vm0, %v377_v59, 0  ;;  %v847_v6 = vand.u32 4294901760, %v846_v63 }
  0xbf   : > { %5683 = vmatmul.mubr.f32.gmra.mrb[12].mxu0 %v815_v51  ;;  %v866_v54 = vsub.f32 %v7178_v34, %v865_v57  ;;  %v885_v26 = vand.u32 4294901760, %v7197_v43  ;;  %v7213_v32 = vand.u32 4294901760, %v492_v0  ;;  %v380_v51 = vld [vmem:[%s6960_s12 + $0xd8] sm:$0xff]  ;;  %v7217_v10 = vsub.f32 %v489_v46, %v7201_v56 }
  0xc0   : > { %9465 = vst [vmem:[#allocation36_spill] sm:$0xff] %v7207_v22  ;;  %5371 = vmatmul.mubr.f32.gmra.mrb[12].mxu1 %v817_v55  ;;  %5685 = vmatprep.mubr.f32.mxu0 %v825_v42  ;;  %v7219_v44 = vand.u32 4294901760, %v495_v33  ;;  %v498_v49 = vsel %vm421_vm0, %v378_v8, 0  ;;  %v501_v59 = vsel %vm421_vm0, %v379_v1, 0  ;;  %v381_v42 = vld [vmem:[%s6960_s12 + $0xe0] sm:$0xff]  ;;  %v876_v63 = vsub.f32 %v7185_v28, %v875_v30 }
  0xc1   : > { %5373 = vmatprep.mubr.f32.mxu1 %v827_v18  ;;  %9466 = vst [vmem:[#allocation37_spill] sm:$0xff] %v7217_v10  ;;  %v7223_v55 = vand.u32 4294901760, %v498_v49  ;;  %v895_v34 = vand.u32 4294901760, %v7207_v22  ;;  %v7228_v58 = vand.u32 4294901760, %v501_v59  ;;  %v504_v18 = vsel %vm421_vm0, %v380_v51, 0 }
  0xc2   : > { %9467 = vst [vmem:[#allocation38_spill] sm:$0xff] %v7219_v44  ;;  %v857_v46 = vand.u32 4294901760, %v856_v12  ;;  %v7232_v8 = vsub.f32 %v492_v0, %v7213_v32  ;;  %v7235_v1 = vsub.f32 %v495_v33, %v7219_v44  ;;  %v867_v28 = vand.u32 4294901760, %v866_v54  ;;  %v383_v54 = vld [vmem:[%s6960_s12 + $0xf0] sm:$0xff] }
  0xc3   : > { %9468 = vst [vmem:[#allocation39_spill] sm:$0xff] %v7223_v55  ;;  %5686 = vmatmul.mubr.f32.gmra.mrb[14].mxu0 %v835_v19  ;;  %9469 = vst [vmem:[#allocation40_spill] sm:$0xff] %v7228_v58  ;;  %v7238_v19 = vsub.f32 %v498_v49, %v7223_v55  ;;  %v886_v47 = vsub.f32 %v7197_v43, %v885_v26  ;;  %v905_v38 = vand.u32 4294901760, %v7217_v10  ;;  %v7247_v0 = vand.u32 4294901760, %v504_v18 }
  0xc4   : > { %5374 = vmatmul.mubr.f32.gmra.mrb[14].mxu1 %v837_v36  ;;  %5688 = vmatprep.mubr.f32.mxu0 %v845_v41  ;;  %9470 = vst [vmem:[#allocation41_spill] sm:$0xff] %v7232_v8  ;;  %9471 = vst [vmem:[#allocation42_spill] sm:$0xff] %v7235_v1  ;;  %v507_v36 = vsel %vm421_vm0, %v381_v42, 0  ;;  %v382_v41 = vld [vmem:[%s6960_s12 + $0xe8] sm:$0xff]  ;;  %v7245_v12 = vsub.f32 %v501_v59, %v7228_v58  ;;  %v877_v51 = vand.u32 4294901760, %v876_v63  ;;  %v915_v49 = vand.u32 4294901760, %v7232_v8 }
  0xc5   : > { %9472 = vst [vmem:[#allocation43_spill] sm:$0xff] %v7238_v19  ;;  %5376 = vmatprep.mubr.f32.mxu1 %v847_v6  ;;  %9474 = vst [vmem:[#allocation45_spill] sm:$0xff] %v7247_v0  ;;  %v7249_v33 = vand.u32 4294901760, %v507_v36  ;;  %v896_v6 = vsub.f32 %v7207_v22, %v895_v34  ;;  %v925_v42 = vand.u32 4294901760, %v7235_v1  ;;  %v510_v43 = vsel %vm421_vm0, %v382_v41, 0 }
  0xc6   : > { %9473 = vst [vmem:[#allocation44_spill] sm:$0xff] %v7245_v12  ;;  %v887_v35 = vand.u32 4294901760, %v886_v47  ;;  %v906_v25 = vsub.f32 %v7217_v10, %v905_v38  ;;  %v7261_v22 = vsub.f32 %v504_v18, %v7247_v0  ;;  %v7268_v41 = vand.u32 4294901760, %v510_v43 }
  0xc7   : > { %9475 = vst [vmem:[#allocation46_spill] sm:$0xff] %v7249_v33  ;;  %5689 = vmatmul.mubr.f32.gmra.mrb[16].mxu0 %v855_v53  ;;  %v384_v53 = vld [vmem:[%s6960_s12 + $0xf8] sm:$0xff]  ;;  %v897_v59 = vand.u32 4294901760, %v896_v6  ;;  %v916_v47 = vsub.f32 %v7232_v8, %v915_v49  ;;  %v9479_v18 = vand.u32 4294901760, %v7238_v19  ;;  %v519_v6 = vsel %vm421_vm0, %v385_v24, 0 }
  0xc8   : > { %5377 = vmatmul.mubr.f32.gmra.mrb[16].mxu1 %v857_v46  ;;  %5691 = vmatprep.mubr.f32.mxu0 %v865_v57  ;;  %9476 = vst [vmem:[#allocation47_spill] sm:$0xff] %v7261_v22  ;;  %v7264_v57 = vsub.f32 %v507_v36, %v7249_v33  ;;  %v513_v46 = vsel %vm421_vm0, %v383_v54, 0  ;;  %9478 = vst [vmem:[#allocation49_spill] sm:$0xff] %v7268_v41  ;;  %v516_v36 = vsel %vm421_vm0, %v384_v53, 0  ;;  %v907_v54 = vand.u32 4294901760, %v906_v25  ;;  %v386_v53 = vld [vmem:[%s6960_s12 + $0x108] sm:$0xff] }
  0xc9   : > { %5379 = vmatprep.mubr.f32.mxu1 %v867_v28  ;;  %v926_v28 = vsub.f32 %v7235_v1, %v925_v42  ;;  %v936_v63 = vsub.f32 %v7238_v19, %v9479_v18  ;;  %v9482_v1 = vand.u32 4294901760, %v7245_v12  ;;  %v7291_v25 = vsub.f32 %v510_v43, %v7268_v41 }
  0xca   : > { %9477 = vst [vmem:[#allocation48_spill] sm:$0xff] %v7264_v57  ;;  %v7293_v24 = vand.u32 4294901760, %v516_v36  ;;  %v917_v10 = vand.u32 4294901760, %v916_v47  ;;  %v7302_v33 = vand.u32 4294901760, %v519_v6  ;;  %v522_v41 = vsel %vm421_vm0, %v386_v53, 0 }
  0xcb   : > { %5692 = vmatmul.mubr.f32.gmra.mrb[18].mxu0 %v875_v30  ;;  %v7276_v30 = vand.u32 4294901760, %v513_v46  ;;  %v946_v8 = vsub.f32 %v7245_v12, %v9482_v1  ;;  %9483 = vst [vmem:[#allocation51_spill] sm:$0xff] %v7291_v25  ;;  %v387_v1 = vld [vmem:[%s6960_s12 + $0x110] sm:$0xff]  ;;  %v927_v18 = vand.u32 4294901760, %v926_v28  ;;  %v7327_v55 = vand.u32 4294901760, %v522_v41 }
  0xcc   : > { %5380 = vmatmul.mubr.f32.gmra.mrb[18].mxu1 %v877_v51  ;;  %5694 = vmatprep.mubr.f32.mxu0 %v885_v26  ;;  %v9481_v51 = vand.u32 4294901760, %v6979_v2  ;;  %9484 = vst [vmem:[#allocation52_spill] sm:$0xff] %v7293_v24  ;;  %9486 = vst [vmem:[#allocation53_spill] sm:$0xff] %v7302_v33  ;;  %v525_v28 = vsel %vm421_vm0, %v387_v1, 0  ;;  %v7321_v53 = vsub.f32 %v516_v36, %v7293_v24  ;;  %v390_v24 = vld [vmem:[%s6960_s12 + $0x128] sm:$0xff] }
  0xcd   : > { %5382 = vmatprep.mubr.f32.mxu1 %v887_v35  ;;  %9480 = vst [vmem:[#allocation50_spill] sm:$0xff] %v7276_v30  ;;  %v7305_v43 = vsub.f32 %v513_v46, %v7276_v30  ;;  %v947_v58 = vand.u32 4294901760, %v946_v8  ;;  %v389_v46 = vld [vmem:[%s6960_s12 + $0x120] sm:$0xff]  ;;  %9492 = vst [vmem:[#allocation57_spill] sm:$0xff] %v7327_v55  ;;  %v7331_v36 = vand.u32 4294901760, %v525_v28 }
  0xce   : > { %v7282_v26 = vsub.f32 %v6979_v2, %v9481_v51  ;;  %v9485_v2 = vand.u32 4294901760, %v6981_v5  ;;  %9490 = vst [vmem:[#allocation55_spill] sm:$0xff] %v7321_v53 }
  0xcf   : > { %5695 = vmatmul.mubr.f32.gmra.mrb[20].mxu0 %v895_v34  ;;  %v937_v34 = vand.u32 4294901760, %v936_v63  ;;  %9487 = vst [vmem:[#allocation54_spill] sm:$0xff] %v7305_v43  ;;  %v9489_v63 = vand.u32 4294901760, %v7264_v57  ;;  %9493 = vst [vmem:[#allocation58_spill] sm:$0xff] %v7331_v36 }
  0xd0   : > { %v1340_v35 = vand.u32 4294901760, %v7282_v26  ;;  %v7299_v51 = vsub.f32 %v6981_v5, %v9485_v2  ;;  %5383 = vmatmul.mubr.f32.gmra.mrb[20].mxu1 %v897_v59  ;;  %5697 = vmatprep.mubr.f32.mxu0 %v905_v38  ;;  %v388_v2 = vld [vmem:[%s6960_s12 + $0x118] sm:$0xff]  ;;  %v9488_v59 = vand.u32 4294901760, %v7261_v22 }
  0xd1   : > { %5385 = vmatprep.mubr.f32.mxu1 %v907_v54  ;;  %v966_v47 = vsub.f32 %v7264_v57, %v9489_v63  ;;  %v975_v54 = vand.u32 4294901760, %v7291_v25  ;;  %v985_v63 = vand.u32 4294901760, %v7305_v43 }
  0xd2   : > { %v1341_v0 = vsub.f32 %v7282_v26, %v1340_v35  ;;  %v1347_v5 = vand.u32 4294901760, %v7299_v51  ;;  %v956_v38 = vsub.f32 %v7261_v22, %v9488_v59  ;;  %v7325_v59 = vsub.f32 %v519_v6, %v7302_v33  ;;  %v407_v33 = vld [vmem:[%s6960_s12 + $0x1b0] sm:$0xff] }
  0xd3   : > { %5698 = vmatmul.mubr.f32.gmra.mrb[22].mxu0 %v915_v49  ;;  %v528_v49 = vsel %vm421_vm0, %v388_v2, 0  ;;  %v976_v6 = vsub.f32 %v7291_v25, %v975_v54  ;;  %v534_v25 = vsel %vm421_vm0, %v390_v24, 0 }
  0xd4   : > { %v1342_v30 = vand.u32 4294901760, %v1341_v0  ;;  %v1348_v8 = vsub.f32 %v7299_v51, %v1347_v5  ;;  %5386 = vmatmul.mubr.f32.gmra.mrb[22].mxu1 %v917_v10  ;;  %5700 = vmatprep.mubr.f32.mxu0 %v925_v42  ;;  %9491 = vst [vmem:[#allocation56_spill] sm:$0xff] %v7325_v59  ;;  %v6004_v1 = vpack.c.bf16 %v1347_v5, %v1340_v35  ;;  %v531_v0 = vsel %vm421_vm0, %v389_v46, 0 }
  0xd5   : > { %5388 = vmatprep.mubr.f32.mxu1 %v927_v18  ;;  %v957_v10 = vand.u32 4294901760, %v956_v38  ;;  %v9494_v42 = vand.u32 4294901760, %v7238_v19  ;;  %v995_v35 = vand.u32 4294901760, %v7321_v53  ;;  %v7339_v2 = vand.u32 4294901760, %v528_v49  ;;  %v391_v18 = vld [vmem:[%s6960_s12 + $0x130] sm:$0xff] }
  0xd6   : > { %v1349_v44 = vand.u32 4294901760, %v1348_v8  ;;  %6005 = vmatprep.subr.bf16.mxu0 %v6004_v1  ;;  %v9496_v8 = vand.u32 4294901760, %v7245_v12  ;;  %v1005_v46 = vand.u32 4294901760, %v7325_v59  ;;  %v7346_v38 = vsub.f32 %v522_v41, %v7327_v55  ;;  %v392_v12 = vld [vmem:[%s6960_s12 + $0x138] sm:$0xff]  ;;  %v406_v55 = vld [vmem:[%s6960_s12 + $0x1a8] sm:$0xff] }
  0xd7   : > { %5701 = vmatmul.mubr.f32.gmra.mrb[24].mxu0 %v9494_v42  ;;  %9495 = vst [vmem:[#allocation59_spill] sm:$0xff] %v7339_v2  ;;  %v7348_v42 = vand.u32 4294901760, %v531_v0  ;;  %v9500_v41 = vand.u32 4294901760, %v7261_v22  ;;  %v996_v19 = vsub.f32 %v7321_v53, %v995_v35  ;;  %v7361_v24 = vsub.f32 %v528_v49, %v7339_v2 }
  0xd8   : > { %v5980_v5 = vpack.c.bf16 %v1349_v44, %v1342_v30  ;;  %5389 = vmatmul.mubr.f32.gmra.mrb[24].mxu1 %v937_v34  ;;  %5703 = vmatprep.mubr.f32.mxu0 %v9496_v8  ;;  %9497 = vst [vmem:[#allocation60_spill] sm:$0xff] %v7346_v38  ;;  %v967_v44 = vand.u32 4294901760, %v966_v47  ;;  %v986_v30 = vsub.f32 %v7305_v43, %v985_v63  ;;  %v537_v8 = vsel %vm421_vm0, %v391_v18, 0  ;;  %v393_v47 = vld [vmem:[%s6960_s12 + $0x140] sm:$0xff] }
  0xd9   : > { %9498 = vst [vmem:[#allocation61_spill] sm:$0xff] %v7348_v42  ;;  %5391 = vmatprep.mubr.f32.mxu1 %v947_v58  ;;  %v7353_v34 = vsub.f32 %v525_v28, %v7331_v36  ;;  %6007 = vmatpush3.bf16.msra.mxu0 %v6004_v1  ;;  %9501 = vst [vmem:[#allocation63_spill] sm:$0xff] %v7361_v24  ;;  %v7363_v58 = vand.u32 4294901760, %v534_v25  ;;  %v9503_v28 = vand.u32 4294901760, %v7264_v57  ;;  %v977_v1 = vand.u32 4294901760, %v976_v6  ;;  %v394_v57 = vld [vmem:[%s6960_s12 + $0x148] sm:$0xff] }
  0xda   : > { %5981 = vmatprep.subr.bf16.mxu1 %v5980_v5  ;;  %6009 = vmatprep.subr.bf16.mxu0 %v6991_v14  ;;  %v1015_v18 = vand.u32 4294901760, %v7346_v38  ;;  %v987_v49 = vand.u32 4294901760, %v986_v30  ;;  %v7375_v43 = vand.u32 4294901760, %v537_v8  ;;  %v997_v6 = vand.u32 4294901760, %v996_v19 }
  0xdb   : > { %9499 = vst [vmem:[#allocation62_spill] sm:$0xff] %v7353_v34  ;;  %5983 = vmatpush3.bf16.msra.mxu1 %v5980_v5  ;;  %5704 = vmatmul.mubr.f32.gmra.mrb[26].mxu0 %v9500_v41  ;;  %9502 = vst [vmem:[#allocation64_spill] sm:$0xff] %v7363_v58  ;;  %v1006_v5 = vsub.f32 %v7325_v59, %v1005_v46  ;;  %v7372_v41 = vsub.f32 %v531_v0, %v7348_v42  ;;  %v1025_v53 = vand.u32 4294901760, %v7353_v34  ;;  %v395_v0 = vld [vmem:[%s6960_s12 + $0x150] sm:$0xff] }
  0xdc   : > { %5392 = vmatmul.mubr.f32.gmra.mrb[26].mxu1 %v957_v10  ;;  %5706 = vmatprep.mubr.f32.mxu0 %v9503_v28  ;;  %9505 = vst [vmem:[#allocation66_spill] sm:$0xff] %v7375_v43  ;;  %v540_v10 = vsel %vm421_vm0, %v392_v12, 0  ;;  %v543_v28 = vsel %vm421_vm0, %v393_v47, 0  ;;  %v1035_v59 = vand.u32 4294901760, %v7361_v24  ;;  %v7382_v22 = vsub.f32 %v534_v25, %v7363_v58  ;;  %v396_v47 = vld [vmem:[%s6960_s12 + $0x158] sm:$0xff]  ;;  %v397_v58 = vld [vmem:[%s6960_s12 + $0x160] sm:$0xff] }
  0xdd   : > { %9504 = vst [vmem:[#allocation65_spill] sm:$0xff] %v7372_v41  ;;  %5394 = vmatprep.mubr.f32.mxu1 %v967_v44  ;;  %v1007_v44 = vand.u32 4294901760, %v1006_v5  ;;  %v1016_v30 = vsub.f32 %v7346_v38, %v1015_v18  ;;  %v1045_v42 = vand.u32 4294901760, %v7372_v41  ;;  %v7387_v12 = vand.u32 4294901760, %v540_v10 }
  0xde   : > { %9506 = vst [vmem:[#allocation67_spill] sm:$0xff] %v7382_v22  ;;  %v1026_v19 = vsub.f32 %v7353_v34, %v1025_v53  ;;  %v7394_v25 = vand.u32 4294901760, %v543_v28  ;;  %v1036_v5 = vsub.f32 %v7361_v24, %v1035_v59  ;;  %v1055_v38 = vand.u32 4294901760, %v7382_v22 }
  0xdf   : > { %5707 = vmatmul.mubr.f32.gmra.mrb[28].mxu0 %v975_v54  ;;  %9507 = vst [vmem:[#allocation68_spill] sm:$0xff] %v7387_v12  ;;  %v7392_v54 = vsub.f32 %v537_v8, %v7375_v43  ;;  %v1017_v34 = vand.u32 4294901760, %v1016_v30  ;;  %v1046_v8 = vsub.f32 %v7372_v41, %v1045_v42  ;;  %v7404_v43 = vsub.f32 %v540_v10, %v7387_v12 }
  0xe0   : > { %5395 = vmatmul.mubr.f32.gmra.mrb[28].mxu1 %v977_v1  ;;  %5709 = vmatprep.mubr.f32.mxu0 %v985_v63  ;;  %9509 = vst [vmem:[#allocation70_spill] sm:$0xff] %v7394_v25  ;;  %v546_v63 = vsel %vm421_vm0, %v394_v57, 0  ;;  %v549_v1 = vsel %vm421_vm0, %v395_v0, 0  ;;  %v398_v0 = vld [vmem:[%s6960_s12 + $0x168] sm:$0xff]  ;;  %v7411_v2 = vsub.f32 %v543_v28, %v7394_v25  ;;  %v555_v30 = vsel %vm421_vm0, %v397_v58, 0 }
  0xe1   : > { %5397 = vmatprep.mubr.f32.mxu1 %v987_v49  ;;  %9508 = vst [vmem:[#allocation69_spill] sm:$0xff] %v7392_v54  ;;  %v552_v49 = vsel %vm421_vm0, %v396_v47, 0  ;;  %9510 = vst [vmem:[#allocation71_spill] sm:$0xff] %v7404_v43  ;;  %v7406_v57 = vand.u32 4294901760, %v546_v63  ;;  %v1065_v24 = vand.u32 4294901760, %v7392_v54  ;;  %v7413_v47 = vand.u32 4294901760, %v549_v1 }
  0xe2   : > { %9512 = vst [vmem:[#allocation73_spill] sm:$0xff] %v7411_v2  ;;  %v1037_v10 = vand.u32 4294901760, %v1036_v5  ;;  %v1056_v41 = vsub.f32 %v7382_v22, %v1055_v38  ;;  %v1075_v28 = vand.u32 4294901760, %v7404_v43 }
  0xe3   : > { %5710 = vmatmul.mubr.f32.gmra.mrb[30].mxu0 %v995_v35  ;;  %9511 = vst [vmem:[#allocation72_spill] sm:$0xff] %v7406_v57  ;;  %v1027_v35 = vand.u32 4294901760, %v1026_v19  ;;  %9513 = vst [vmem:[#allocation74_spill] sm:$0xff] %v7413_v47  ;;  %v1047_v19 = vand.u32 4294901760, %v1046_v8  ;;  %v7423_v25 = vsub.f32 %v546_v63, %v7406_v57  ;;  %v1066_v58 = vsub.f32 %v7392_v54, %v1065_v24  ;;  %v402_v57 = vld [vmem:[%s6960_s12 + $0x188] sm:$0xff] }
  0xe4   : > { %5398 = vmatmul.mubr.f32.gmra.mrb[30].mxu1 %v997_v6  ;;  %5712 = vmatprep.mubr.f32.mxu0 %v1005_v46  ;;  %v399_v6 = vld [vmem:[%s6960_s12 + $0x170] sm:$0xff]  ;;  %v7416_v46 = vand.u32 4294901760, %v552_v49  ;;  %v7429_v5 = vsub.f32 %v549_v1, %v7413_v47  ;;  %v1076_v54 = vsub.f32 %v7404_v43, %v1075_v28 }
  0xe5   : > { %5400 = vmatprep.mubr.f32.mxu1 %v1007_v44  ;;  %v558_v44 = vsel %vm421_vm0, %v398_v0, 0  ;;  %9515 = vst [vmem:[#allocation76_spill] sm:$0xff] %v7423_v25  ;;  %v561_v12 = vsel %vm421_vm0, %v399_v6, 0  ;;  %v7431_v0 = vand.u32 4294901760, %v555_v30  ;;  %v1057_v6 = vand.u32 4294901760, %v1056_v41  ;;  %v403_v43 = vld [vmem:[%s6960_s12 + $0x190] sm:$0xff] }
  0xe6   : > { %9514 = vst [vmem:[#allocation75_spill] sm:$0xff] %v7416_v46  ;;  %9516 = vst [vmem:[#allocation77_spill] sm:$0xff] %v7429_v5  ;;  %v7436_v8 = vsub.f32 %v552_v49, %v7416_v46  ;;  %v7438_v63 = vand.u32 4294901760, %v558_v44  ;;  %v1095_v1 = vand.u32 4294901760, %v7423_v25  ;;  %v1067_v49 = vand.u32 4294901760, %v1066_v58 }
  0xe7   : > { %5713 = vmatmul.mubr.f32.gmra.mrb[32].mxu0 %v1015_v18  ;;  %v1085_v18 = vand.u32 4294901760, %v7411_v2  ;;  %9517 = vst [vmem:[#allocation78_spill] sm:$0xff] %v7431_v0  ;;  %v7450_v41 = vsub.f32 %v555_v30, %v7431_v0  ;;  %v1077_v30 = vand.u32 4294901760, %v1076_v54 }
  0xe8   : > { %5401 = vmatmul.mubr.f32.gmra.mrb[32].mxu1 %v1017_v34  ;;  %5715 = vmatprep.mubr.f32.mxu0 %v1025_v53  ;;  %v400_v53 = vld [vmem:[%s6960_s12 + $0x178] sm:$0xff]  ;;  %v401_v34 = vld [vmem:[%s6960_s12 + $0x180] sm:$0xff]  ;;  %9518 = vst [vmem:[#allocation79_spill] sm:$0xff] %v7436_v8  ;;  %9519 = vst [vmem:[#allocation80_spill] sm:$0xff] %v7438_v63 }
  0xe9   : > { %5403 = vmatprep.mubr.f32.mxu1 %v1027_v35  ;;  %v7440_v35 = vand.u32 4294901760, %v561_v12  ;;  %v564_v22 = vsel %vm421_vm0, %v400_v53, 0  ;;  %v567_v47 = vsel %vm421_vm0, %v401_v34, 0  ;;  %v1086_v46 = vsub.f32 %v7411_v2, %v1085_v18  ;;  %9521 = vst [vmem:[#allocation82_spill] sm:$0xff] %v7450_v41 }
  0xea   : > { %v7462_v58 = vand.u32 4294901760, %v567_v47  ;;  %v570_v34 = vsel %vm421_vm0, %v402_v57, 0  ;;  %v1096_v2 = vsub.f32 %v7423_v25, %v1095_v1 }
  0xeb   : > { %5716 = vmatmul.mubr.f32.gmra.mrb[34].mxu0 %v1035_v59  ;;  %9520 = vst [vmem:[#allocation81_spill] sm:$0xff] %v7440_v35  ;;  %v1105_v59 = vand.u32 4294901760, %v7429_v5  ;;  %v7458_v53 = vsub.f32 %v561_v12, %v7440_v35  ;;  %v573_v12 = vsel %vm421_vm0, %v403_v43, 0  ;;  %v404_v35 = vld [vmem:[%s6960_s12 + $0x198] sm:$0xff]  ;;  %v7472_v57 = vand.u32 4294901760, %v570_v34 }
  0xec   : > { %5404 = vmatmul.mubr.f32.gmra.mrb[34].mxu1 %v1037_v10  ;;  %5718 = vmatprep.mubr.f32.mxu0 %v1045_v42  ;;  %v1115_v42 = vand.u32 4294901760, %v7436_v8  ;;  %v7454_v10 = vsub.f32 %v558_v44, %v7438_v63  ;;  %v1087_v44 = vand.u32 4294901760, %v1086_v46  ;;  %v1097_v43 = vand.u32 4294901760, %v1096_v2 }
  0xed   : > { %5406 = vmatprep.mubr.f32.mxu1 %v1047_v19  ;;  %9523 = vst [vmem:[#allocation84_spill] sm:$0xff] %v7458_v53  ;;  %v7460_v19 = vand.u32 4294901760, %v564_v22  ;;  %v1106_v63 = vsub.f32 %v7429_v5, %v1105_v59  ;;  %v1145_v54 = vand.u32 4294901760, %v7458_v53 }
  0xee   : > { %9522 = vst [vmem:[#allocation83_spill] sm:$0xff] %v7454_v10  ;;  %v1116_v0 = vsub.f32 %v7436_v8, %v1115_v42  ;;  %v1135_v36 = vand.u32 4294901760, %v7454_v10  ;;  %v576_v8 = vsel %vm421_vm0, %v404_v35, 0 }
  0xef   : > { %5719 = vmatmul.mubr.f32.gmra.mrb[36].mxu0 %v1055_v38  ;;  %9524 = vst [vmem:[#allocation85_spill] sm:$0xff] %v7460_v19  ;;  %v1125_v38 = vand.u32 4294901760, %v7450_v41  ;;  %v7477_v46 = vsub.f32 %v564_v22, %v7460_v19  ;;  %v1107_v5 = vand.u32 4294901760, %v1106_v63  ;;  %v1146_v2 = vsub.f32 %v7458_v53, %v1145_v54 }
  0xf0   : > { %5407 = vmatmul.mubr.f32.gmra.mrb[36].mxu1 %v1057_v6  ;;  %5721 = vmatprep.mubr.f32.mxu0 %v1065_v24  ;;  %v405_v24 = vld [vmem:[%s6960_s12 + $0x1a0] sm:$0xff]  ;;  %v7480_v6 = vsub.f32 %v567_v47, %v7462_v58  ;;  %v1117_v22 = vand.u32 4294901760, %v1116_v0  ;;  %v1136_v19 = vsub.f32 %v7454_v10, %v1135_v36  ;;  %v7491_v47 = vsub.f32 %v570_v34, %v7472_v57  ;;  %v408_v10 = vld [vmem:[%s6960_s12 + $0x1b8] sm:$0xff] }
  0xf1   : > { %5409 = vmatprep.mubr.f32.mxu1 %v1067_v49  ;;  %9525 = vst [vmem:[#allocation86_spill] sm:$0xff] %v7477_v46  ;;  %v7482_v49 = vand.u32 4294901760, %v573_v12  ;;  %v1126_v25 = vsub.f32 %v7450_v41, %v1125_v38  ;;  %v7496_v35 = vand.u32 4294901760, %v576_v8  ;;  %v582_v34 = vsel %vm421_vm0, %v406_v55, 0  ;;  %v409_v41 = vld [vmem:[%s6960_s12 + $0x1c0] sm:$0xff] }
  0xf2   : > { %9526 = vst [vmem:[#allocation87_spill] sm:$0xff] %v7480_v6  ;;  %9528 = vst [vmem:[#allocation89_spill] sm:$0xff] %v7491_v47  ;;  %v1165_v63 = vand.u32 4294901760, %v7480_v6  ;;  %v1175_v53 = vand.u32 4294901760, %v7491_v47 }
  0xf3   : > { %5722 = vmatmul.mubr.f32.gmra.mrb[38].mxu0 %v1075_v28  ;;  %9527 = vst [vmem:[#allocation88_spill] sm:$0xff] %v7482_v49  ;;  %v579_v28 = vsel %vm421_vm0, %v405_v24, 0  ;;  %v7499_v0 = vsub.f32 %v573_v12, %v7482_v49  ;;  %v1137_v24 = vand.u32 4294901760, %v1136_v19  ;;  %v7509_v12 = vand.u32 4294901760, %v582_v34 }
  0xf4   : > { %5410 = vmatmul.mubr.f32.gmra.mrb[38].mxu1 %v1077_v30  ;;  %5724 = vmatprep.mubr.f32.mxu0 %v1085_v18  ;;  %v1155_v18 = vand.u32 4294901760, %v7477_v46  ;;  %v7501_v30 = vand.u32 4294901760, %v579_v28  ;;  %v1166_v55 = vsub.f32 %v7480_v6, %v1165_v63  ;;  %v591_v19 = vsel %vm421_vm0, %v409_v41, 0  ;;  %v411_v41 = vld [vmem:[%s6960_s12 + $0x1d0] sm:$0xff] }
  0xf5   : > { %5412 = vmatprep.mubr.f32.mxu1 %v1087_v44  ;;  %9529 = vst [vmem:[#allocation90_spill] sm:$0xff] %v7499_v0  ;;  %v1127_v44 = vand.u32 4294901760, %v1126_v25  ;;  %9530 = vst [vmem:[#allocation91_spill] sm:$0xff] %v7509_v12  ;;  %v7516_v25 = vsub.f32 %v576_v8, %v7496_v35  ;;  %v1176_v6 = vsub.f32 %v7491_v47, %v1175_v53 }
  0xf7   : > { %5725 = vmatmul.mubr.f32.gmra.mrb[40].mxu0 %v1095_v1  ;;  %v585_v1 = vsel %vm421_vm0, %v407_v33, 0  ;;  %v1185_v33 = vand.u32 4294901760, %v7499_v0  ;;  %9532 = vst [vmem:[#allocation93_spill] sm:$0xff] %v7516_v25 }
  0xf8   : > { %5413 = vmatmul.mubr.f32.gmra.mrb[40].mxu1 %v1097_v43  ;;  %5727 = vmatprep.mubr.f32.mxu0 %v1105_v59  ;;  %v1147_v43 = vand.u32 4294901760, %v1146_v2  ;;  %v1156_v59 = vsub.f32 %v7477_v46, %v1155_v18  ;;  %v7511_v49 = vand.u32 4294901760, %v585_v1  ;;  %v410_v2 = vld [vmem:[%s6960_s12 + $0x1c8] sm:$0xff]  ;;  %v413_v46 = vld [vmem:[%s6960_s12 + $0x1e0] sm:$0xff] }
  0xf9   : > { %5415 = vmatprep.mubr.f32.mxu1 %v1107_v5  ;;  %v7519_v5 = vsub.f32 %v579_v28, %v7501_v30  ;;  %v7534_v28 = vsub.f32 %v582_v34, %v7509_v12  ;;  %v1186_v34 = vsub.f32 %v7499_v0, %v1185_v33 }
  0xfa   : > { %9531 = vst [vmem:[#allocation92_spill] sm:$0xff] %v7511_v49  ;;  %v1157_v8 = vand.u32 4294901760, %v1156_v59  ;;  %v412_v59 = vld [vmem:[%s6960_s12 + $0x1d8] sm:$0xff] }
  0xfb   : > { %5728 = vmatmul.mubr.f32.gmra.mrb[42].mxu0 %v1115_v42  ;;  %9533 = vst [vmem:[#allocation94_spill] sm:$0xff] %v7519_v5  ;;  %v588_v42 = vsel %vm421_vm0, %v408_v10, 0  ;;  %9534 = vst [vmem:[#allocation95_spill] sm:$0xff] %v7534_v28  ;;  %v7537_v10 = vsub.f32 %v585_v1, %v7511_v49  ;;  %v1205_v1 = vand.u32 4294901760, %v7519_v5  ;;  %v600_v12 = vsel %vm421_vm0, %v412_v59, 0 }
  0xfc   : > { %5416 = vmatmul.mubr.f32.gmra.mrb[42].mxu1 %v1117_v22  ;;  %5730 = vmatprep.mubr.f32.mxu0 %v1125_v38  ;;  %v7526_v38 = vpack.c.bf16 %v7007_v21, %v6997_v17  ;;  %v7530_v22 = vpack.c.bf16 %v7299_v51, %v7282_v26  ;;  %v1195_v17 = vand.u32 4294901760, %v7516_v25  ;;  %v7542_v21 = vand.u32 4294901760, %v588_v42 }
  0xfd   : > { %5418 = vmatprep.mubr.f32.mxu1 %v1127_v44  ;;  %9535 = vst [vmem:[#allocation96_spill] sm:$0xff] %v7537_v10  ;;  %v7544_v26 = vand.u32 4294901760, %v591_v19  ;;  %v594_v51 = vsel %vm421_vm0, %v410_v2, 0  ;;  %v597_v44 = vsel %vm421_vm0, %v411_v41, 0  ;;  %v1206_v0 = vsub.f32 %v7519_v5, %v1205_v1 }
  0xfe   : > { %5985 = vmatprep.subr.bf16.mxu1 %v7526_v38  ;;  %v7553_v47 = vand.u32 4294901760, %v594_v51  ;;  %v7558_v2 = vsub.f32 %v588_v42, %v7542_v21  ;;  %v7564_v49 = vand.u32 4294901760, %v597_v44 }
  0xff   : > { %5731 = vmatmul.mubr.f32.gmra.mrb[44].mxu0 %v1135_v36  ;;  %v1167_v36 = vand.u32 4294901760, %v1166_v55  ;;  %v1196_v55 = vsub.f32 %v7516_v25, %v1195_v17  ;;  %v7561_v41 = vsub.f32 %v591_v19, %v7544_v26  ;;  %v7577_v25 = vand.u32 4294901760, %v600_v12 }
 0x100   : > { %5419 = vmatmul.mubr.f32.gmra.mrb[44].mxu1 %v1137_v24  ;;  %5733 = vmatprep.mubr.f32.mxu0 %v1145_v54  ;;  %v1215_v54 = vand.u32 4294901760, %v7534_v28  ;;  %v1225_v24 = vand.u32 4294901760, %v7537_v10  ;;  %9536 = vst [vmem:[#allocation97_spill] sm:$0xff] %v7553_v47  ;;  %9537 = vst [vmem:[#allocation98_spill] sm:$0xff] %v7558_v2  ;;  %v7572_v19 = vsub.f32 %v594_v51, %v7553_v47  ;;  %v1235_v5 = vand.u32 4294901760, %v7558_v2 }
 0x101   : > { %5421 = vmatprep.mubr.f32.mxu1 %v1147_v43  ;;  %v1177_v43 = vand.u32 4294901760, %v1176_v6  ;;  %9538 = vst [vmem:[#allocation99_spill] sm:$0xff] %v7561_v41  ;;  %9539 = vst [vmem:[#allocation100_spill] sm:$0xff] %v7564_v49  ;;  %v1245_v59 = vand.u32 4294901760, %v7561_v41 }
 0x102   : > { %v1216_v6 = vsub.f32 %v7534_v28, %v1215_v54  ;;  %v1226_v42 = vsub.f32 %v7537_v10, %v1225_v24  ;;  %9540 = vst [vmem:[#allocation101_spill] sm:$0xff] %v7572_v19  ;;  %9541 = vst [vmem:[#allocation102_spill] sm:$0xff] %v7577_v25  ;;  %v1255_v47 = vand.u32 4294901760, %v7572_v19 }
 0x103   : > { %5734 = vmatmul.mubr.f32.gmra.mrb[46].mxu0 %v1155_v18  ;;  %v1187_v18 = vand.u32 4294901760, %v1186_v34  ;;  %v1197_v34 = vand.u32 4294901760, %v1196_v55 }
 0x104   : > { %5422 = vmatmul.mubr.f32.gmra.mrb[46].mxu1 %v1157_v8  ;;  %5736 = vmatprep.mubr.f32.mxu0 %v1165_v63  ;;  %v603_v63 = vsel %vm421_vm0, %v413_v46, 0  ;;  %v414_v8 = vld [vmem:[%s6960_s12 + $0x1e8] sm:$0xff]  ;;  %v7580_v46 = vsub.f32 %v597_v44, %v7564_v49  ;;  %v1227_v55 = vand.u32 4294901760, %v1226_v42  ;;  %v7591_v44 = vsub.f32 %v600_v12, %v7577_v25 }
 0x105   : > { %5424 = vmatprep.mubr.f32.mxu1 %v1167_v36  ;;  %v415_v36 = vld [vmem:[%s6960_s12 + $0x1f0] sm:$0xff]  ;;  %v7582_v28 = vand.u32 4294901760, %v603_v63  ;;  %v606_v51 = vsel %vm421_vm0, %v414_v8, 0 }
 0x106   : > { %9542 = vst [vmem:[#allocation103_spill] sm:$0xff] %v7580_v46  ;;  %v609_v10 = vsel %vm421_vm0, %v415_v36, 0  ;;  %9544 = vst [vmem:[#allocation105_spill] sm:$0xff] %v7591_v44  ;;  %v7593_v49 = vand.u32 4294901760, %v606_v51  ;;  %v1265_v8 = vand.u32 4294901760, %v7580_v46  ;;  %v1275_v12 = vand.u32 4294901760, %v7591_v44 }
 0x107   : > { %5737 = vmatmul.mubr.f32.gmra.mrb[48].mxu0 %v1175_v53  ;;  %v1207_v53 = vand.u32 4294901760, %v1206_v0  ;;  %9543 = vst [vmem:[#allocation104_spill] sm:$0xff] %v7582_v28  ;;  %v1246_v0 = vsub.f32 %v7561_v41, %v1245_v59 }
 0x108   : > { %5425 = vmatmul.mubr.f32.gmra.mrb[48].mxu1 %v1177_v43  ;;  %5739 = vmatprep.mubr.f32.mxu0 %v1185_v33  ;;  %v416_v43 = vld [vmem:[%s6960_s12 + $0x1f8] sm:$0xff]  ;;  %v1217_v33 = vand.u32 4294901760, %v1216_v6  ;;  %9545 = vst [vmem:[#allocation106_spill] sm:$0xff] %v7593_v49  ;;  %v7599_v6 = vand.u32 4294901760, %v609_v10  ;;  %v1266_v41 = vsub.f32 %v7580_v46, %v1265_v8  ;;  %v9578_v46 = vld [vmem:[#allocation97_spill] sm:$0xff]  ;;  %s6588_s12 = scalar_lea.vmem %s6587_s10, 16384 }
 0x109   : > { %5427 = vmatprep.mubr.f32.mxu1 %v1187_v18  ;;  %v1236_v18 = vsub.f32 %v7558_v2, %v1235_v5  ;;  %v612_v42 = vsel %vm421_vm0, %v416_v43, 0  ;;  %v1276_v43 = vsub.f32 %v7591_v44, %v1275_v12  ;;  %v9577_v44 = vld [vmem:[#allocation92_spill] sm:$0xff]  ;;  %p6590_p2 = scmp.lt.s32.totalorder %s6588_s12, %s6582_s3 }
 0x10a   : > { %9547 = vst [vmem:[#allocation108_spill] sm:$0xff] %v7599_v6 }
 0x10b   : > { %5740 = vmatmul.mubr.f32.gmra.mrb[50].mxu0 %v1195_v17  ;;  %v7597_v17 = vsub.f32 %v603_v63, %v7582_v28  ;;  %v1237_v36 = vand.u32 4294901760, %v1236_v18  ;;  %v1247_v63 = vand.u32 4294901760, %v1246_v0  ;;  %p6591_p5 = por %p6590_p2, %p6589_p8 }
 0x10c   : > { %5428 = vmatmul.mubr.f32.gmra.mrb[50].mxu1 %v1197_v34  ;;  %5742 = vmatprep.mubr.f32.mxu0 %v1205_v1  ;;  %v1256_v1 = vsub.f32 %v7572_v19, %v1255_v47  ;;  %v7605_v34 = vsub.f32 %v606_v51, %v7593_v49  ;;  %v9579_v19 = vld [vmem:[#allocation100_spill] sm:$0xff] }
 0x10d   : > { %5430 = vmatprep.mubr.f32.mxu1 %v1207_v53  ;;  %9546 = vst [vmem:[#allocation107_spill] sm:$0xff] %v7597_v17  ;;  %v7607_v53 = vand.u32 4294901760, %v612_v42  ;;  %v1285_v2 = vand.u32 4294901760, %v7597_v17  ;;  %p6592_p6 = pnand %p6591_p5, %p6585_p7 }
 0x10e   : > { %9548 = vst [vmem:[#allocation109_spill] sm:$0xff] %v7605_v34  ;;  %v1295_v51 = vand.u32 4294901760, %v7605_v34 }
 0x10f   : > { %5743 = vmatmul.mubr.f32.gmra.mrb[52].mxu0 %v1215_v54  ;;  %v7612_v54 = vsub.f32 %v609_v10, %v7599_v6  ;;  %v1286_v18 = vsub.f32 %v7597_v17, %v1285_v2  ;;  %v9576_v17 = vld [vmem:[#allocation91_spill] sm:$0xff] }
 0x110   : > { %5431 = vmatmul.mubr.f32.gmra.mrb[52].mxu1 %v1217_v33  ;;  %5745 = vmatprep.mubr.f32.mxu0 %v1225_v24  ;;  %v1257_v24 = vand.u32 4294901760, %v1256_v1  ;;  %v7617_v33 = vsub.f32 %v612_v42, %v7607_v53  ;;  %v1296_v10 = vsub.f32 %v7605_v34, %v1295_v51  ;;  %v9575_v34 = vld [vmem:[#allocation88_spill] sm:$0xff] }
 0x111   : > { %5433 = vmatprep.mubr.f32.mxu1 %v1227_v55  ;;  %9549 = vst [vmem:[#allocation110_spill] sm:$0xff] %v7612_v54  ;;  %v1267_v55 = vand.u32 4294901760, %v1266_v41  ;;  %v1305_v0 = vand.u32 4294901760, %v7612_v54  ;;  %v1287_v1 = vand.u32 4294901760, %v1286_v18  ;;  %v9562_v18 = vld [vmem:[#allocation59_spill] sm:$0xff] }
 0x112   : > { %9550 = vst [vmem:[#allocation111_spill] sm:$0xff] %v7617_v33  ;;  %v1297_v41 = vand.u32 4294901760, %v1296_v10  ;;  %v9565_v10 = vld [vmem:[#allocation66_spill] sm:$0xff] }
 0x113   : > { %5746 = vmatmul.mubr.f32.gmra.mrb[54].mxu0 %v1235_v5  ;;  %v1277_v5 = vand.u32 4294901760, %v1276_v43  ;;  %v9559_v43 = vld [vmem:[#allocation53_spill] sm:$0xff] }
 0x114   : > { %5434 = vmatmul.mubr.f32.gmra.mrb[54].mxu1 %v1237_v36  ;;  %5748 = vmatprep.mubr.f32.mxu0 %v1245_v59  ;;  %v1315_v59 = vand.u32 4294901760, %v7617_v33  ;;  %v1306_v36 = vsub.f32 %v7612_v54, %v1305_v0  ;;  %v9574_v54 = vld [vmem:[#allocation85_spill] sm:$0xff] }
 0x115   : > { %5436 = vmatprep.mubr.f32.mxu1 %v1247_v63 }
 0x116   : > { %v1316_v42 = vsub.f32 %v7617_v33, %v1315_v59  ;;  %v1307_v63 = vand.u32 4294901760, %v1306_v36  ;;  %v9568_v36 = vld [vmem:[#allocation72_spill] sm:$0xff]  ;;  %v9573_v33 = vld [vmem:[#allocation81_spill] sm:$0xff] }
 0x117   : > { %5749 = vmatmul.mubr.f32.gmra.mrb[56].mxu0 %v1255_v47 }
 0x118   : > { %5437 = vmatmul.mubr.f32.gmra.mrb[56].mxu1 %v1257_v24  ;;  %5751 = vmatprep.mubr.f32.mxu0 %v1265_v8  ;;  %v1317_v47 = vand.u32 4294901760, %v1316_v42  ;;  %v9556_v8 = vld [vmem:[#allocation49_spill] sm:$0xff]  ;;  %v9558_v24 = vld [vmem:[#allocation52_spill] sm:$0xff]  ;;  %v9570_v42 = vld [vmem:[#allocation75_spill] sm:$0xff] }
 0x119   : > { %5439 = vmatprep.mubr.f32.mxu1 %v1267_v55  ;;  %v9561_v55 = vld [vmem:[#allocation58_spill] sm:$0xff] }
 0x11b   : > { %5752 = vmatmul.mubr.f32.gmra.mrb[58].mxu0 %v1275_v12  ;;  %v9557_v12 = vld [vmem:[#allocation50_spill] sm:$0xff] }
 0x11c   : > { %5440 = vmatmul.mubr.f32.gmra.mrb[58].mxu1 %v1277_v5  ;;  %5754 = vmatprep.mubr.f32.mxu0 %v1285_v2  ;;  %v9555_v2 = vld [vmem:[#allocation46_spill] sm:$0xff]  ;;  %v9564_v5 = vld [vmem:[#allocation64_spill] sm:$0xff] }
 0x11d   : > { %5442 = vmatprep.mubr.f32.mxu1 %v1287_v1  ;;  %v9567_v1 = vld [vmem:[#allocation70_spill] sm:$0xff] }
 0x11f   : > { %5755 = vmatmul.mubr.f32.gmra.mrb[60].mxu0 %v1295_v51  ;;  %v9560_v51 = vld [vmem:[#allocation57_spill] sm:$0xff] }
 0x120   : > { %5443 = vmatmul.mubr.f32.gmra.mrb[60].mxu1 %v1297_v41  ;;  %5757 = vmatprep.mubr.f32.mxu0 %v1305_v0  ;;  %v9563_v0 = vld [vmem:[#allocation61_spill] sm:$0xff]  ;;  %v9569_v41 = vld [vmem:[#allocation74_spill] sm:$0xff] }
 0x121   : > { %5445 = vmatprep.mubr.f32.mxu1 %v1307_v63  ;;  %v9571_v63 = vld [vmem:[#allocation78_spill] sm:$0xff] }
 0x123   : > { %5758 = vmatmul.mubr.f32.gmra.mrb[62].mxu0 %v1315_v59  ;;  %v9566_v59 = vld [vmem:[#allocation68_spill] sm:$0xff] }
 0x124   : > { %5446 = vmatmul.mubr.f32.gmra.mrb[62].mxu1 %v1317_v47  ;;  %5768 = vmatprep.mubr.f32.mxu0 %v6993_v15  ;;  %v9572_v47 = vld [vmem:[#allocation80_spill] sm:$0xff] }
 0x125   : > { %5456 = vmatprep.mubr.f32.mxu1 %v6993_v15 }
 0x127   : > { %5769 = vmatmul.mubr.f32.vlgmr.msra.gmra.mrb[0].mxu0 %v6995_v16 }
 0x128   : > { %5457 = vmatmul.mubr.f32.vlgmr.msra.gmra.mrb[0].mxu1 %v6995_v16  ;;  %6011 = vmatpush3.bf16.msra.mxu0 %v6991_v14  ;;  %v9551_v14 = vld [vmem:[#allocation38_spill] sm:$0xff] }
 0x129   : > { %5987 = vmatpush3.bf16.msra.mxu1 %v7526_v38  ;;  %5459 = vmatprep.mubr.f32.mxu1 %v7020_v27  ;;  %v9553_v38 = vld [vmem:[#allocation40_spill] sm:$0xff] }
 0x12a   : > { %5771 = vmatprep.mubr.f32.mxu0 %v7020_v27  ;;  %5989 = vmatprep.subr.bf16.mxu1 %v7530_v22 }
 0x12b   : > { %5772 = vmatmul.mubr.f32.gmra.mrb[2].mxu0 %v7025_v29  ;;  %6013 = vmatprep.subr.bf16.mxu0 %v7005_v20 }
 0x12c   : > { %5460 = vmatmul.mubr.f32.gmra.mrb[2].mxu1 %v7025_v29  ;;  %5774 = vmatprep.mubr.f32.mxu0 %v7041_v39 }
 0x12d   : > { %5462 = vmatprep.mubr.f32.mxu1 %v7041_v39  ;;  %5991 = vmatpush3.bf16.msra.mxu1 %v7530_v22  ;;  %v9554_v22 = vld [vmem:[#allocation45_spill] sm:$0xff] }
 0x12e   : > { %6015 = vmatpush3.bf16.msra.mxu0 %v7005_v20  ;;  %v9552_v20 = vld [vmem:[#allocation39_spill] sm:$0xff] }
 0x12f   : > { %5775 = vmatmul.mubr.f32.gmra.mrb[4].mxu0 %v7053_v48 }
 0x130   : > { %5463 = vmatmul.mubr.f32.gmra.mrb[4].mxu1 %v7053_v48  ;;  %5777 = vmatprep.mubr.f32.mxu0 %v7066_v62 }
 0x131   : > { %5465 = vmatprep.mubr.f32.mxu1 %v7066_v62 }
 0x133   : > { %5778 = vmatmul.mubr.f32.gmra.mrb[6].mxu0 %v7072_v7 }
 0x134   : > { %5466 = vmatmul.mubr.f32.gmra.mrb[6].mxu1 %v7072_v7  ;;  %5780 = vmatprep.mubr.f32.mxu0 %v7078_v11 }
 0x135   : > { %5468 = vmatprep.mubr.f32.mxu1 %v7078_v11 }
 0x137   : > { %5781 = vmatmul.mubr.f32.gmra.mrb[8].mxu0 %v7086_v23 }
 0x138   : > { %5469 = vmatmul.mubr.f32.gmra.mrb[8].mxu1 %v7086_v23  ;;  %5783 = vmatprep.mubr.f32.mxu0 %v7093_v31 }
 0x139   : > { %5471 = vmatprep.mubr.f32.mxu1 %v7093_v31 }
 0x13b   : > { %5784 = vmatmul.mubr.f32.gmra.mrb[10].mxu0 %v7100_v37 }
 0x13c   : > { %5472 = vmatmul.mubr.f32.gmra.mrb[10].mxu1 %v7100_v37  ;;  %5786 = vmatprep.mubr.f32.mxu0 %v7114_v50 }
 0x13d   : > { %5474 = vmatprep.mubr.f32.mxu1 %v7114_v50 }
 0x13f   : > { %5787 = vmatmul.mubr.f32.gmra.mrb[12].mxu0 %v7128_v3 }
 0x140   : > { %5475 = vmatmul.mubr.f32.gmra.mrb[12].mxu1 %v7128_v3  ;;  %5789 = vmatprep.mubr.f32.mxu0 %v7133_v13 }
 0x141   : > { %5477 = vmatprep.mubr.f32.mxu1 %v7133_v13 }
 0x143   : > { %5790 = vmatmul.mubr.f32.gmra.mrb[14].mxu0 %v7146_v45 }
 0x144   : > { %5478 = vmatmul.mubr.f32.gmra.mrb[14].mxu1 %v7146_v45  ;;  %5792 = vmatprep.mubr.f32.mxu0 %v7150_v52 }
 0x145   : > { %5480 = vmatprep.mubr.f32.mxu1 %v7150_v52 }
 0x147   : > { %5793 = vmatmul.mubr.f32.gmra.mrb[16].mxu0 %v7158_v61 }
 0x148   : > { %5481 = vmatmul.mubr.f32.gmra.mrb[16].mxu1 %v7158_v61  ;;  %5795 = vmatprep.mubr.f32.mxu0 %v7164_v4 }
 0x149   : > { %5483 = vmatprep.mubr.f32.mxu1 %v7164_v4 }
 0x14b   : > { %5796 = vmatmul.mubr.f32.gmra.mrb[18].mxu0 %v7172_v9 }
 0x14c   : > { %5484 = vmatmul.mubr.f32.gmra.mrb[18].mxu1 %v7172_v9  ;;  %5798 = vmatprep.mubr.f32.mxu0 %v7187_v40 }
 0x14d   : > { %5486 = vmatprep.mubr.f32.mxu1 %v7187_v40 }
 0x14f   : > { %5799 = vmatmul.mubr.f32.gmra.mrb[20].mxu0 %v7192_v60 }
 0x150   : > { %5487 = vmatmul.mubr.f32.gmra.mrb[20].mxu1 %v7192_v60  ;;  %5801 = vmatprep.mubr.f32.mxu0 %v7201_v56 }
 0x151   : > { %5489 = vmatprep.mubr.f32.mxu1 %v7201_v56 }
 0x153   : > { %5802 = vmatmul.mubr.f32.gmra.mrb[22].mxu0 %v7213_v32 }
 0x154   : > { %5490 = vmatmul.mubr.f32.gmra.mrb[22].mxu1 %v7213_v32  ;;  %5804 = vmatprep.mubr.f32.mxu0 %v9551_v14 }
 0x155   : > { %5492 = vmatprep.mubr.f32.mxu1 %v9551_v14 }
 0x157   : > { %5805 = vmatmul.mubr.f32.gmra.mrb[24].mxu0 %v9552_v20 }
 0x158   : > { %5493 = vmatmul.mubr.f32.gmra.mrb[24].mxu1 %v9552_v20  ;;  %5807 = vmatprep.mubr.f32.mxu0 %v9553_v38 }
 0x159   : > { %5495 = vmatprep.mubr.f32.mxu1 %v9553_v38 }
 0x15b   : > { %5808 = vmatmul.mubr.f32.gmra.mrb[26].mxu0 %v9554_v22 }
 0x15c   : > { %5496 = vmatmul.mubr.f32.gmra.mrb[26].mxu1 %v9554_v22  ;;  %5810 = vmatprep.mubr.f32.mxu0 %v9555_v2 }
 0x15d   : > { %5498 = vmatprep.mubr.f32.mxu1 %v9555_v2 }
 0x15f   : > { %5811 = vmatmul.mubr.f32.gmra.mrb[28].mxu0 %v9556_v8 }
 0x160   : > { %5499 = vmatmul.mubr.f32.gmra.mrb[28].mxu1 %v9556_v8  ;;  %5813 = vmatprep.mubr.f32.mxu0 %v9557_v12 }
 0x161   : > { %5501 = vmatprep.mubr.f32.mxu1 %v9557_v12 }
 0x163   : > { %5814 = vmatmul.mubr.f32.gmra.mrb[30].mxu0 %v9558_v24 }
 0x164   : > { %5502 = vmatmul.mubr.f32.gmra.mrb[30].mxu1 %v9558_v24  ;;  %5816 = vmatprep.mubr.f32.mxu0 %v9559_v43 }
 0x165   : > { %5504 = vmatprep.mubr.f32.mxu1 %v9559_v43 }
 0x167   : > { %5817 = vmatmul.mubr.f32.gmra.mrb[32].mxu0 %v9560_v51 }
 0x168   : > { %5505 = vmatmul.mubr.f32.gmra.mrb[32].mxu1 %v9560_v51  ;;  %5819 = vmatprep.mubr.f32.mxu0 %v9561_v55 }
 0x169   : > { %5507 = vmatprep.mubr.f32.mxu1 %v9561_v55 }
 0x16b   : > { %5820 = vmatmul.mubr.f32.gmra.mrb[34].mxu0 %v9562_v18 }
 0x16c   : > { %5508 = vmatmul.mubr.f32.gmra.mrb[34].mxu1 %v9562_v18  ;;  %5822 = vmatprep.mubr.f32.mxu0 %v9563_v0 }
 0x16d   : > { %5510 = vmatprep.mubr.f32.mxu1 %v9563_v0 }
 0x16f   : > { %5823 = vmatmul.mubr.f32.gmra.mrb[36].mxu0 %v9564_v5 }
 0x170   : > { %5511 = vmatmul.mubr.f32.gmra.mrb[36].mxu1 %v9564_v5  ;;  %5825 = vmatprep.mubr.f32.mxu0 %v9565_v10 }
 0x171   : > { %5513 = vmatprep.mubr.f32.mxu1 %v9565_v10 }
 0x173   : > { %5826 = vmatmul.mubr.f32.gmra.mrb[38].mxu0 %v9566_v59 }
 0x174   : > { %5514 = vmatmul.mubr.f32.gmra.mrb[38].mxu1 %v9566_v59  ;;  %5828 = vmatprep.mubr.f32.mxu0 %v9567_v1 }
 0x175   : > { %5516 = vmatprep.mubr.f32.mxu1 %v9567_v1 }
 0x177   : > { %5829 = vmatmul.mubr.f32.gmra.mrb[40].mxu0 %v9568_v36 }
 0x178   : > { %5517 = vmatmul.mubr.f32.gmra.mrb[40].mxu1 %v9568_v36  ;;  %5831 = vmatprep.mubr.f32.mxu0 %v9569_v41 }
 0x179   : > { %5519 = vmatprep.mubr.f32.mxu1 %v9569_v41 }
 0x17b   : > { %5832 = vmatmul.mubr.f32.gmra.mrb[42].mxu0 %v9570_v42 }
 0x17c   : > { %5520 = vmatmul.mubr.f32.gmra.mrb[42].mxu1 %v9570_v42  ;;  %5834 = vmatprep.mubr.f32.mxu0 %v9571_v63 }
 0x17d   : > { %5522 = vmatprep.mubr.f32.mxu1 %v9571_v63 }
 0x17f   : > { %5835 = vmatmul.mubr.f32.gmra.mrb[44].mxu0 %v9572_v47 }
 0x180   : > { %5523 = vmatmul.mubr.f32.gmra.mrb[44].mxu1 %v9572_v47  ;;  %5837 = vmatprep.mubr.f32.mxu0 %v9573_v33 }
 0x181   : > { %5525 = vmatprep.mubr.f32.mxu1 %v9573_v33 }
 0x183   : > { %5838 = vmatmul.mubr.f32.gmra.mrb[46].mxu0 %v9574_v54 }
 0x184   : > { %5526 = vmatmul.mubr.f32.gmra.mrb[46].mxu1 %v9574_v54  ;;  %5840 = vmatprep.mubr.f32.mxu0 %v7462_v58 }
 0x185   : > { %5528 = vmatprep.mubr.f32.mxu1 %v7462_v58 }
 0x187   : > { %5841 = vmatmul.mubr.f32.gmra.mrb[48].mxu0 %v7472_v57 }
 0x188   : > { %5529 = vmatmul.mubr.f32.gmra.mrb[48].mxu1 %v7472_v57  ;;  %5843 = vmatprep.mubr.f32.mxu0 %v9575_v34 }
 0x189   : > { %5531 = vmatprep.mubr.f32.mxu1 %v9575_v34 }
 0x18b   : > { %5844 = vmatmul.mubr.f32.gmra.mrb[50].mxu0 %v7496_v35 }
 0x18c   : > { %5532 = vmatmul.mubr.f32.gmra.mrb[50].mxu1 %v7496_v35  ;;  %5846 = vmatprep.mubr.f32.mxu0 %v7501_v30 }
 0x18d   : > { %5534 = vmatprep.mubr.f32.mxu1 %v7501_v30 }
 0x18f   : > { %5847 = vmatmul.mubr.f32.gmra.mrb[52].mxu0 %v9576_v17 }
 0x190   : > { %5535 = vmatmul.mubr.f32.gmra.mrb[52].mxu1 %v9576_v17  ;;  %5849 = vmatprep.mubr.f32.mxu0 %v9577_v44 }
 0x191   : > { %5537 = vmatprep.mubr.f32.mxu1 %v9577_v44 }
 0x193   : > { %5850 = vmatmul.mubr.f32.gmra.mrb[54].mxu0 %v7542_v21 }
 0x194   : > { %5538 = vmatmul.mubr.f32.gmra.mrb[54].mxu1 %v7542_v21  ;;  %5852 = vmatprep.mubr.f32.mxu0 %v7544_v26 }
 0x195   : > { %5540 = vmatprep.mubr.f32.mxu1 %v7544_v26 }
 0x197   : > { %5853 = vmatmul.mubr.f32.gmra.mrb[56].mxu0 %v9578_v46 }
 0x198   : > { %5541 = vmatmul.mubr.f32.gmra.mrb[56].mxu1 %v9578_v46  ;;  %5855 = vmatprep.mubr.f32.mxu0 %v9579_v19 }
 0x199   : > { %5543 = vmatprep.mubr.f32.mxu1 %v9579_v19  ;;  %v9580_v19 = vld [vmem:[#allocation15_spill] sm:$0xff] }
 0x19b   : > { %5856 = vmatmul.mubr.f32.gmra.mrb[58].mxu0 %v7577_v25 }
 0x19c   : > { %5544 = vmatmul.mubr.f32.gmra.mrb[58].mxu1 %v7577_v25  ;;  %5858 = vmatprep.mubr.f32.mxu0 %v7582_v28  ;;  %v9581_v25 = vld [vmem:[#allocation16_spill] sm:$0xff] }
 0x19d   : > { %5546 = vmatprep.mubr.f32.mxu1 %v7582_v28  ;;  %v9582_v28 = vld [vmem:[#allocation17_spill] sm:$0xff] }
 0x19f   : > { %5859 = vmatmul.mubr.f32.gmra.mrb[60].mxu0 %v7593_v49 }
 0x1a0   : > { %5547 = vmatmul.mubr.f32.gmra.mrb[60].mxu1 %v7593_v49  ;;  %5861 = vmatprep.mubr.f32.mxu0 %v7599_v6  ;;  %v9583_v49 = vld [vmem:[#allocation18_spill] sm:$0xff] }
 0x1a1   : > { %5549 = vmatprep.mubr.f32.mxu1 %v7599_v6  ;;  %v9584_v6 = vld [vmem:[#allocation19_spill] sm:$0xff] }
 0x1a3   : > { %5862 = vmatmul.mubr.f32.gmra.mrb[62].mxu0 %v7607_v53 }
 0x1a4   : > { %5550 = vmatmul.mubr.f32.gmra.mrb[62].mxu1 %v7607_v53  ;;  %5872 = vmatprep.mubr.f32.mxu0 %v6993_v15  ;;  %v9585_v15 = vld [vmem:[#allocation20_spill] sm:$0xff] }
 0x1a5   : > { %5560 = vmatprep.mubr.f32.mxu1 %v9580_v19  ;;  %v9612_v19 = vld [vmem:[#allocation56_spill] sm:$0xff] }
 0x1a7   : > { %5873 = vmatmul.mubr.f32.vlgmr.msra.gmra.mrb[0].mxu0 %v6995_v16  ;;  %v9586_v16 = vld [vmem:[#allocation21_spill] sm:$0xff] }
 0x1a8   : > { %5561 = vmatmul.mubr.f32.vlgmr.msra.gmra.mrb[0].mxu1 %v9581_v25  ;;  %5875 = vmatprep.mubr.f32.mxu0 %v7020_v27  ;;  %v9587_v27 = vld [vmem:[#allocation22_spill] sm:$0xff] }
 0x1a9   : > { %5563 = vmatprep.mubr.f32.mxu1 %v9582_v28  ;;  %v9610_v25 = vld [vmem:[#allocation54_spill] sm:$0xff]  ;;  %v9611_v28 = vld [vmem:[#allocation55_spill] sm:$0xff] }
 0x1ab   : > { %5876 = vmatmul.mubr.f32.gmra.mrb[2].mxu0 %v7025_v29  ;;  %v9588_v29 = vld [vmem:[#allocation23_spill] sm:$0xff] }
 0x1ac   : > { %5564 = vmatmul.mubr.f32.gmra.mrb[2].mxu1 %v9583_v49  ;;  %5878 = vmatprep.mubr.f32.mxu0 %v7041_v39  ;;  %v9589_v39 = vld [vmem:[#allocation24_spill] sm:$0xff]  ;;  %v9609_v49 = vld [vmem:[#allocation51_spill] sm:$0xff] }
 0x1ad   : > { %5566 = vmatprep.mubr.f32.mxu1 %v9584_v6  ;;  %v9613_v6 = vld [vmem:[#allocation60_spill] sm:$0xff] }
 0x1af   : > { %5879 = vmatmul.mubr.f32.gmra.mrb[4].mxu0 %v7053_v48  ;;  %v9590_v48 = vld [vmem:[#allocation25_spill] sm:$0xff] }
 0x1b0   : > { %5567 = vmatmul.mubr.f32.gmra.mrb[4].mxu1 %v9585_v15  ;;  %5881 = vmatprep.mubr.f32.mxu0 %v7066_v62  ;;  %v9591_v62 = vld [vmem:[#allocation26_spill] sm:$0xff]  ;;  %v9648_v15 = vld [vmem:[#allocation111_spill] sm:$0xff] }
 0x1b1   : > { %5569 = vmatprep.mubr.f32.mxu1 %v9586_v16 }
 0x1b3   : > { %5882 = vmatmul.mubr.f32.gmra.mrb[6].mxu0 %v7072_v7  ;;  %v9592_v7 = vld [vmem:[#allocation27_spill] sm:$0xff] }
 0x1b4   : > { %5570 = vmatmul.mubr.f32.gmra.mrb[6].mxu1 %v9587_v27  ;;  %5884 = vmatprep.mubr.f32.mxu0 %v7078_v11  ;;  %v9593_v11 = vld [vmem:[#allocation28_spill] sm:$0xff] }
 0x1b5   : > { %5572 = vmatprep.mubr.f32.mxu1 %v9588_v29  ;;  %v7890_v29 = vld [vmem:[%s9269_s2] ss:$0 sm:$0xff] }
 0x1b7   : > { %5885 = vmatmul.mubr.f32.gmra.mrb[8].mxu0 %v7086_v23  ;;  %v9594_v23 = vld [vmem:[#allocation29_spill] sm:$0xff] }
 0x1b8   : > { %5573 = vmatmul.mubr.f32.gmra.mrb[8].mxu1 %v9589_v39  ;;  %5887 = vmatprep.mubr.f32.mxu0 %v7093_v31  ;;  %v9595_v31 = vld [vmem:[#allocation30_spill] sm:$0xff] }
 0x1b9   : > { %5575 = vmatprep.mubr.f32.mxu1 %v9590_v48 }
 0x1bb   : > { %5888 = vmatmul.mubr.f32.gmra.mrb[10].mxu0 %v7100_v37  ;;  %v9596_v37 = vld [vmem:[#allocation31_spill] sm:$0xff] }
 0x1bc   : > { %5576 = vmatmul.mubr.f32.gmra.mrb[10].mxu1 %v9591_v62  ;;  %5890 = vmatprep.mubr.f32.mxu0 %v7114_v50  ;;  %v9597_v50 = vld [vmem:[#allocation32_spill] sm:$0xff] }
 0x1bd   : > { %5578 = vmatprep.mubr.f32.mxu1 %v9592_v7 }
 0x1bf   : > { %5891 = vmatmul.mubr.f32.gmra.mrb[12].mxu0 %v7128_v3  ;;  %v9598_v3 = vld [vmem:[#allocation33_spill] sm:$0xff] }
 0x1c0   : > { %5579 = vmatmul.mubr.f32.gmra.mrb[12].mxu1 %v9593_v11  ;;  %5893 = vmatprep.mubr.f32.mxu0 %v7133_v13  ;;  %v9599_v13 = vld [vmem:[#allocation34_spill] sm:$0xff] }
 0x1c1   : > { %5581 = vmatprep.mubr.f32.mxu1 %v9594_v23 }
 0x1c3   : > { %5894 = vmatmul.mubr.f32.gmra.mrb[14].mxu0 %v7146_v45  ;;  %v9600_v45 = vld [vmem:[#allocation35_spill] sm:$0xff] }
 0x1c4   : > { %5582 = vmatmul.mubr.f32.gmra.mrb[14].mxu1 %v9595_v31  ;;  %5896 = vmatprep.mubr.f32.mxu0 %v7150_v52  ;;  %v9601_v52 = vld [vmem:[#allocation36_spill] sm:$0xff] }
 0x1c5   : > { %5584 = vmatprep.mubr.f32.mxu1 %v9596_v37 }
 0x1c7   : > { %5897 = vmatmul.mubr.f32.gmra.mrb[16].mxu0 %v7158_v61  ;;  %v9602_v61 = vld [vmem:[#allocation37_spill] sm:$0xff] }
 0x1c8   : > { %5585 = vmatmul.mubr.f32.gmra.mrb[16].mxu1 %v9597_v50  ;;  %5899 = vmatprep.mubr.f32.mxu0 %v7164_v4  ;;  %v9603_v4 = vld [vmem:[#allocation41_spill] sm:$0xff] }
 0x1c9   : > { %5587 = vmatprep.mubr.f32.mxu1 %v9598_v3 }
 0x1cb   : > { %5900 = vmatmul.mubr.f32.gmra.mrb[18].mxu0 %v7172_v9  ;;  %v9604_v9 = vld [vmem:[#allocation42_spill] sm:$0xff] }
 0x1cc   : > { %5588 = vmatmul.mubr.f32.gmra.mrb[18].mxu1 %v9599_v13  ;;  %5902 = vmatprep.mubr.f32.mxu0 %v7187_v40  ;;  %v9605_v40 = vld [vmem:[#allocation43_spill] sm:$0xff] }
 0x1cd   : > { %5590 = vmatprep.mubr.f32.mxu1 %v9600_v45 }
 0x1cf   : > { %5903 = vmatmul.mubr.f32.gmra.mrb[20].mxu0 %v7192_v60  ;;  %v9606_v60 = vld [vmem:[#allocation44_spill] sm:$0xff] }
 0x1d0   : > { %5591 = vmatmul.mubr.f32.gmra.mrb[20].mxu1 %v9601_v52  ;;  %5905 = vmatprep.mubr.f32.mxu0 %v7201_v56  ;;  %v9607_v56 = vld [vmem:[#allocation47_spill] sm:$0xff] }
 0x1d1   : > { %5593 = vmatprep.mubr.f32.mxu1 %v9602_v61 }
 0x1d3   : > { %5906 = vmatmul.mubr.f32.gmra.mrb[22].mxu0 %v7213_v32  ;;  %v9608_v32 = vld [vmem:[#allocation48_spill] sm:$0xff] }
 0x1d4   : > { %5594 = vmatmul.mubr.f32.gmra.mrb[22].mxu1 %v9603_v4  ;;  %5908 = vmatprep.mubr.f32.mxu0 %v9551_v14  ;;  %v9614_v14 = vld [vmem:[#allocation62_spill] sm:$0xff] }
 0x1d5   : > { %5596 = vmatprep.mubr.f32.mxu1 %v9604_v9 }
 0x1d7   : > { %5909 = vmatmul.mubr.f32.gmra.mrb[24].mxu0 %v9552_v20  ;;  %v9615_v20 = vld [vmem:[#allocation63_spill] sm:$0xff] }
 0x1d8   : > { %5597 = vmatmul.mubr.f32.gmra.mrb[24].mxu1 %v9605_v40  ;;  %5911 = vmatprep.mubr.f32.mxu0 %v9553_v38  ;;  %v9616_v38 = vld [vmem:[#allocation65_spill] sm:$0xff] }
 0x1d9   : > { %5599 = vmatprep.mubr.f32.mxu1 %v9606_v60 }
 0x1db   : > { %5912 = vmatmul.mubr.f32.gmra.mrb[26].mxu0 %v9554_v22  ;;  %v9617_v22 = vld [vmem:[#allocation67_spill] sm:$0xff] }
 0x1dc   : > { %5600 = vmatmul.mubr.f32.gmra.mrb[26].mxu1 %v9607_v56  ;;  %5914 = vmatprep.mubr.f32.mxu0 %v9555_v2  ;;  %v9618_v2 = vld [vmem:[#allocation69_spill] sm:$0xff] }
 0x1dd   : > { %5602 = vmatprep.mubr.f32.mxu1 %v9608_v32 }
 0x1df   : > { %5915 = vmatmul.mubr.f32.gmra.mrb[28].mxu0 %v9556_v8  ;;  %v9619_v8 = vld [vmem:[#allocation71_spill] sm:$0xff] }
 0x1e0   : > { %5603 = vmatmul.mubr.f32.gmra.mrb[28].mxu1 %v9609_v49  ;;  %5917 = vmatprep.mubr.f32.mxu0 %v9557_v12  ;;  %v9620_v12 = vld [vmem:[#allocation73_spill] sm:$0xff] }
 0x1e1   : > { %5605 = vmatprep.mubr.f32.mxu1 %v9610_v25 }
 0x1e3   : > { %5918 = vmatmul.mubr.f32.gmra.mrb[30].mxu0 %v9558_v24  ;;  %v9621_v24 = vld [vmem:[#allocation76_spill] sm:$0xff] }
 0x1e4   : > { %5606 = vmatmul.mubr.f32.gmra.mrb[30].mxu1 %v9611_v28  ;;  %5920 = vmatprep.mubr.f32.mxu0 %v9559_v43  ;;  %v9622_v43 = vld [vmem:[#allocation77_spill] sm:$0xff] }
 0x1e5   : > { %5608 = vmatprep.mubr.f32.mxu1 %v9612_v19 }
 0x1e7   : > { %5921 = vmatmul.mubr.f32.gmra.mrb[32].mxu0 %v9560_v51  ;;  %v9623_v51 = vld [vmem:[#allocation79_spill] sm:$0xff] }
 0x1e8   : > { %5609 = vmatmul.mubr.f32.gmra.mrb[32].mxu1 %v9613_v6  ;;  %5923 = vmatprep.mubr.f32.mxu0 %v9561_v55  ;;  %v9624_v55 = vld [vmem:[#allocation82_spill] sm:$0xff] }
 0x1e9   : > { %5611 = vmatprep.mubr.f32.mxu1 %v9614_v14 }
 0x1eb   : > { %5924 = vmatmul.mubr.f32.gmra.mrb[34].mxu0 %v9562_v18  ;;  %v9625_v18 = vld [vmem:[#allocation83_spill] sm:$0xff] }
 0x1ec   : > { %5612 = vmatmul.mubr.f32.gmra.mrb[34].mxu1 %v9615_v20  ;;  %5926 = vmatprep.mubr.f32.mxu0 %v9563_v0  ;;  %v9626_v0 = vld [vmem:[#allocation84_spill] sm:$0xff] }
 0x1ed   : > { %5614 = vmatprep.mubr.f32.mxu1 %v9616_v38 }
 0x1ef   : > { %5927 = vmatmul.mubr.f32.gmra.mrb[36].mxu0 %v9564_v5  ;;  %v9627_v5 = vld [vmem:[#allocation86_spill] sm:$0xff] }
 0x1f0   : > { %5615 = vmatmul.mubr.f32.gmra.mrb[36].mxu1 %v9617_v22  ;;  %5929 = vmatprep.mubr.f32.mxu0 %v9565_v10  ;;  %v9628_v10 = vld [vmem:[#allocation87_spill] sm:$0xff] }
 0x1f1   : > { %5617 = vmatprep.mubr.f32.mxu1 %v9618_v2 }
 0x1f3   : > { %5930 = vmatmul.mubr.f32.gmra.mrb[38].mxu0 %v9566_v59  ;;  %v9629_v59 = vld [vmem:[#allocation89_spill] sm:$0xff] }
 0x1f4   : > { %5618 = vmatmul.mubr.f32.gmra.mrb[38].mxu1 %v9619_v8  ;;  %5932 = vmatprep.mubr.f32.mxu0 %v9567_v1  ;;  %v9630_v1 = vld [vmem:[#allocation90_spill] sm:$0xff] }
 0x1f5   : > { %5620 = vmatprep.mubr.f32.mxu1 %v9620_v12 }
 0x1f7   : > { %5933 = vmatmul.mubr.f32.gmra.mrb[40].mxu0 %v9568_v36  ;;  %v9638_v36 = vld [vmem:[#allocation100_spill] sm:$0xff] }
 0x1f8   : > { %5621 = vmatmul.mubr.f32.gmra.mrb[40].mxu1 %v9621_v24  ;;  %5935 = vmatprep.mubr.f32.mxu0 %v9569_v41  ;;  %v9640_v41 = vld [vmem:[#allocation102_spill] sm:$0xff] }
 0x1f9   : > { %5623 = vmatprep.mubr.f32.mxu1 %v9622_v43 }
 0x1fb   : > { %5936 = vmatmul.mubr.f32.gmra.mrb[42].mxu0 %v9570_v42  ;;  %v9642_v42 = vld [vmem:[#allocation104_spill] sm:$0xff] }
 0x1fc   : > { %5624 = vmatmul.mubr.f32.gmra.mrb[42].mxu1 %v9623_v51  ;;  %5938 = vmatprep.mubr.f32.mxu0 %v9571_v63  ;;  %v9644_v63 = vld [vmem:[#allocation106_spill] sm:$0xff] }
 0x1fd   : > { %5626 = vmatprep.mubr.f32.mxu1 %v9624_v55 }
 0x1ff   : > { %5939 = vmatmul.mubr.f32.gmra.mrb[44].mxu0 %v9572_v47  ;;  %v9646_v47 = vld [vmem:[#allocation108_spill] sm:$0xff] }
 0x200   : > { %5627 = vmatmul.mubr.f32.gmra.mrb[44].mxu1 %v9625_v18  ;;  %5941 = vmatprep.mubr.f32.mxu0 %v9573_v33  ;;  %v9631_v33 = vld [vmem:[#allocation93_spill] sm:$0xff] }
 0x201   : > { %5629 = vmatprep.mubr.f32.mxu1 %v9626_v0 }
 0x203   : > { %5942 = vmatmul.mubr.f32.gmra.mrb[46].mxu0 %v9574_v54  ;;  %v9632_v54 = vld [vmem:[#allocation94_spill] sm:$0xff] }
 0x204   : > { %5630 = vmatmul.mubr.f32.gmra.mrb[46].mxu1 %v9627_v5  ;;  %5944 = vmatprep.mubr.f32.mxu0 %v7462_v58  ;;  %v9633_v58 = vld [vmem:[#allocation95_spill] sm:$0xff] }
 0x205   : > { %5632 = vmatprep.mubr.f32.mxu1 %v9628_v10 }
 0x207   : > { %5945 = vmatmul.mubr.f32.gmra.mrb[48].mxu0 %v7472_v57  ;;  %v9634_v57 = vld [vmem:[#allocation96_spill] sm:$0xff] }
 0x208   : > { %5633 = vmatmul.mubr.f32.gmra.mrb[48].mxu1 %v9629_v59  ;;  %5947 = vmatprep.mubr.f32.mxu0 %v9575_v34  ;;  %v9635_v34 = vld [vmem:[#allocation98_spill] sm:$0xff] }
 0x209   : > { %5635 = vmatprep.mubr.f32.mxu1 %v9630_v1 }
 0x20b   : > { %5948 = vmatmul.mubr.f32.gmra.mrb[50].mxu0 %v7496_v35  ;;  %v9636_v35 = vld [vmem:[#allocation99_spill] sm:$0xff] }
 0x20c   : > { %5636 = vmatmul.mubr.f32.gmra.mrb[50].mxu1 %v9631_v33  ;;  %5950 = vmatprep.mubr.f32.mxu0 %v7501_v30  ;;  %v9637_v30 = vld [vmem:[#allocation101_spill] sm:$0xff] }
 0x20d   : > { %5638 = vmatprep.mubr.f32.mxu1 %v9632_v54 }
 0x20f   : > { %5951 = vmatmul.mubr.f32.gmra.mrb[52].mxu0 %v9576_v17  ;;  %v9639_v17 = vld [vmem:[#allocation103_spill] sm:$0xff] }
 0x210   : > { %5639 = vmatmul.mubr.f32.gmra.mrb[52].mxu1 %v9633_v58  ;;  %5953 = vmatprep.mubr.f32.mxu0 %v9577_v44  ;;  %v9641_v44 = vld [vmem:[#allocation105_spill] sm:$0xff] }
 0x211   : > { %5641 = vmatprep.mubr.f32.mxu1 %v9634_v57 }
 0x213   : > { %5954 = vmatmul.mubr.f32.gmra.mrb[54].mxu0 %v7542_v21  ;;  %v9643_v21 = vld [vmem:[#allocation107_spill] sm:$0xff] }
 0x214   : > { %5642 = vmatmul.mubr.f32.gmra.mrb[54].mxu1 %v9635_v34  ;;  %5956 = vmatprep.mubr.f32.mxu0 %v7544_v26  ;;  %v9645_v26 = vld [vmem:[#allocation109_spill] sm:$0xff] }
 0x215   : > { %5644 = vmatprep.mubr.f32.mxu1 %v9636_v35 }
 0x217   : > { %5957 = vmatmul.mubr.f32.gmra.mrb[56].mxu0 %v9578_v46  ;;  %v9647_v46 = vld [vmem:[#allocation110_spill] sm:$0xff] }
 0x218   : > { %5645 = vmatmul.mubr.f32.gmra.mrb[56].mxu1 %v9637_v30  ;;  %5959 = vmatprep.mubr.f32.mxu0 %v9638_v36 }
 0x219   : > { %5647 = vmatprep.mubr.f32.mxu1 %v9639_v17 }
 0x21b   : > { %5960 = vmatmul.mubr.f32.gmra.mrb[58].mxu0 %v9640_v41 }
 0x21c   : > { %5648 = vmatmul.mubr.f32.gmra.mrb[58].mxu1 %v9641_v44  ;;  %5962 = vmatprep.mubr.f32.mxu0 %v9642_v42 }
 0x21d   : > { %5650 = vmatprep.mubr.f32.mxu1 %v9643_v21 }
 0x21f   : > { %5963 = vmatmul.mubr.f32.gmra.mrb[60].mxu0 %v9644_v63 }
 0x220   : > { %5651 = vmatmul.mubr.f32.gmra.mrb[60].mxu1 %v9645_v26  ;;  %5965 = vmatprep.mubr.f32.mxu0 %v9646_v47 }
 0x221   : > { %5653 = vmatprep.mubr.f32.mxu1 %v9647_v46 }
 0x223   : > { %5966 = vmatmul.mubr.f32.gmra.mrb[62].mxu0 %v7607_v53 }
 0x224   : > { %5654 = vmatmul.mubr.f32.gmra.mrb[62].mxu1 %v9648_v15 }
 0x27a   : > { %v5874_v16 = vpop.f32.mrb[0].mxu0 }
 0x27b   : > { %v5562_v27 = vpop.f32.mrb[0].mxu1  ;;  %v3426_v39 = vpop.f32.mrb[1].mxu0 }
 0x27c   : > { %v6016_v48 = vadd.f32 %v5874_v16, %v5562_v27  ;;  %v1868_v62 = vpop.f32.mrb[1].mxu1 }
 0x27d   : > { %v6017_v7 = vadd.f32 %v3426_v39, %v1868_v62 }
 0x27e   : > { %v7893_v11 = vadd.f32 %v6016_v48, %v7890_v29  ;;  %v5877_v23 = vpop.f32.mrb[2].mxu0 }
 0x27f   : > { %v7896_v31 = vadd.f32 %v6017_v7, %v7890_v29  ;;  %v5565_v53 = vpop.f32.mrb[2].mxu1  ;;  %v3438_v37 = vpop.f32.mrb[3].mxu0 }
 0x280   : > { %v3880_v50 = vsel %vm421_vm0, %v7893_v11, 0.0  ;;  %v6018_v3 = vadd.f32 %v5877_v23, %v5565_v53  ;;  %v1882_v13 = vpop.f32.mrb[3].mxu1 }
 0x281   : > { %v3879_v45 = vsel %vm421_vm0, %v7896_v31, 0.0  ;;  %v6019_v52 = vadd.f32 %v3438_v37, %v1882_v13 }
 0x282   : > { %v3881_v61 = vadd.f32 %v3880_v50, %v3879_v45  ;;  %v5880_v4 = vpop.f32.mrb[4].mxu0  ;;  %v7903_v9 = vadd.f32 %v6018_v3, %v7890_v29 }
 0x283   : > { %v7906_v40 = vadd.f32 %v6019_v52, %v7890_v29  ;;  %v5568_v60 = vpop.f32.mrb[4].mxu1  ;;  %v3450_v56 = vpop.f32.mrb[5].mxu0 }
 0x284   : > { %v6020_v32 = vadd.f32 %v5880_v4, %v5568_v60  ;;  %v1896_v49 = vpop.f32.mrb[5].mxu1  ;;  %v3884_v20 = vsel %vm421_vm0, %v7903_v9, 0.0 }
 0x285   : > { %v3882_v25 = vsel %vm421_vm0, %v7906_v40, 0.0  ;;  %v6021_v28 = vadd.f32 %v3450_v56, %v1896_v49 }
 0x286   : > { %v3883_v19 = vadd.f32 %v3882_v25, %v3881_v61  ;;  %v7911_v6 = vadd.f32 %v6020_v32, %v7890_v29  ;;  %v5883_v14 = vpop.f32.mrb[6].mxu0 }
 0x287   : > { %v7916_v38 = vadd.f32 %v6021_v28, %v7890_v29  ;;  %v5571_v22 = vpop.f32.mrb[6].mxu1  ;;  %v3462_v2 = vpop.f32.mrb[7].mxu0 }
 0x288   : > { %v3885_v8 = vadd.f32 %v3884_v20, %v3883_v19  ;;  %v3893_v12 = vsel %vm421_vm0, %v7911_v6, 0.0  ;;  %v6022_v24 = vadd.f32 %v5883_v14, %v5571_v22  ;;  %v1910_v43 = vpop.f32.mrb[7].mxu1 }
 0x289   : > { %v3892_v51 = vsel %vm421_vm0, %v7916_v38, 0.0  ;;  %v6023_v55 = vadd.f32 %v3462_v2, %v1910_v43 }
 0x28a   : > { %v3886_v18 = vrot.slane %v3885_v8, 4  ;;  %v3894_v0 = vadd.f32 %v3893_v12, %v3892_v51  ;;  %v5886_v5 = vpop.f32.mrb[8].mxu0  ;;  %v7923_v10 = vadd.f32 %v6022_v24, %v7890_v29 }
 0x28b   : > { %v7926_v59 = vadd.f32 %v6023_v55, %v7890_v29  ;;  %v5574_v1 = vpop.f32.mrb[8].mxu1  ;;  %v3474_v33 = vpop.f32.mrb[9].mxu0 }
 0x28c   : > { %v3887_v54 = vadd.f32 %v3886_v18, %v3885_v8  ;;  %v6024_v58 = vadd.f32 %v5886_v5, %v5574_v1  ;;  %v1924_v57 = vpop.f32.mrb[9].mxu1  ;;  %v3897_v44 = vsel %vm421_vm0, %v7923_v10, 0.0 }
 0x28d   : > { %v3895_v34 = vsel %vm421_vm0, %v7926_v59, 0.0  ;;  %v6025_v35 = vadd.f32 %v3474_v33, %v1924_v57 }
 0x28e   : > { %v3888_v30 = vrot.slane %v3887_v54, 2  ;;  %v3896_v36 = vadd.f32 %v3895_v34, %v3894_v0  ;;  %v7931_v17 = vadd.f32 %v6024_v58, %v7890_v29  ;;  %v5889_v41 = vpop.f32.mrb[10].mxu0 }
 0x28f   : > { %v7936_v42 = vadd.f32 %v6025_v35, %v7890_v29  ;;  %v5577_v21 = vpop.f32.mrb[10].mxu1  ;;  %v3486_v63 = vpop.f32.mrb[11].mxu0 }
 0x290   : > { %v3889_v26 = vadd.f32 %v3888_v30, %v3887_v54  ;;  %v3898_v47 = vadd.f32 %v3897_v44, %v3896_v36  ;;  %v3906_v46 = vsel %vm421_vm0, %v7931_v17, 0.0  ;;  %v6026_v15 = vadd.f32 %v5889_v41, %v5577_v21  ;;  %v1938_v16 = vpop.f32.mrb[11].mxu1 }
 0x291   : > { %v3905_v27 = vsel %vm421_vm0, %v7936_v42, 0.0  ;;  %v6027_v39 = vadd.f32 %v3486_v63, %v1938_v16 }
 0x292   : > { %v3890_v48 = vrot.slane %v3889_v26, 1  ;;  %v3899_v62 = vrot.slane %v3898_v47, 4  ;;  %v3907_v7 = vadd.f32 %v3906_v46, %v3905_v27  ;;  %v5892_v23 = vpop.f32.mrb[12].mxu0  ;;  %v7943_v53 = vadd.f32 %v6026_v15, %v7890_v29 }
 0x293   : > { %v7946_v37 = vadd.f32 %v6027_v39, %v7890_v29  ;;  %v5580_v50 = vpop.f32.mrb[12].mxu1  ;;  %v3498_v3 = vpop.f32.mrb[13].mxu0 }
 0x294   : > { %v3891_v13 = vadd.f32 %v3890_v48, %v3889_v26  ;;  %v3900_v45 = vadd.f32 %v3899_v62, %v3898_v47  ;;  %v6028_v52 = vadd.f32 %v5892_v23, %v5580_v50  ;;  %v1952_v61 = vpop.f32.mrb[13].mxu1  ;;  %v3910_v19 = vsel %vm421_vm0, %v7943_v53, 0.0 }
 0x295   : > { %v3908_v4 = vsel %vm421_vm0, %v7946_v37, 0.0  ;;  %v6029_v60 = vadd.f32 %v3498_v3, %v1952_v61 }
 0x296   : > { %v4088_v56 = vmul.f32 0.03125, %v3891_v13  ;;  %v3901_v32 = vrot.slane %v3900_v45, 2  ;;  %v3909_v49 = vadd.f32 %v3908_v4, %v3907_v7  ;;  %v7951_v25 = vadd.f32 %v6028_v52, %v7890_v29  ;;  %v5895_v28 = vpop.f32.mrb[14].mxu0 }
 0x297   : > { %v7956_v14 = vadd.f32 %v6029_v60, %v7890_v29  ;;  %v5583_v20 = vpop.f32.mrb[14].mxu1  ;;  %v3510_v22 = vpop.f32.mrb[15].mxu0 }
 0x298   : > { %v7959_v2 = vsub.f32 %v7896_v31, %v4088_v56  ;;  %v7962_v8 = vsub.f32 %v7893_v11, %v4088_v56  ;;  %v7965_v12 = vsub.f32 %v7906_v40, %v4088_v56  ;;  %v7968_v24 = vsub.f32 %v7903_v9, %v4088_v56  ;;  %v1966_v43 = vpop.f32.mrb[15].mxu1 }
 0x299   : > { %v3902_v51 = vadd.f32 %v3901_v32, %v3900_v45  ;;  %v3911_v55 = vadd.f32 %v3910_v19, %v3909_v49  ;;  %v3919_v18 = vsel %vm421_vm0, %v7951_v25, 0.0  ;;  %v3918_v0 = vsel %vm421_vm0, %v7956_v14, 0.0 }
 0x29a   : > { %v4168_v31 = vmul.f32 %v7959_v2, %v7959_v2  ;;  %v4169_v11 = vmul.f32 %v7962_v8, %v7962_v8  ;;  %v4170_v40 = vmul.f32 %v7965_v12, %v7965_v12  ;;  %v4171_v9 = vmul.f32 %v7968_v24, %v7968_v24  ;;  %v5898_v5 = vpop.f32.mrb[16].mxu0 }
 0x29b   : > { %v3903_v1 = vrot.slane %v3902_v51, 1  ;;  %v3912_v33 = vrot.slane %v3911_v55, 4  ;;  %v3920_v54 = vadd.f32 %v3919_v18, %v3918_v0  ;;  %v6030_v58 = vadd.f32 %v5895_v28, %v5583_v20  ;;  %v5586_v57 = vpop.f32.mrb[16].mxu1  ;;  %v3522_v34 = vpop.f32.mrb[17].mxu0 }
 0x29c   : > { %v4232_v35 = vsel %vm421_vm0, %v4168_v31, 0.0  ;;  %v4233_v30 = vsel %vm421_vm0, %v4169_v11, 0.0  ;;  %v4235_v36 = vsel %vm421_vm0, %v4170_v40, 0.0  ;;  %v1980_v41 = vpop.f32.mrb[17].mxu1  ;;  %v4237_v47 = vsel %vm421_vm0, %v4171_v9, 0.0 }
 0x29d   : > { %v4234_v44 = vadd.f32 %v4233_v30, %v4232_v35  ;;  %v3904_v21 = vadd.f32 %v3903_v1, %v3902_v51  ;;  %v3913_v63 = vadd.f32 %v3912_v33, %v3911_v55  ;;  %v7986_v26 = vadd.f32 %v6030_v58, %v7890_v29 }
 0x29e   : > { %v6031_v46 = vadd.f32 %v3510_v22, %v1966_v43  ;;  %v6032_v15 = vadd.f32 %v5898_v5, %v5586_v57  ;;  %v6033_v16 = vadd.f32 %v3522_v34, %v1980_v41  ;;  %v5901_v27 = vpop.f32.mrb[18].mxu0 }
 0x29f   : > { %v4236_v39 = vadd.f32 %v4235_v36, %v4234_v44  ;;  %v4089_v48 = vmul.f32 0.03125, %v3904_v21  ;;  %v3914_v62 = vrot.slane %v3913_v63, 2  ;;  %v3923_v7 = vsel %vm421_vm0, %v7986_v26, 0.0  ;;  %v5589_v23 = vpop.f32.mrb[18].mxu1  ;;  %v3534_v50 = vpop.f32.mrb[19].mxu0 }
 0x2a0   : > { %v7992_v3 = vadd.f32 %v6031_v46, %v7890_v29  ;;  %v7995_v13 = vadd.f32 %v6032_v15, %v7890_v29  ;;  %v7998_v45 = vadd.f32 %v6033_v16, %v7890_v29  ;;  %v6034_v52 = vadd.f32 %v5901_v27, %v5589_v23  ;;  %v1994_v61 = vpop.f32.mrb[19].mxu1 }
 0x2a1   : > { %v4238_v4 = vadd.f32 %v4237_v47, %v4236_v39  ;;  %v8001_v60 = vsub.f32 %v7916_v38, %v4089_v48  ;;  %v8004_v56 = vsub.f32 %v7911_v6, %v4089_v48  ;;  %v8007_v32 = vsub.f32 %v7926_v59, %v4089_v48 }
 0x2a2   : > { %v8010_v49 = vsub.f32 %v7923_v10, %v4089_v48  ;;  %v3915_v28 = vadd.f32 %v3914_v62, %v3913_v63  ;;  %v3921_v19 = vsel %vm421_vm0, %v7992_v3, 0.0  ;;  %v3932_v20 = vsel %vm421_vm0, %v7995_v13, 0.0  ;;  %v5904_v22 = vpop.f32.mrb[20].mxu0 }
 0x2a3   : > { %v4239_v43 = vrot.slane %v4238_v4, 4  ;;  %v4172_v38 = vmul.f32 %v8001_v60, %v8001_v60  ;;  %v4173_v6 = vmul.f32 %v8004_v56, %v8004_v56  ;;  %v4174_v59 = vmul.f32 %v8007_v32, %v8007_v32  ;;  %v5592_v10 = vpop.f32.mrb[20].mxu1  ;;  %v3546_v51 = vpop.f32.mrb[21].mxu0 }
 0x2a4   : > { %v4175_v55 = vmul.f32 %v8010_v49, %v8010_v49  ;;  %v3916_v18 = vrot.slane %v3915_v28, 1  ;;  %v3922_v0 = vadd.f32 %v3921_v19, %v3920_v54  ;;  %v3931_v31 = vsel %vm421_vm0, %v7998_v45, 0.0  ;;  %v2008_v11 = vpop.f32.mrb[21].mxu1 }
 0x2a5   : > { %v4240_v40 = vadd.f32 %v4239_v43, %v4238_v4  ;;  %v4245_v9 = vsel %vm421_vm0, %v4172_v38, 0.0  ;;  %v4246_v5 = vsel %vm421_vm0, %v4173_v6, 0.0  ;;  %v4248_v1 = vsel %vm421_vm0, %v4174_v59, 0.0 }
 0x2a6   : > { %v4247_v33 = vadd.f32 %v4246_v5, %v4245_v9  ;;  %v4250_v58 = vsel %vm421_vm0, %v4175_v55, 0.0  ;;  %v3917_v57 = vadd.f32 %v3916_v18, %v3915_v28  ;;  %v3924_v34 = vadd.f32 %v3923_v7, %v3922_v0  ;;  %v5907_v35 = vpop.f32.mrb[22].mxu0 }
 0x2a7   : > { %v4241_v30 = vrot.slane %v4240_v40, 2  ;;  %v3933_v36 = vadd.f32 %v3932_v20, %v3931_v31  ;;  %v8031_v54 = vadd.f32 %v6034_v52, %v7890_v29  ;;  %v6035_v41 = vadd.f32 %v3534_v50, %v1994_v61  ;;  %v5595_v44 = vpop.f32.mrb[22].mxu1  ;;  %v8033_v21 = vpop.f32.mrb[23].mxu0 }
 0x2a8   : > { %v4249_v63 = vadd.f32 %v4248_v1, %v4247_v33  ;;  %v4090_v47 = vmul.f32 0.03125, %v3917_v57  ;;  %v3925_v46 = vrot.slane %v3924_v34, 4  ;;  %v6036_v15 = vadd.f32 %v5904_v22, %v5592_v10  ;;  %v2022_v16 = vpop.f32.mrb[23].mxu1 }
 0x2a9   : > { %v4242_v27 = vadd.f32 %v4241_v30, %v4240_v40  ;;  %v3936_v39 = vsel %vm421_vm0, %v8031_v54, 0.0  ;;  %v8038_v48 = vadd.f32 %v6035_v41, %v7890_v29  ;;  %v6037_v62 = vadd.f32 %v3546_v51, %v2008_v11 }
 0x2aa   : > { %v4251_v7 = vadd.f32 %v4250_v58, %v4249_v63  ;;  %v8041_v23 = vsub.f32 %v7936_v42, %v4090_v47  ;;  %v8044_v50 = vsub.f32 %v7931_v17, %v4090_v47  ;;  %v8047_v52 = vsub.f32 %v7946_v37, %v4090_v47  ;;  %v5910_v61 = vpop.f32.mrb[24].mxu0 }
 0x2ab   : > { %v4243_v4 = vrot.slane %v4242_v27, 1  ;;  %v8050_v28 = vsub.f32 %v7943_v53, %v4090_v47  ;;  %v3926_v19 = vadd.f32 %v3925_v46, %v3924_v34  ;;  %v3934_v20 = vsel %vm421_vm0, %v8038_v48, 0.0  ;;  %v5598_v22 = vpop.f32.mrb[24].mxu1  ;;  %v3570_v43 = vpop.f32.mrb[25].mxu0 }
 0x2ac   : > { %v4252_v38 = vrot.slane %v4251_v7, 4  ;;  %v4176_v42 = vmul.f32 %v8041_v23, %v8041_v23  ;;  %v4177_v17 = vmul.f32 %v8044_v50, %v8044_v50  ;;  %v4178_v37 = vmul.f32 %v8047_v52, %v8047_v52  ;;  %v2036_v6 = vpop.f32.mrb[25].mxu1 }
 0x2ad   : > { %v4244_v59 = vadd.f32 %v4243_v4, %v4242_v27  ;;  %v4179_v53 = vmul.f32 %v8050_v28, %v8050_v28  ;;  %v3927_v10 = vrot.slane %v3926_v19, 2  ;;  %v3935_v51 = vadd.f32 %v3934_v20, %v3933_v36 }
 0x2ae   : > { %v4253_v55 = vadd.f32 %v4252_v38, %v4251_v7  ;;  %v4258_v18 = vsel %vm421_vm0, %v4176_v42, 0.0  ;;  %v4259_v0 = vsel %vm421_vm0, %v4177_v17, 0.0  ;;  %v4261_v31 = vsel %vm421_vm0, %v4178_v37, 0.0  ;;  %v8065_v11 = vpop.f32.mrb[26].mxu0 }
 0x2af   : > { %v4440_v40 = vmul.f32 0.03125, %v4244_v59  ;;  %v4260_v9 = vadd.f32 %v4259_v0, %v4258_v18  ;;  %v4263_v5 = vsel %vm421_vm0, %v4179_v53, 0.0  ;;  %v3928_v1 = vadd.f32 %v3927_v10, %v3926_v19  ;;  %v8068_v33 = vpop.f32.mrb[26].mxu1  ;;  %v8070_v58 = vpop.f32.mrb[27].mxu0 }
 0x2b0   : > { %v4254_v57 = vrot.slane %v4253_v55, 2  ;;  %v3937_v34 = vadd.f32 %v3936_v39, %v3935_v51  ;;  %v8073_v30 = vadd.f32 %v6036_v15, %v7890_v29  ;;  %v8076_v36 = vadd.f32 %v6037_v62, %v7890_v29  ;;  %v8078_v41 = vpop.f32.mrb[27].mxu1 }
 0x2b1   : > { %v4456_v63 = vadd.f32 1e-06, %v4440_v40  ;;  %v4262_v47 = vadd.f32 %v4261_v31, %v4260_v9  ;;  %v3929_v46 = vrot.slane %v3928_v1, 1  ;;  %v6038_v27 = vadd.f32 %v5907_v35, %v5595_v44 }
 0x2b2   : > { %v4255_v7 = vadd.f32 %v4254_v57, %v4253_v55  ;;  %v3938_v4 = vrot.slane %v3937_v34, 4  ;;  %v3945_v19 = vsel %vm421_vm0, %v8073_v30, 0.0  ;;  %v3944_v39 = vsel %vm421_vm0, %v8076_v36, 0.0  ;;  %v8084_v20 = vpop.f32.mrb[28].mxu0 }
 0x2b3   : > { %6423 = vrsqrt.f32 %v4456_v63  ;;  %v4264_v15 = vadd.f32 %v4263_v5, %v4262_v47  ;;  %v3930_v62 = vadd.f32 %v3929_v46, %v3928_v1  ;;  %v3946_v38 = vadd.f32 %v3945_v19, %v3944_v39  ;;  %v8086_v42 = vpop.f32.mrb[28].mxu1  ;;  %v8088_v17 = vpop.f32.mrb[29].mxu0 }
 0x2b4   : > { %v4256_v37 = vrot.slane %v4255_v7, 1  ;;  %v3939_v35 = vadd.f32 %v3938_v4, %v3937_v34  ;;  %v8091_v44 = vadd.f32 %v6038_v27, %v7890_v29  ;;  %v6039_v59 = vadd.f32 %v8033_v21, %v2022_v16  ;;  %v8094_v53 = vpop.f32.mrb[29].mxu1 }
 0x2b5   : > { %v4265_v10 = vrot.slane %v4264_v15, 4  ;;  %v4091_v51 = vmul.f32 0.03125, %v3930_v62  ;;  %v6040_v55 = vadd.f32 %v5910_v61, %v5598_v22  ;;  %v6041_v18 = vadd.f32 %v3570_v43, %v2036_v6 }
 0x2b6   : > { %v4257_v0 = vadd.f32 %v4256_v37, %v4255_v7  ;;  %v3940_v31 = vrot.slane %v3939_v35, 2  ;;  %v3949_v40 = vsel %vm421_vm0, %v8091_v44, 0.0  ;;  %v8099_v9 = vadd.f32 %v6039_v59, %v7890_v29  ;;  %v8101_v5 = vpop.f32.mrb[30].mxu0 }
 0x2b7   : > { %v4266_v1 = vadd.f32 %v4265_v10, %v4264_v15  ;;  %v8104_v57 = vsub.f32 %v7956_v14, %v4091_v51  ;;  %v8107_v21 = vsub.f32 %v7951_v25, %v4091_v51  ;;  %v8110_v16 = vsub.f32 %v7992_v3, %v4091_v51  ;;  %v8112_v61 = vpop.f32.mrb[30].mxu1  ;;  %v8114_v22 = vpop.f32.mrb[31].mxu0  ;;  %v8141_v10 = vld [vmem:[%s6973_s7] sm:$0xff] }
 0x2b8   : > { %v4441_v43 = vmul.f32 0.03125, %v4257_v0  ;;  %v8117_v6 = vsub.f32 %v7986_v26, %v4091_v51  ;;  %v3941_v34 = vadd.f32 %v3940_v31, %v3939_v35  ;;  %v3947_v63 = vsel %vm421_vm0, %v8099_v9, 0.0  ;;  %v8121_v14 = vpop.f32.mrb[31].mxu1 }
 0x2b9   : > { %9649 = vst [vmem:[#allocation38_spill] sm:$0xff] %v8104_v57  ;;  %9650 = vst [vmem:[#allocation39_spill] sm:$0xff] %v8107_v21  ;;  %v4267_v25 = vrot.slane %v4266_v1, 2  ;;  %v4180_v3 = vmul.f32 %v8104_v57, %v8104_v57  ;;  %v4181_v47 = vmul.f32 %v8107_v21, %v8107_v21  ;;  %v4182_v46 = vmul.f32 %v8110_v16, %v8110_v16 }
 0x2ba   : > { %9651 = vst [vmem:[#allocation40_spill] sm:$0xff] %v8110_v16  ;;  %9652 = vst [vmem:[#allocation45_spill] sm:$0xff] %v8117_v6  ;;  %v4457_v27 = vadd.f32 1e-06, %v4441_v43  ;;  %v4183_v26 = vmul.f32 %v8117_v6, %v8117_v6  ;;  %v3942_v7 = vrot.slane %v3941_v34, 1  ;;  %v3948_v4 = vadd.f32 %v3947_v63, %v3946_v38  ;;  %v8131_v19 = vpop.f32.mrb[32].mxu0 }
 0x2bb   : > { %v4268_v39 = vadd.f32 %v4267_v25, %v4266_v1  ;;  %v4271_v15 = vsel %vm421_vm0, %v4180_v3, 0.0  ;;  %v4272_v62 = vsel %vm421_vm0, %v4181_v47, 0.0  ;;  %v4274_v37 = vsel %vm421_vm0, %v4182_v46, 0.0  ;;  %v8136_v35 = vpop.f32.mrb[32].mxu1  ;;  %v8138_v59 = vpop.f32.mrb[33].mxu0  ;;  %v8147_v43 = vld [vmem:[%s6973_s7 + $0x8] sm:$0xff] }
 0x2bc   : > { %9653 = vst [vmem:[#allocation46_spill] sm:$0xff] %v8138_v59  ;;  %6425 = vrsqrt.f32 %v4457_v27  ;;  %v4273_v51 = vadd.f32 %v4272_v62, %v4271_v15  ;;  %v4276_v38 = vsel %vm421_vm0, %v4183_v26, 0.0  ;;  %v3943_v0 = vadd.f32 %v3942_v7, %v3941_v34  ;;  %v8144_v31 = vpop.f32.mrb[33].mxu1  ;;  %v8150_v63 = vld [vmem:[%s6973_s7 + $0x10] sm:$0xff]  ;;  %v8153_v25 = vld [vmem:[%s6973_s7 + $0x18] sm:$0xff] }
 0x2bd   : > { %9654 = vst [vmem:[#allocation49_spill] sm:$0xff] %v8144_v31  ;;  %v6424_v1 = vpop.eup %6423  ;;  %v4269_v3 = vrot.slane %v4268_v39, 1  ;;  %v3950_v47 = vadd.f32 %v3949_v40, %v3948_v4  ;;  %v8156_v46 = vadd.f32 %v6040_v55, %v7890_v29  ;;  %v8159_v27 = vadd.f32 %v6041_v18, %v7890_v29  ;;  %v8170_v55 = vld [vmem:[%s8167_s24] sm:$0xff]  ;;  %v8173_v40 = vld [vmem:[%s8167_s24 + $0x8] sm:$0xff] }
 0x2be   : > { %v4488_v26 = vmul.f32 %v6424_v1, %v7959_v2  ;;  %v4489_v34 = vmul.f32 %v6424_v1, %v7962_v8  ;;  %v4490_v7 = vmul.f32 %v6424_v1, %v7965_v12  ;;  %v4491_v15 = vmul.f32 %v6424_v1, %v7968_v24  ;;  %v8175_v18 = vpop.f32.mrb[34].mxu0  ;;  %v8178_v2 = vld [vmem:[%s8167_s24 + $0x10] sm:$0xff]  ;;  %v8181_v8 = vld [vmem:[%s8167_s24 + $0x18] sm:$0xff] }
 0x2bf   : > { %9655 = vst [vmem:[#allocation50_spill] sm:$0xff] %v8156_v46  ;;  %9656 = vst [vmem:[#allocation52_spill] sm:$0xff] %v8159_v27  ;;  %v4270_v12 = vadd.f32 %v4269_v3, %v4268_v39  ;;  %v4275_v4 = vadd.f32 %v4274_v37, %v4273_v51  ;;  %v4092_v24 = vmul.f32 0.03125, %v3943_v0  ;;  %v3951_v62 = vrot.slane %v3950_v47, 4  ;;  %v8183_v1 = vpop.f32.mrb[34].mxu1  ;;  %v8185_v6 = vpop.f32.mrb[35].mxu0 }
 0x2c0   : > { %9657 = vst [vmem:[#allocation53_spill] sm:$0xff] %v8175_v18  ;;  %9658 = vst [vmem:[#allocation57_spill] sm:$0xff] %v8185_v6  ;;  %v4556_v16 = vmul.f32 %v8141_v10, %v4488_v26  ;;  %v4557_v21 = vmul.f32 %v8147_v43, %v4489_v34  ;;  %v4558_v57 = vmul.f32 %v8150_v63, %v4490_v7  ;;  %v8191_v59 = vpop.f32.mrb[35].mxu1 }
 0x2c1   : > { %v4559_v18 = vmul.f32 %v8153_v25, %v4491_v15  ;;  %v4442_v31 = vmul.f32 0.03125, %v4270_v12  ;;  %v4277_v39 = vadd.f32 %v4276_v38, %v4275_v4  ;;  %v8194_v37 = vsub.f32 %v7998_v45, %v4092_v24 }
 0x2c2   : > { %v8197_v51 = vsub.f32 %v7995_v13, %v4092_v24  ;;  %v4624_v0 = vadd.f32 %v8170_v55, %v4556_v16  ;;  %v4625_v3 = vadd.f32 %v8173_v40, %v4557_v21  ;;  %v4626_v26 = vadd.f32 %v8178_v2, %v4558_v57  ;;  %v8203_v7 = vpop.f32.mrb[36].mxu0 }
 0x2c3   : > { %9659 = vst [vmem:[#allocation58_spill] sm:$0xff] %v8194_v37  ;;  %v4627_v34 = vadd.f32 %v8181_v8, %v4559_v18  ;;  %v4458_v15 = vadd.f32 1e-06, %v4442_v31  ;;  %v4278_v6 = vrot.slane %v4277_v39, 4  ;;  %v8206_v38 = vsub.f32 %v8038_v48, %v4092_v24  ;;  %v8211_v13 = vpop.f32.mrb[36].mxu1  ;;  %v8213_v12 = vpop.f32.mrb[37].mxu0 }
 0x2c4   : > { %9660 = vst [vmem:[#allocation59_spill] sm:$0xff] %v8197_v51  ;;  %v8209_v45 = vsub.f32 %v8031_v54, %v4092_v24  ;;  %4688 = vst.msk [vmem:[%s8217_s6] sm:$0xff] %vm421_vm0, %v4624_v0  ;;  %v4184_v54 = vmul.f32 %v8194_v37, %v8194_v37  ;;  %v4185_v48 = vmul.f32 %v8197_v51, %v8197_v51  ;;  %v3958_v21 = vsel %vm421_vm0, %v8156_v46, 0.0  ;;  %v8233_v16 = vpop.f32.mrb[37].mxu1 }
 0x2c5   : > { %9661 = vst [vmem:[#allocation61_spill] sm:$0xff] %v8206_v38  ;;  %4689 = vst.msk [vmem:[%s8217_s6 + $0x8] sm:$0xff] %vm421_vm0, %v4625_v3  ;;  %v3952_v57 = vadd.f32 %v3951_v62, %v3950_v47  ;;  %6427 = vrsqrt.f32 %v4458_v15  ;;  %v4279_v31 = vadd.f32 %v4278_v6, %v4277_v39  ;;  %v4186_v18 = vmul.f32 %v8206_v38, %v8206_v38 }
 0x2c6   : > { %9662 = vst [vmem:[#allocation64_spill] sm:$0xff] %v8209_v45  ;;  %4690 = vst.msk [vmem:[%s8217_s6 + $0x10] sm:$0xff] %vm421_vm0, %v4626_v26  ;;  %v4187_v4 = vmul.f32 %v8209_v45, %v8209_v45  ;;  %v6426_v24 = vpop.eup %6425  ;;  %v4284_v0 = vsel %vm421_vm0, %v4184_v54, 0.0  ;;  %v4285_v3 = vsel %vm421_vm0, %v4185_v48, 0.0  ;;  %v3957_v47 = vsel %vm421_vm0, %v8159_v27, 0.0  ;;  %v8243_v62 = vpop.f32.mrb[38].mxu0 }
 0x2c7   : > { %4691 = vst.msk [vmem:[%s8217_s6 + $0x18] sm:$0xff] %vm421_vm0, %v4627_v34  ;;  %v3953_v26 = vrot.slane %v3952_v57, 2  ;;  %v4492_v34 = vmul.f32 %v6426_v24, %v8001_v60  ;;  %v4493_v6 = vmul.f32 %v6426_v24, %v8004_v56  ;;  %v4494_v39 = vmul.f32 %v6426_v24, %v8007_v32  ;;  %v8249_v46 = vpop.f32.mrb[38].mxu1  ;;  %v8251_v45 = vpop.f32.mrb[39].mxu0 }
 0x2c8   : > { %v4495_v15 = vmul.f32 %v6426_v24, %v8010_v49  ;;  %9663 = vst [vmem:[#allocation66_spill] sm:$0xff] %v8251_v45  ;;  %v4280_v54 = vrot.slane %v4279_v31, 2  ;;  %v4286_v48 = vadd.f32 %v4285_v3, %v4284_v0  ;;  %v4287_v38 = vsel %vm421_vm0, %v4186_v18, 0.0  ;;  %v8255_v51 = vpop.f32.mrb[39].mxu1 }
 0x2c9   : > { %v4289_v27 = vsel %vm421_vm0, %v4187_v4, 0.0  ;;  %v4560_v60 = vmul.f32 %v8141_v10, %v4492_v34  ;;  %v4561_v56 = vmul.f32 %v8147_v43, %v4493_v6  ;;  %v4562_v32 = vmul.f32 %v8150_v63, %v4494_v39 }
 0x2ca   : > { %v4563_v49 = vmul.f32 %v8153_v25, %v4495_v15  ;;  %v4281_v24 = vadd.f32 %v4280_v54, %v4279_v31  ;;  %v4288_v37 = vadd.f32 %v4287_v38, %v4286_v48  ;;  %v3954_v45 = vadd.f32 %v3953_v26, %v3952_v57  ;;  %v8263_v18 = vpop.f32.mrb[40].mxu0 }
 0x2cb   : > { %v8261_v0 = vadd.f32 %v3958_v21, %v3957_v47  ;;  %v4628_v4 = vadd.f32 %v8170_v55, %v4560_v60  ;;  %v4629_v3 = vadd.f32 %v8173_v40, %v4561_v56  ;;  %v4630_v34 = vadd.f32 %v8178_v2, %v4562_v32  ;;  %v8269_v39 = vpop.f32.mrb[40].mxu1  ;;  %v8271_v31 = vpop.f32.mrb[41].mxu0 }
 0x2cc   : > { %v4631_v6 = vadd.f32 %v8181_v8, %v4563_v49  ;;  %v4282_v38 = vrot.slane %v4281_v24, 1  ;;  %v4290_v57 = vadd.f32 %v4289_v27, %v4288_v37  ;;  %v3955_v26 = vrot.slane %v3954_v45, 1  ;;  %v8275_v47 = vpop.f32.mrb[41].mxu1 }
 0x2cd   : > { %v6042_v21 = vadd.f32 %v8065_v11, %v8068_v33  ;;  %4692 = vst.msk [vmem:[%s8217_s6 + $0x20] sm:$0xff] %vm421_vm0, %v4628_v4  ;;  %4693 = vst.msk [vmem:[%s8217_s6 + $0x28] sm:$0xff] %vm421_vm0, %v4629_v3  ;;  %v6043_v15 = vadd.f32 %v8070_v58, %v8078_v41  ;;  %v6044_v27 = vadd.f32 %v8084_v20, %v8086_v42 }
 0x2ce   : > { %4694 = vst.msk [vmem:[%s8217_s6 + $0x30] sm:$0xff] %vm421_vm0, %v4630_v34  ;;  %4695 = vst.msk [vmem:[%s8217_s6 + $0x38] sm:$0xff] %vm421_vm0, %v4631_v6  ;;  %v6045_v37 = vadd.f32 %v8088_v17, %v8094_v53  ;;  %v6046_v11 = vadd.f32 %v8101_v5, %v8112_v61  ;;  %v4283_v33 = vadd.f32 %v4282_v38, %v4281_v24  ;;  %v4291_v54 = vrot.slane %v4290_v57, 4  ;;  %v8296_v56 = vpop.f32.mrb[42].mxu0 }
 0x2cf   : > { %v3956_v48 = vadd.f32 %v3955_v26, %v3954_v45  ;;  %v8294_v60 = vadd.f32 %v6042_v21, %v7890_v29  ;;  %v6428_v32 = vpop.eup %6427  ;;  %v8299_v58 = vadd.f32 %v6043_v15, %v7890_v29  ;;  %v8302_v41 = vadd.f32 %v6044_v27, %v7890_v29  ;;  %v8310_v17 = vpop.f32.mrb[42].mxu1 }
 0x2d0   : > { %v8305_v20 = vadd.f32 %v6045_v37, %v7890_v29  ;;  %v8308_v42 = vadd.f32 %v6046_v11, %v7890_v29  ;;  %v8312_v53 = vpop.f32.mrb[43].mxu0  ;;  %v4496_v5 = vmul.f32 %v6428_v32, %v8041_v23  ;;  %v4497_v61 = vmul.f32 %v6428_v32, %v8044_v50  ;;  %v8318_v24 = vpop.f32.mrb[43].mxu1 }
 0x2d1   : > { %v4498_v45 = vmul.f32 %v6428_v32, %v8047_v52  ;;  %v4499_v49 = vmul.f32 %v6428_v32, %v8050_v28  ;;  %v4443_v4 = vmul.f32 0.03125, %v4283_v33  ;;  %v4292_v3 = vadd.f32 %v4291_v54, %v4290_v57 }
 0x2d2   : > { %v4093_v34 = vmul.f32 0.03125, %v3956_v48  ;;  %v3962_v6 = vsel %vm421_vm0, %v8294_v60, 0.0  ;;  %v4564_v38 = vmul.f32 %v8141_v10, %v4496_v5  ;;  %v4565_v26 = vmul.f32 %v8147_v43, %v4497_v61  ;;  %v8326_v21 = vpop.f32.mrb[44].mxu0 }
 0x2d3   : > { %v4566_v23 = vmul.f32 %v8150_v63, %v4498_v45  ;;  %v4567_v50 = vmul.f32 %v8153_v25, %v4499_v49  ;;  %9664 = vst [vmem:[#allocation68_spill] sm:$0xff] %v8326_v21  ;;  %v4459_v52 = vadd.f32 1e-06, %v4443_v4  ;;  %v4293_v28 = vrot.slane %v4292_v3, 2  ;;  %v8334_v27 = vpop.f32.mrb[44].mxu1  ;;  %v8336_v37 = vpop.f32.mrb[45].mxu0 }
 0x2d4   : > { %v8329_v57 = vsub.f32 %v8076_v36, %v4093_v34  ;;  %v8332_v15 = vsub.f32 %v8073_v30, %v4093_v34  ;;  %9665 = vst [vmem:[#allocation70_spill] sm:$0xff] %v8336_v37  ;;  %v4632_v11 = vadd.f32 %v8170_v55, %v4564_v38  ;;  %v4633_v33 = vadd.f32 %v8173_v40, %v4565_v26  ;;  %v8342_v32 = vpop.f32.mrb[45].mxu1  ;;  %v9672_v21 = vld [vmem:[#allocation49_spill] sm:$0xff] }
 0x2d5   : > { %v4634_v54 = vadd.f32 %v8178_v2, %v4566_v23  ;;  %v4635_v48 = vadd.f32 %v8181_v8, %v4567_v50  ;;  %9666 = vst [vmem:[#allocation72_spill] sm:$0xff] %v8342_v32  ;;  %6429 = vrsqrt.f32 %v4459_v52  ;;  %v4294_v36 = vadd.f32 %v4293_v28, %v4292_v3 }
 0x2d6   : > { %v8345_v5 = vsub.f32 %v8099_v9, %v4093_v34  ;;  %v8348_v30 = vsub.f32 %v8091_v44, %v4093_v34  ;;  %4696 = vst.msk [vmem:[%s8217_s6 + $0x40] sm:$0xff] %vm421_vm0, %v4632_v11  ;;  %4697 = vst.msk [vmem:[%s8217_s6 + $0x48] sm:$0xff] %vm421_vm0, %v4633_v33  ;;  %v4188_v61 = vmul.f32 %v8329_v57, %v8329_v57  ;;  %v3960_v9 = vsel %vm421_vm0, %v8299_v58, 0.0  ;;  %v8366_v49 = vpop.f32.mrb[46].mxu0 }
 0x2d7   : > { %4698 = vst.msk [vmem:[%s8217_s6 + $0x50] sm:$0xff] %vm421_vm0, %v4634_v54  ;;  %4699 = vst.msk [vmem:[%s8217_s6 + $0x58] sm:$0xff] %vm421_vm0, %v4635_v48  ;;  %v4189_v45 = vmul.f32 %v8332_v15, %v8332_v15  ;;  %v3971_v44 = vsel %vm421_vm0, %v8302_v41, 0.0  ;;  %v4295_v4 = vrot.slane %v4294_v36, 1  ;;  %v3961_v38 = vadd.f32 %v3960_v9, %v8261_v0  ;;  %v8373_v26 = vpop.f32.mrb[46].mxu1  ;;  %v8375_v23 = vpop.f32.mrb[47].mxu0 }
 0x2d8   : > { %9667 = vst [vmem:[#allocation74_spill] sm:$0xff] %v8366_v49  ;;  %v4190_v3 = vmul.f32 %v8345_v5, %v8345_v5  ;;  %v4191_v34 = vmul.f32 %v8348_v30, %v8348_v30  ;;  %9668 = vst [vmem:[#allocation75_spill] sm:$0xff] %v8373_v26  ;;  %v4297_v50 = vsel %vm421_vm0, %v4188_v61, 0.0  ;;  %v3970_v28 = vsel %vm421_vm0, %v8305_v20, 0.0  ;;  %v8383_v33 = vpop.f32.mrb[47].mxu1 }
 0x2d9   : > { %9669 = vst [vmem:[#allocation78_spill] sm:$0xff] %v8375_v23  ;;  %v4298_v52 = vsel %vm421_vm0, %v4189_v45, 0.0  ;;  %v3975_v11 = vsel %vm421_vm0, %v8308_v42, 0.0  ;;  %9670 = vst [vmem:[#allocation80_spill] sm:$0xff] %v8383_v33  ;;  %v4296_v54 = vadd.f32 %v4295_v4, %v4294_v36  ;;  %v3963_v49 = vadd.f32 %v3962_v6, %v3961_v38  ;;  %v9673_v33 = vld [vmem:[#allocation46_spill] sm:$0xff]  ;;  %v9674_v4 = vld [vmem:[#allocation53_spill] sm:$0xff] }
 0x2da   : > { %v4299_v48 = vadd.f32 %v4298_v52, %v4297_v50  ;;  %v4300_v0 = vsel %vm421_vm0, %v4190_v3, 0.0  ;;  %v4302_v9 = vsel %vm421_vm0, %v4191_v34, 0.0  ;;  %v3972_v23 = vadd.f32 %v3971_v44, %v3970_v28  ;;  %v8391_v26 = vpop.f32.mrb[48].mxu0 }
 0x2db   : > { %v6047_v61 = vadd.f32 %v8114_v22, %v8121_v14  ;;  %v6048_v45 = vadd.f32 %v8131_v19, %v8136_v35  ;;  %9671 = vst [vmem:[#allocation81_spill] sm:$0xff] %v8391_v26  ;;  %v4444_v37 = vmul.f32 0.03125, %v4296_v54  ;;  %v6049_v36 = vadd.f32 %v9673_v33, %v9672_v21  ;;  %v8397_v50 = vpop.f32.mrb[48].mxu1  ;;  %v8399_v6 = vpop.f32.mrb[49].mxu0  ;;  %v9676_v19 = vld [vmem:[#allocation57_spill] sm:$0xff] }
 0x2dc   : > { %v4301_v32 = vadd.f32 %v4300_v0, %v4299_v48  ;;  %v6050_v3 = vadd.f32 %v9674_v4, %v8183_v1  ;;  %9675 = vst [vmem:[#allocation85_spill] sm:$0xff] %v8399_v6  ;;  %v3964_v44 = vrot.slane %v3963_v49, 4  ;;  %v6051_v35 = vadd.f32 %v9676_v19, %v8191_v59  ;;  %v8409_v34 = vpop.f32.mrb[49].mxu1  ;;  %v9682_v4 = vld [vmem:[#allocation39_spill] sm:$0xff]  ;;  %v9684_v19 = vld [vmem:[#allocation45_spill] sm:$0xff] }
 0x2dd   : > { %v8402_v22 = vadd.f32 %v6047_v61, %v7890_v29  ;;  %v8405_v14 = vadd.f32 %v6048_v45, %v7890_v29  ;;  %9677 = vst [vmem:[#allocation88_spill] sm:$0xff] %v8409_v34  ;;  %v4460_v21 = vadd.f32 1e-06, %v4444_v37  ;;  %v8412_v1 = vadd.f32 %v6049_v36, %v7890_v29  ;;  %v9681_v45 = vld [vmem:[#allocation38_spill] sm:$0xff] }
 0x2de   : > { %v4303_v38 = vadd.f32 %v4302_v9, %v4301_v32  ;;  %v8415_v52 = vadd.f32 %v6050_v3, %v7890_v29  ;;  %v3965_v28 = vadd.f32 %v3964_v44, %v3963_v49  ;;  %v8422_v48 = vadd.f32 %v6051_v35, %v7890_v29  ;;  %v8424_v59 = vpop.f32.mrb[50].mxu0  ;;  %v9683_v44 = vld [vmem:[#allocation40_spill] sm:$0xff] }
 0x2df   : > { %v3973_v33 = vsel %vm421_vm0, %v8402_v22, 0.0  ;;  %v3984_v54 = vsel %vm421_vm0, %v8405_v14, 0.0  ;;  %9678 = vst [vmem:[#allocation91_spill] sm:$0xff] %v8424_v59  ;;  %v6430_v37 = vpop.eup %6429  ;;  %6431 = vrsqrt.f32 %v4460_v21  ;;  %v3983_v9 = vsel %vm421_vm0, %v8412_v1, 0.0  ;;  %v8428_v61 = vpop.f32.mrb[50].mxu1 }
 0x2e0   : > { %v4304_v32 = vrot.slane %v4303_v38, 4  ;;  %v3974_v0 = vadd.f32 %v3973_v33, %v3972_v23  ;;  %9679 = vst [vmem:[#allocation92_spill] sm:$0xff] %v8428_v61  ;;  %v8430_v49 = vpop.f32.mrb[51].mxu0  ;;  %v4500_v36 = vmul.f32 %v6430_v37, %v9681_v45  ;;  %v4501_v3 = vmul.f32 %v6430_v37, %v9682_v4  ;;  %v8436_v59 = vpop.f32.mrb[51].mxu1 }
 0x2e1   : > { %9680 = vst [vmem:[#allocation97_spill] sm:$0xff] %v8430_v49  ;;  %v4502_v29 = vmul.f32 %v6430_v37, %v9683_v44  ;;  %v4503_v35 = vmul.f32 %v6430_v37, %v9684_v19  ;;  %v3966_v6 = vrot.slane %v3965_v28, 2  ;;  %v3985_v33 = vadd.f32 %v3984_v54, %v3983_v9 }
 0x2e2   : > { %v4305_v21 = vadd.f32 %v4304_v32, %v4303_v38  ;;  %v3976_v23 = vadd.f32 %v3975_v11, %v3974_v0  ;;  %v4568_v34 = vmul.f32 %v8141_v10, %v4500_v36  ;;  %v4569_v61 = vmul.f32 %v8147_v43, %v4501_v3  ;;  %v8442_v26 = vpop.f32.mrb[52].mxu0 }
 0x2e3   : > { %v4570_v49 = vmul.f32 %v8150_v63, %v4502_v29  ;;  %v4571_v45 = vmul.f32 %v8153_v25, %v4503_v35  ;;  %v3967_v37 = vadd.f32 %v3966_v6, %v3965_v28  ;;  %v3988_v11 = vsel %vm421_vm0, %v8415_v52, 0.0  ;;  %v8446_v38 = vpop.f32.mrb[52].mxu1  ;;  %v8448_v54 = vpop.f32.mrb[53].mxu0 }
 0x2e4   : > { %v4306_v4 = vrot.slane %v4305_v21, 2  ;;  %v3977_v44 = vrot.slane %v3976_v23, 4  ;;  %9685 = vst [vmem:[#allocation15_spill] sm:$0xff] %v8448_v54  ;;  %v4636_v32 = vadd.f32 %v8170_v55, %v4568_v34  ;;  %v4637_v0 = vadd.f32 %v8173_v40, %v4569_v61  ;;  %v8454_v3 = vpop.f32.mrb[53].mxu1  ;;  %v9696_v54 = vld [vmem:[#allocation52_spill] sm:$0xff] }
 0x2e5   : > { %v4638_v9 = vadd.f32 %v8178_v2, %v4570_v49  ;;  %v4639_v36 = vadd.f32 %v8181_v8, %v4571_v45  ;;  %v3968_v28 = vrot.slane %v3967_v37, 1  ;;  %v3986_v19 = vsel %vm421_vm0, %v8422_v48, 0.0 }
 0x2e6   : > { %v4307_v6 = vadd.f32 %v4306_v4, %v4305_v21  ;;  %v3978_v29 = vadd.f32 %v3977_v44, %v3976_v23  ;;  %4700 = vst.msk [vmem:[%s8217_s6 + $0x60] sm:$0xff] %vm421_vm0, %v4636_v32  ;;  %4701 = vst.msk [vmem:[%s8217_s6 + $0x68] sm:$0xff] %vm421_vm0, %v4637_v0  ;;  %v3987_v34 = vadd.f32 %v3986_v19, %v3985_v33  ;;  %v8472_v21 = vpop.f32.mrb[54].mxu0  ;;  %v9687_v44 = vld [vmem:[#allocation66_spill] sm:$0xff] }
 0x2e7   : > { %4702 = vst.msk [vmem:[%s8217_s6 + $0x70] sm:$0xff] %vm421_vm0, %v4638_v9  ;;  %4703 = vst.msk [vmem:[%s8217_s6 + $0x78] sm:$0xff] %vm421_vm0, %v4639_v36  ;;  %v6052_v61 = vadd.f32 %v8203_v7, %v8211_v13  ;;  %v6053_v49 = vadd.f32 %v8213_v12, %v8233_v16  ;;  %v6054_v35 = vadd.f32 %v8243_v62, %v8249_v46  ;;  %v8476_v0 = vpop.f32.mrb[54].mxu1  ;;  %v8478_v33 = vpop.f32.mrb[55].mxu0  ;;  %v8483_v7 = vld [vmem:[%s9269_s2] ss:$0 sm:$0xff] }
 0x2e8   : > { %9686 = vst [vmem:[#allocation16_spill] sm:$0xff] %v8472_v21  ;;  %v4308_v23 = vrot.slane %v4307_v6, 1  ;;  %v3969_v45 = vadd.f32 %v3968_v28, %v3967_v37  ;;  %v3979_v4 = vrot.slane %v3978_v29, 2  ;;  %v6055_v32 = vadd.f32 %v9687_v44, %v8255_v51  ;;  %9688 = vst [vmem:[#allocation17_spill] sm:$0xff] %v8476_v0  ;;  %v8494_v51 = vpop.f32.mrb[55].mxu1  ;;  %v9691_v28 = vld [vmem:[#allocation58_spill] sm:$0xff] }
 0x2e9   : > { %9689 = vst [vmem:[#allocation18_spill] sm:$0xff] %v8478_v33  ;;  %v3989_v9 = vadd.f32 %v3988_v11, %v3987_v34  ;;  %v8486_v46 = vadd.f32 %v8483_v7, %v6052_v61  ;;  %v8489_v13 = vadd.f32 %v8483_v7, %v6053_v49  ;;  %v8492_v12 = vadd.f32 %v8483_v7, %v6054_v35  ;;  %v6432_v16 = vpop.eup %6431  ;;  %v9692_v34 = vld [vmem:[#allocation59_spill] sm:$0xff]  ;;  %v9693_v44 = vld [vmem:[#allocation61_spill] sm:$0xff]  ;;  %v9694_v49 = vld [vmem:[#allocation64_spill] sm:$0xff] }
 0x2ea   : > { %9690 = vst [vmem:[#allocation19_spill] sm:$0xff] %v8494_v51  ;;  %v4309_v62 = vadd.f32 %v4308_v23, %v4307_v6  ;;  %v4094_v37 = vmul.f32 0.03125, %v3969_v45  ;;  %v3980_v11 = vadd.f32 %v3979_v4, %v3978_v29  ;;  %v8497_v36 = vadd.f32 %v8483_v7, %v6055_v32  ;;  %v8503_v0 = vpop.f32.mrb[56].mxu0  ;;  %v9697_v6 = vld [vmem:[#allocation50_spill] sm:$0xff] }
 0x2eb   : > { %v4504_v19 = vmul.f32 %v6432_v16, %v9691_v28  ;;  %v4505_v61 = vmul.f32 %v6432_v16, %v9692_v34  ;;  %v4506_v33 = vmul.f32 %v6432_v16, %v9693_v44  ;;  %v4507_v21 = vmul.f32 %v6432_v16, %v9694_v49  ;;  %9695 = vst [vmem:[#allocation20_spill] sm:$0xff] %v8503_v0  ;;  %v8514_v45 = vpop.f32.mrb[56].mxu1  ;;  %v8516_v4 = vpop.f32.mrb[57].mxu0 }
 0x2ec   : > { %v4445_v35 = vmul.f32 0.03125, %v4309_v62  ;;  %v8506_v51 = vsub.f32 %v9696_v54, %v4094_v37  ;;  %v8509_v23 = vsub.f32 %v9697_v6, %v4094_v37  ;;  %v8512_v29 = vsub.f32 %v8299_v58, %v4094_v37  ;;  %9698 = vst [vmem:[#allocation21_spill] sm:$0xff] %v8514_v45  ;;  %9699 = vst [vmem:[#allocation22_spill] sm:$0xff] %v8516_v4  ;;  %v8522_v54 = vpop.f32.mrb[57].mxu1 }
 0x2ed   : > { %v4572_v32 = vmul.f32 %v8141_v10, %v4504_v19  ;;  %v4573_v16 = vmul.f32 %v8147_v43, %v4505_v61  ;;  %v4574_v28 = vmul.f32 %v8150_v63, %v4506_v33  ;;  %v4575_v62 = vmul.f32 %v8153_v25, %v4507_v21  ;;  %9700 = vst [vmem:[#allocation23_spill] sm:$0xff] %v8522_v54 }
 0x2ee   : > { %v4461_v34 = vadd.f32 1e-06, %v4445_v35  ;;  %v8525_v58 = vsub.f32 %v8294_v60, %v4094_v37  ;;  %v4192_v44 = vmul.f32 %v8506_v51, %v8506_v51  ;;  %v4193_v19 = vmul.f32 %v8509_v23, %v8509_v23  ;;  %v8535_v35 = vpop.f32.mrb[58].mxu0 }
 0x2ef   : > { %v4640_v33 = vadd.f32 %v8170_v55, %v4572_v32  ;;  %v4641_v21 = vadd.f32 %v8173_v40, %v4573_v16  ;;  %v4642_v61 = vadd.f32 %v8178_v2, %v4574_v28  ;;  %v4643_v49 = vadd.f32 %v8181_v8, %v4575_v62  ;;  %9701 = vst [vmem:[#allocation24_spill] sm:$0xff] %v8535_v35  ;;  %v8542_v4 = vpop.f32.mrb[58].mxu1  ;;  %v8544_v32 = vpop.f32.mrb[59].mxu0 }
 0x2f0   : > { %6433 = vrsqrt.f32 %v4461_v34  ;;  %v4194_v60 = vmul.f32 %v8512_v29, %v8512_v29  ;;  %v4195_v37 = vmul.f32 %v8525_v58, %v8525_v58  ;;  %v4310_v6 = vsel %vm421_vm0, %v4192_v44, 0.0  ;;  %9702 = vst [vmem:[#allocation25_spill] sm:$0xff] %v8542_v4  ;;  %9703 = vst [vmem:[#allocation26_spill] sm:$0xff] %v8544_v32  ;;  %v8557_v44 = vpop.f32.mrb[59].mxu1 }
 0x2f1   : > { %4704 = vst.msk [vmem:[%s8217_s6 + $0x80] sm:$0xff] %vm421_vm0, %v4640_v33  ;;  %4705 = vst.msk [vmem:[%s8217_s6 + $0x88] sm:$0xff] %vm421_vm0, %v4641_v21  ;;  %v4311_v16 = vsel %vm421_vm0, %v4193_v19, 0.0  ;;  %v3981_v28 = vrot.slane %v3980_v11, 1  ;;  %v3990_v62 = vrot.slane %v3989_v9, 4  ;;  %v3997_v34 = vsel %vm421_vm0, %v8486_v46, 0.0 }
 0x2f2   : > { %4706 = vst.msk [vmem:[%s8217_s6 + $0x90] sm:$0xff] %vm421_vm0, %v4642_v61  ;;  %4707 = vst.msk [vmem:[%s8217_s6 + $0x98] sm:$0xff] %vm421_vm0, %v4643_v49  ;;  %v4312_v35 = vadd.f32 %v4311_v16, %v4310_v6  ;;  %v4313_v32 = vsel %vm421_vm0, %v4194_v60, 0.0  ;;  %v4315_v33 = vsel %vm421_vm0, %v4195_v37, 0.0  ;;  %v3996_v21 = vsel %vm421_vm0, %v8489_v13, 0.0  ;;  %v8565_v54 = vpop.f32.mrb[60].mxu0 }
 0x2f3   : > { %9704 = vst [vmem:[#allocation27_spill] sm:$0xff] %v8557_v44  ;;  %v3982_v61 = vadd.f32 %v3981_v28, %v3980_v11  ;;  %v3991_v4 = vadd.f32 %v3990_v62, %v3989_v9  ;;  %v3998_v49 = vadd.f32 %v3997_v34, %v3996_v21  ;;  %v4001_v19 = vsel %vm421_vm0, %v8492_v12, 0.0  ;;  %9705 = vst [vmem:[#allocation28_spill] sm:$0xff] %v8565_v54  ;;  %v8573_v6 = vpop.f32.mrb[60].mxu1  ;;  %v8575_v11 = vpop.f32.mrb[61].mxu0 }
 0x2f4   : > { %v4314_v0 = vadd.f32 %v4313_v32, %v4312_v35  ;;  %v3999_v44 = vsel %vm421_vm0, %v8497_v36, 0.0  ;;  %v6056_v60 = vadd.f32 %v8263_v18, %v8269_v39  ;;  %v6057_v37 = vadd.f32 %v8271_v31, %v8275_v47  ;;  %9706 = vst [vmem:[#allocation29_spill] sm:$0xff] %v8573_v6  ;;  %9707 = vst [vmem:[#allocation30_spill] sm:$0xff] %v8575_v11  ;;  %v8579_v35 = vpop.f32.mrb[61].mxu1 }
 0x2f5   : > { %v4095_v9 = vmul.f32 0.03125, %v3982_v61  ;;  %v3992_v16 = vrot.slane %v3991_v4, 2  ;;  %v4000_v28 = vadd.f32 %v3999_v44, %v3998_v49  ;;  %v6058_v62 = vadd.f32 %v8296_v56, %v8310_v17  ;;  %9708 = vst [vmem:[#allocation31_spill] sm:$0xff] %v8579_v35 }
 0x2f6   : > { %v4316_v32 = vadd.f32 %v4315_v33, %v4314_v0  ;;  %v8582_v34 = vadd.f32 %v8483_v7, %v6056_v60  ;;  %v8585_v18 = vadd.f32 %v8483_v7, %v6057_v37  ;;  %v6059_v39 = vadd.f32 %v8312_v53, %v8318_v24  ;;  %v8601_v0 = vpop.f32.mrb[62].mxu0 }
 0x2f7   : > { %v8590_v31 = vsub.f32 %v8305_v20, %v4095_v9  ;;  %v8593_v47 = vsub.f32 %v8302_v41, %v4095_v9  ;;  %v8596_v56 = vsub.f32 %v8402_v22, %v4095_v9  ;;  %v8599_v17 = vsub.f32 %v8308_v42, %v4095_v9  ;;  %9709 = vst [vmem:[#allocation32_spill] sm:$0xff] %v8601_v0  ;;  %v8605_v24 = vpop.f32.mrb[62].mxu1  ;;  %v8607_v20 = vpop.f32.mrb[63].mxu0 }
 0x2f8   : > { %v4317_v44 = vrot.slane %v4316_v32, 4  ;;  %v3993_v33 = vadd.f32 %v3992_v16, %v3991_v4  ;;  %v4002_v21 = vadd.f32 %v4001_v19, %v4000_v28  ;;  %v4010_v53 = vsel %vm421_vm0, %v8582_v34, 0.0  ;;  %9710 = vst [vmem:[#allocation33_spill] sm:$0xff] %v8605_v24  ;;  %9711 = vst [vmem:[#allocation34_spill] sm:$0xff] %v8607_v20  ;;  %v8617_v61 = vpop.f32.mrb[63].mxu1 }
 0x2f9   : > { %v4196_v41 = vmul.f32 %v8590_v31, %v8590_v31  ;;  %v4197_v22 = vmul.f32 %v8593_v47, %v8593_v47  ;;  %v4198_v42 = vmul.f32 %v8596_v56, %v8596_v56  ;;  %v4199_v4 = vmul.f32 %v8599_v17, %v8599_v17  ;;  %9712 = vst [vmem:[#allocation35_spill] sm:$0xff] %v8617_v61 }
 0x2fa   : > { %v6434_v49 = vpop.eup %6433  ;;  %v4318_v19 = vadd.f32 %v4317_v44, %v4316_v32  ;;  %v3994_v60 = vrot.slane %v3993_v33, 1  ;;  %v4003_v37 = vrot.slane %v4002_v21, 4  ;;  %v4009_v9 = vsel %vm421_vm0, %v8585_v18, 0.0 }
 0x2fb   : > { %v4508_v16 = vmul.f32 %v6434_v49, %v8329_v57  ;;  %v4509_v28 = vmul.f32 %v6434_v49, %v8332_v15  ;;  %v4510_v20 = vmul.f32 %v6434_v49, %v8345_v5  ;;  %v4511_v0 = vmul.f32 %v6434_v49, %v8348_v30 }
 0x2fc   : > { %v4319_v24 = vrot.slane %v4318_v19, 2  ;;  %v4323_v11 = vsel %vm421_vm0, %v4196_v41, 0.0  ;;  %v4324_v61 = vsel %vm421_vm0, %v4197_v22, 0.0  ;;  %v4326_v32 = vsel %vm421_vm0, %v4198_v42, 0.0 }
 0x2fd   : > { %v4576_v44 = vmul.f32 %v8141_v10, %v4508_v16  ;;  %v4577_v35 = vmul.f32 %v8147_v43, %v4509_v28  ;;  %v4578_v57 = vmul.f32 %v8150_v63, %v4510_v20  ;;  %v4579_v15 = vmul.f32 %v8153_v25, %v4511_v0 }
 0x2fe   : > { %v4320_v5 = vadd.f32 %v4319_v24, %v4318_v19  ;;  %v4325_v30 = vadd.f32 %v4324_v61, %v4323_v11  ;;  %v4328_v41 = vsel %vm421_vm0, %v4199_v4, 0.0  ;;  %v3995_v49 = vadd.f32 %v3994_v60, %v3993_v33  ;;  %v9713_v33 = vld [vmem:[#allocation68_spill] sm:$0xff] }
 0x2ff   : > { %v4644_v22 = vadd.f32 %v8170_v55, %v4576_v44  ;;  %v4645_v42 = vadd.f32 %v8173_v40, %v4577_v35  ;;  %v4646_v16 = vadd.f32 %v8178_v2, %v4578_v57  ;;  %v4647_v28 = vadd.f32 %v8181_v8, %v4579_v15 }
 0x300   : > { %v4321_v54 = vrot.slane %v4320_v5, 1  ;;  %v4327_v6 = vadd.f32 %v4326_v32, %v4325_v30  ;;  %v4096_v20 = vmul.f32 0.03125, %v3995_v49  ;;  %v4004_v45 = vadd.f32 %v4003_v37, %v4002_v21 }
 0x301   : > { %4708 = vst.msk [vmem:[%s8217_s6 + $0xa0] sm:$0xff] %vm421_vm0, %v4644_v22  ;;  %4709 = vst.msk [vmem:[%s8217_s6 + $0xa8] sm:$0xff] %vm421_vm0, %v4645_v42  ;;  %v4011_v11 = vadd.f32 %v4010_v53, %v4009_v9  ;;  %v8646_v0 = vadd.f32 %v8483_v7, %v6058_v62  ;;  %v8649_v35 = vadd.f32 %v8483_v7, %v6059_v39 }
 0x302   : > { %4710 = vst.msk [vmem:[%s8217_s6 + $0xb0] sm:$0xff] %vm421_vm0, %v4646_v16  ;;  %4711 = vst.msk [vmem:[%s8217_s6 + $0xb8] sm:$0xff] %vm421_vm0, %v4647_v28  ;;  %v6060_v24 = vadd.f32 %v9713_v33, %v8334_v27  ;;  %v4322_v4 = vadd.f32 %v4321_v54, %v4320_v5  ;;  %v4329_v21 = vadd.f32 %v4328_v41, %v4327_v6  ;;  %v4005_v53 = vrot.slane %v4004_v45, 2  ;;  %v9714_v28 = vld [vmem:[#allocation72_spill] sm:$0xff] }
 0x303   : > { %v8654_v61 = vsub.f32 %v8412_v1, %v4096_v20  ;;  %v8657_v19 = vsub.f32 %v8405_v14, %v4096_v20  ;;  %v8660_v60 = vsub.f32 %v8422_v48, %v4096_v20  ;;  %v8663_v62 = vsub.f32 %v8415_v52, %v4096_v20  ;;  %v9715_v20 = vld [vmem:[#allocation70_spill] sm:$0xff] }
 0x304   : > { %v4014_v39 = vsel %vm421_vm0, %v8646_v0, 0.0  ;;  %v4446_v37 = vmul.f32 0.03125, %v4322_v4  ;;  %v4330_v27 = vrot.slane %v4329_v21, 4  ;;  %v4006_v52 = vadd.f32 %v4005_v53, %v4004_v45  ;;  %v9716_v4 = vld [vmem:[#allocation75_spill] sm:$0xff] }
 0x305   : > { %v4200_v54 = vmul.f32 %v8654_v61, %v8654_v61  ;;  %v4201_v1 = vmul.f32 %v8657_v19, %v8657_v19  ;;  %v4202_v14 = vmul.f32 %v8660_v60, %v8660_v60  ;;  %v4203_v48 = vmul.f32 %v8663_v62, %v8663_v62 }
 0x306   : > { %v4012_v6 = vsel %vm421_vm0, %v8649_v35, 0.0  ;;  %v4462_v9 = vadd.f32 1e-06, %v4446_v37  ;;  %v4331_v32 = vadd.f32 %v4330_v27, %v4329_v21  ;;  %v4007_v41 = vrot.slane %v4006_v52, 1  ;;  %v9717_v21 = vld [vmem:[#allocation74_spill] sm:$0xff] }
 0x307   : > { %v4336_v44 = vsel %vm421_vm0, %v4200_v54, 0.0  ;;  %v4337_v57 = vsel %vm421_vm0, %v4201_v1, 0.0  ;;  %v4339_v5 = vsel %vm421_vm0, %v4202_v14, 0.0  ;;  %v4341_v30 = vsel %vm421_vm0, %v4203_v48, 0.0  ;;  %v9718_v1 = vld [vmem:[#allocation80_spill] sm:$0xff]  ;;  %v9719_v14 = vld [vmem:[#allocation78_spill] sm:$0xff] }
 0x308   : > { %v4338_v15 = vadd.f32 %v4337_v57, %v4336_v44  ;;  %6435 = vrsqrt.f32 %v4462_v9  ;;  %v4332_v49 = vrot.slane %v4331_v32, 2  ;;  %v4013_v22 = vadd.f32 %v4012_v6, %v4011_v11 }
 0x309   : > { %v8682_v45 = vadd.f32 %v8483_v7, %v6060_v24  ;;  %v4008_v16 = vadd.f32 %v4007_v41, %v4006_v52  ;;  %v6061_v33 = vadd.f32 %v9715_v20, %v9714_v28  ;;  %v6062_v53 = vadd.f32 %v9717_v21, %v9716_v4 }
 0x30a   : > { %v4340_v42 = vadd.f32 %v4339_v5, %v4338_v15  ;;  %v4333_v37 = vadd.f32 %v4332_v49, %v4331_v32  ;;  %v4015_v27 = vadd.f32 %v4014_v39, %v4013_v22  ;;  %v6063_v48 = vadd.f32 %v9719_v14, %v9718_v1  ;;  %v9720_v39 = vld [vmem:[#allocation81_spill] sm:$0xff] }
 0x30b   : > { %v4023_v54 = vsel %vm421_vm0, %v8682_v45, 0.0  ;;  %v4097_v6 = vmul.f32 0.03125, %v4008_v16  ;;  %v8693_v24 = vadd.f32 %v8483_v7, %v6061_v33  ;;  %v8696_v52 = vadd.f32 %v8483_v7, %v6062_v53 }
 0x30c   : > { %v4342_v11 = vadd.f32 %v4341_v30, %v4340_v42  ;;  %v4334_v9 = vrot.slane %v4333_v37, 1  ;;  %v4016_v44 = vrot.slane %v4015_v27, 4  ;;  %v8699_v57 = vadd.f32 %v8483_v7, %v6063_v48 }
 0x30d   : > { %v6064_v32 = vadd.f32 %v9720_v39, %v8397_v50  ;;  %v8704_v5 = vsub.f32 %v8489_v13, %v4097_v6  ;;  %v8707_v30 = vsub.f32 %v8486_v46, %v4097_v6  ;;  %v8710_v41 = vsub.f32 %v8497_v36, %v4097_v6 }
 0x30e   : > { %v4343_v15 = vrot.slane %v4342_v11, 4  ;;  %v4335_v49 = vadd.f32 %v4334_v9, %v4333_v37  ;;  %v8713_v22 = vsub.f32 %v8492_v12, %v4097_v6  ;;  %v4017_v42 = vadd.f32 %v4016_v44, %v4015_v27 }
 0x30f   : > { %v4022_v16 = vsel %vm421_vm0, %v8693_v24, 0.0  ;;  %v4204_v50 = vmul.f32 %v8704_v5, %v8704_v5  ;;  %v4205_v13 = vmul.f32 %v8707_v30, %v8707_v30  ;;  %v4206_v46 = vmul.f32 %v8710_v41, %v8710_v41 }
 0x310   : > { %v4344_v28 = vadd.f32 %v4343_v15, %v4342_v11  ;;  %v4447_v36 = vmul.f32 0.03125, %v4335_v49  ;;  %v4207_v20 = vmul.f32 %v8713_v22, %v8713_v22  ;;  %v4018_v12 = vrot.slane %v4017_v42, 2 }
 0x311   : > { %v4024_v33 = vadd.f32 %v4023_v54, %v4022_v16  ;;  %v4349_v21 = vsel %vm421_vm0, %v4204_v50, 0.0  ;;  %v4350_v53 = vsel %vm421_vm0, %v4205_v13, 0.0  ;;  %v4352_v37 = vsel %vm421_vm0, %v4206_v46, 0.0 }
 0x312   : > { %v4345_v4 = vrot.slane %v4344_v28, 2  ;;  %v6436_v27 = vpop.eup %6435  ;;  %v4463_v1 = vadd.f32 1e-06, %v4447_v36  ;;  %v4351_v14 = vadd.f32 %v4350_v53, %v4349_v21  ;;  %v4354_v48 = vsel %vm421_vm0, %v4207_v20, 0.0 }
 0x313   : > { %v4019_v11 = vadd.f32 %v4018_v12, %v4017_v42  ;;  %v4512_v6 = vmul.f32 %v6436_v27, %v8506_v51  ;;  %v4513_v9 = vmul.f32 %v6436_v27, %v8509_v23  ;;  %v4514_v44 = vmul.f32 %v6436_v27, %v8512_v29 }
 0x314   : > { %v4515_v54 = vmul.f32 %v6436_v27, %v8525_v58  ;;  %6437 = vrsqrt.f32 %v4463_v1  ;;  %v4346_v39 = vadd.f32 %v4345_v4, %v4344_v28  ;;  %v4353_v15 = vadd.f32 %v4352_v37, %v4351_v14  ;;  %v9721_v1 = vld [vmem:[#allocation88_spill] sm:$0xff]  ;;  %v9722_v14 = vld [vmem:[#allocation85_spill] sm:$0xff] }
 0x315   : > { %v4020_v49 = vrot.slane %v4019_v11, 1  ;;  %v4580_v16 = vmul.f32 %v8141_v10, %v4512_v6  ;;  %v4581_v50 = vmul.f32 %v8147_v43, %v4513_v9  ;;  %v4582_v42 = vmul.f32 %v8150_v63, %v4514_v44  ;;  %v9724_v6 = vld [vmem:[#allocation91_spill] sm:$0xff] }
 0x316   : > { %v4583_v51 = vmul.f32 %v8153_v25, %v4515_v54  ;;  %v4347_v23 = vrot.slane %v4346_v39, 1  ;;  %v4355_v29 = vadd.f32 %v4354_v48, %v4353_v15  ;;  %v4027_v58 = vsel %vm421_vm0, %v8696_v52, 0.0 }
 0x317   : > { %v4021_v13 = vadd.f32 %v4020_v49, %v4019_v11  ;;  %v4648_v28 = vadd.f32 %v8170_v55, %v4580_v16  ;;  %v4649_v46 = vadd.f32 %v8173_v40, %v4581_v50  ;;  %v4650_v36 = vadd.f32 %v8178_v2, %v4582_v42  ;;  %v9723_v11 = vld [vmem:[#allocation92_spill] sm:$0xff] }
 0x318   : > { %v4651_v20 = vadd.f32 %v8181_v8, %v4583_v51  ;;  %v4348_v12 = vadd.f32 %v4347_v23, %v4346_v39  ;;  %v4356_v4 = vrot.slane %v4355_v29, 4  ;;  %v4025_v53 = vsel %vm421_vm0, %v8699_v57, 0.0 }
 0x319   : > { %v4098_v21 = vmul.f32 0.03125, %v4021_v13  ;;  %4712 = vst.msk [vmem:[%s8217_s6 + $0xc0] sm:$0xff] %vm421_vm0, %v4648_v28  ;;  %4713 = vst.msk [vmem:[%s8217_s6 + $0xc8] sm:$0xff] %vm421_vm0, %v4649_v46  ;;  %v4026_v37 = vadd.f32 %v4025_v53, %v4024_v33  ;;  %v8754_v27 = vadd.f32 %v8483_v7, %v6064_v32  ;;  %v6065_v48 = vadd.f32 %v9722_v14, %v9721_v1 }
 0x31a   : > { %4714 = vst.msk [vmem:[%s8217_s6 + $0xd0] sm:$0xff] %vm421_vm0, %v4650_v36  ;;  %4715 = vst.msk [vmem:[%s8217_s6 + $0xd8] sm:$0xff] %vm421_vm0, %v4651_v20  ;;  %v6066_v9 = vadd.f32 %v9724_v6, %v9723_v11  ;;  %v4448_v44 = vmul.f32 0.03125, %v4348_v12  ;;  %v4357_v54 = vadd.f32 %v4356_v4, %v4355_v29 }
 0x31b   : > { %v8761_v39 = vsub.f32 %v8585_v18, %v4098_v21  ;;  %v8764_v15 = vsub.f32 %v8582_v34, %v4098_v21  ;;  %v8767_v49 = vsub.f32 %v8649_v35, %v4098_v21  ;;  %v8770_v32 = vsub.f32 %v8646_v0, %v4098_v21 }
 0x31c   : > { %v4028_v33 = vadd.f32 %v4027_v58, %v4026_v37  ;;  %v4036_v16 = vsel %vm421_vm0, %v8754_v27, 0.0  ;;  %v4464_v50 = vadd.f32 1e-06, %v4448_v44  ;;  %v4358_v42 = vrot.slane %v4357_v54, 2 }
 0x31d   : > { %v4208_v51 = vmul.f32 %v8761_v39, %v8761_v39  ;;  %v4209_v18 = vmul.f32 %v8764_v15, %v8764_v15  ;;  %v4210_v34 = vmul.f32 %v8767_v49, %v8767_v49  ;;  %v4211_v35 = vmul.f32 %v8770_v32, %v8770_v32 }
 0x31e   : > { %v4029_v0 = vrot.slane %v4028_v33, 4  ;;  %v8783_v23 = vadd.f32 %v8483_v7, %v6065_v48  ;;  %v6438_v29 = vpop.eup %6437  ;;  %6439 = vrsqrt.f32 %v4464_v50  ;;  %v4359_v13 = vadd.f32 %v4358_v42, %v4357_v54 }
 0x31f   : > { %v4362_v58 = vsel %vm421_vm0, %v4208_v51, 0.0  ;;  %v4363_v28 = vsel %vm421_vm0, %v4209_v18, 0.0  ;;  %v4516_v46 = vmul.f32 %v6438_v29, %v8590_v31  ;;  %v4517_v36 = vmul.f32 %v6438_v29, %v8593_v47 }
 0x320   : > { %v4518_v20 = vmul.f32 %v6438_v29, %v8596_v56  ;;  %v4519_v12 = vmul.f32 %v6438_v29, %v8599_v17  ;;  %v4360_v4 = vrot.slane %v4359_v13, 1  ;;  %v4364_v21 = vadd.f32 %v4363_v28, %v4362_v58 }
 0x321   : > { %v4365_v53 = vsel %vm421_vm0, %v4210_v34, 0.0  ;;  %v4367_v37 = vsel %vm421_vm0, %v4211_v35, 0.0  ;;  %v4584_v1 = vmul.f32 %v8141_v10, %v4516_v46  ;;  %v4585_v14 = vmul.f32 %v8147_v43, %v4517_v36  ;;  %v9727_v34 = vld [vmem:[#allocation17_spill] sm:$0xff]  ;;  %v9728_v35 = vld [vmem:[#allocation16_spill] sm:$0xff] }
 0x322   : > { %v4586_v31 = vmul.f32 %v8150_v63, %v4518_v20  ;;  %v4587_v47 = vmul.f32 %v8153_v25, %v4519_v12  ;;  %v4361_v56 = vadd.f32 %v4360_v4, %v4359_v13  ;;  %v4366_v17 = vadd.f32 %v4365_v53, %v4364_v21 }
 0x323   : > { %v4030_v48 = vadd.f32 %v4029_v0, %v4028_v33  ;;  %v4035_v11 = vsel %vm421_vm0, %v8783_v23, 0.0  ;;  %v4652_v6 = vadd.f32 %v8170_v55, %v4584_v1  ;;  %v4653_v10 = vadd.f32 %v8173_v40, %v4585_v14  ;;  %v9725_v55 = vld [vmem:[#allocation97_spill] sm:$0xff]  ;;  %v8857_v14 = vld [vmem:[%s6973_s7 + $0x18] sm:$0xff] }
 0x324   : > { %v4654_v44 = vadd.f32 %v8178_v2, %v4586_v31  ;;  %v4655_v43 = vadd.f32 %v8181_v8, %v4587_v47  ;;  %v4449_v54 = vmul.f32 0.03125, %v4361_v56  ;;  %v4368_v63 = vadd.f32 %v4367_v37, %v4366_v17  ;;  %v9726_v8 = vld [vmem:[#allocation15_spill] sm:$0xff] }
 0x325   : > { %v4031_v50 = vrot.slane %v4030_v48, 2  ;;  %v4037_v42 = vadd.f32 %v4036_v16, %v4035_v11  ;;  %4716 = vst.msk [vmem:[%s8217_s6 + $0xe0] sm:$0xff] %vm421_vm0, %v4652_v6  ;;  %4717 = vst.msk [vmem:[%s8217_s6 + $0xe8] sm:$0xff] %vm421_vm0, %v4653_v10  ;;  %v8812_v25 = vadd.f32 %v8483_v7, %v6066_v9  ;;  %v6067_v40 = vadd.f32 %v9725_v55, %v8436_v59  ;;  %v8845_v37 = vld [vmem:[%s6973_s7] sm:$0xff]  ;;  %v8867_v10 = vld [vmem:[%s8167_s24 + $0x8] sm:$0xff] }
 0x326   : > { %4718 = vst.msk [vmem:[%s8217_s6 + $0xf0] sm:$0xff] %vm421_vm0, %v4654_v44  ;;  %4719 = vst.msk [vmem:[%s8217_s6 + $0xf8] sm:$0xff] %vm421_vm0, %v4655_v43  ;;  %v6068_v2 = vadd.f32 %v8442_v26, %v8446_v38  ;;  %v6069_v33 = vadd.f32 %v9726_v8, %v8454_v3  ;;  %v4465_v16 = vadd.f32 1e-06, %v4449_v54  ;;  %v4369_v51 = vrot.slane %v4368_v63, 4  ;;  %v8863_v11 = vld [vmem:[%s8167_s24] sm:$0xff] }
 0x327   : > { %v4032_v18 = vadd.f32 %v4031_v50, %v4030_v48  ;;  %v6070_v0 = vadd.f32 %v9728_v35, %v9727_v34  ;;  %v4040_v29 = vsel %vm421_vm0, %v8812_v25, 0.0  ;;  %v8825_v9 = vadd.f32 %v8483_v7, %v6067_v40  ;;  %v8871_v43 = vld [vmem:[%s8167_s24 + $0x10] sm:$0xff]  ;;  %v9729_v35 = vld [vmem:[#allocation19_spill] sm:$0xff] }
 0x328   : > { %v8828_v59 = vadd.f32 %v8483_v7, %v6068_v2  ;;  %v8831_v26 = vadd.f32 %v8483_v7, %v6069_v33  ;;  %v6440_v38 = vpop.eup %6439  ;;  %6441 = vrsqrt.f32 %v4465_v16  ;;  %v4370_v3 = vadd.f32 %v4369_v51, %v4368_v63  ;;  %v8875_v63 = vld [vmem:[%s8167_s24 + $0x18] sm:$0xff] }
 0x329   : > { %v4033_v13 = vrot.slane %v4032_v18, 1  ;;  %v8834_v58 = vadd.f32 %v8483_v7, %v6070_v0  ;;  %v4520_v28 = vmul.f32 %v6440_v38, %v8654_v61  ;;  %v4521_v46 = vmul.f32 %v6440_v38, %v8657_v19  ;;  %v8849_v19 = vld [vmem:[%s6973_s7 + $0x8] sm:$0xff]  ;;  %v9730_v0 = vld [vmem:[#allocation18_spill] sm:$0xff] }
 0x32a   : > { %v4522_v36 = vmul.f32 %v6440_v38, %v8660_v60  ;;  %v4523_v20 = vmul.f32 %v6440_v38, %v8663_v62  ;;  %v4371_v12 = vrot.slane %v4370_v3, 2  ;;  %v4038_v21 = vsel %vm421_vm0, %v8825_v9, 0.0  ;;  %v8853_v62 = vld [vmem:[%s6973_s7 + $0x10] sm:$0xff] }
 0x32b   : > { %v4034_v4 = vadd.f32 %v4033_v13, %v4032_v18  ;;  %v4049_v53 = vsel %vm421_vm0, %v8828_v59, 0.0  ;;  %v4588_v61 = vmul.f32 %v8845_v37, %v4520_v28  ;;  %v4589_v60 = vmul.f32 %v8849_v19, %v4521_v46  ;;  %v9731_v38 = vld [vmem:[#allocation21_spill] sm:$0xff] }
 0x32c   : > { %v4590_v1 = vmul.f32 %v8853_v62, %v4522_v36  ;;  %v4591_v31 = vmul.f32 %v8857_v14, %v4523_v20  ;;  %v4372_v47 = vadd.f32 %v4371_v12, %v4370_v3  ;;  %v4039_v17 = vadd.f32 %v4038_v21, %v4037_v42  ;;  %v9732_v3 = vld [vmem:[#allocation20_spill] sm:$0xff] }
 0x32d   : > { %v4099_v56 = vmul.f32 0.03125, %v4034_v4  ;;  %v4048_v48 = vsel %vm421_vm0, %v8831_v26, 0.0  ;;  %v4656_v6 = vadd.f32 %v8863_v11, %v4588_v61  ;;  %v4657_v44 = vadd.f32 %v8867_v10, %v4589_v60 }
 0x32e   : > { %v4658_v54 = vadd.f32 %v8871_v43, %v4590_v1  ;;  %v4659_v50 = vadd.f32 %v8875_v63, %v4591_v31  ;;  %v4373_v42 = vrot.slane %v4372_v47, 1  ;;  %v4041_v33 = vadd.f32 %v4040_v29, %v4039_v17 }
 0x32f   : > { %v8879_v55 = vsub.f32 %v8693_v24, %v4099_v56  ;;  %v8882_v40 = vsub.f32 %v8682_v45, %v4099_v56  ;;  %v8885_v2 = vsub.f32 %v8699_v57, %v4099_v56  ;;  %4720 = vst.msk [vmem:[%s8217_s6 + $0x100] sm:$0xff] %vm421_vm0, %v4656_v6  ;;  %4721 = vst.msk [vmem:[%s8217_s6 + $0x108] sm:$0xff] %vm421_vm0, %v4657_v44  ;;  %v4053_v45 = vsel %vm421_vm0, %v8834_v58, 0.0 }
 0x330   : > { %4722 = vst.msk [vmem:[%s8217_s6 + $0x110] sm:$0xff] %vm421_vm0, %v4658_v54  ;;  %4723 = vst.msk [vmem:[%s8217_s6 + $0x118] sm:$0xff] %vm421_vm0, %v4659_v50  ;;  %v8896_v8 = vsub.f32 %v8696_v52, %v4099_v56  ;;  %v4050_v24 = vadd.f32 %v4049_v53, %v4048_v48  ;;  %v4374_v16 = vadd.f32 %v4373_v42, %v4372_v47  ;;  %v4042_v52 = vrot.slane %v4041_v33, 4 }
 0x331   : > { %v4212_v57 = vmul.f32 %v8879_v55, %v8879_v55  ;;  %v4213_v51 = vmul.f32 %v8882_v40, %v8882_v40  ;;  %v4214_v18 = vmul.f32 %v8885_v2, %v8885_v2  ;;  %v6071_v29 = vadd.f32 %v9730_v0, %v9729_v35  ;;  %v9735_v35 = vld [vmem:[#allocation25_spill] sm:$0xff]  ;;  %v9736_v0 = vld [vmem:[#allocation24_spill] sm:$0xff] }
 0x332   : > { %v4215_v34 = vmul.f32 %v8896_v8, %v8896_v8  ;;  %v6072_v13 = vadd.f32 %v9732_v3, %v9731_v38  ;;  %v6442_v28 = vpop.eup %6441  ;;  %v4450_v46 = vmul.f32 0.03125, %v4374_v16  ;;  %v4043_v47 = vadd.f32 %v4042_v52, %v4041_v33  ;;  %v9737_v38 = vld [vmem:[#allocation27_spill] sm:$0xff]  ;;  %v9738_v3 = vld [vmem:[#allocation26_spill] sm:$0xff] }
 0x333   : > { %v4375_v36 = vsel %vm421_vm0, %v4212_v57, 0.0  ;;  %v4376_v20 = vsel %vm421_vm0, %v4213_v51, 0.0  ;;  %v4378_v12 = vsel %vm421_vm0, %v4214_v18, 0.0  ;;  %v4524_v4 = vmul.f32 %v6442_v28, %v8704_v5  ;;  %v9733_v18 = vld [vmem:[#allocation23_spill] sm:$0xff] }
 0x334   : > { %v4525_v21 = vmul.f32 %v6442_v28, %v8707_v30  ;;  %v4526_v53 = vmul.f32 %v6442_v28, %v8710_v41  ;;  %v4527_v61 = vmul.f32 %v6442_v28, %v8713_v22  ;;  %v4466_v60 = vadd.f32 1e-06, %v4450_v46 }
 0x335   : > { %v4377_v1 = vadd.f32 %v4376_v20, %v4375_v36  ;;  %v4380_v31 = vsel %vm421_vm0, %v4215_v34, 0.0  ;;  %v4592_v56 = vmul.f32 %v8845_v37, %v4524_v4  ;;  %v4044_v41 = vrot.slane %v4043_v47, 2  ;;  %v9734_v34 = vld [vmem:[#allocation22_spill] sm:$0xff]  ;;  %v9739_v20 = vld [vmem:[#allocation29_spill] sm:$0xff] }
 0x336   : > { %v4593_v17 = vmul.f32 %v8849_v19, %v4525_v21  ;;  %v4594_v48 = vmul.f32 %v8853_v62, %v4526_v53  ;;  %v4595_v5 = vmul.f32 %v8857_v14, %v4527_v61  ;;  %6443 = vrsqrt.f32 %v4466_v60 }
 0x337   : > { %v4379_v30 = vadd.f32 %v4378_v12, %v4377_v1  ;;  %v8925_v22 = vadd.f32 %v8483_v7, %v6071_v29  ;;  %v4660_v6 = vadd.f32 %v8863_v11, %v4592_v56  ;;  %v4045_v33 = vadd.f32 %v4044_v41, %v4043_v47  ;;  %v9740_v12 = vld [vmem:[#allocation28_spill] sm:$0xff]  ;;  %v9742_v47 = vld [vmem:[#allocation30_spill] sm:$0xff] }
 0x338   : > { %v4661_v44 = vadd.f32 %v8867_v10, %v4593_v17  ;;  %v4662_v54 = vadd.f32 %v8871_v43, %v4594_v48  ;;  %v4663_v50 = vadd.f32 %v8875_v63, %v4595_v5  ;;  %v8934_v57 = vadd.f32 %v8483_v7, %v6072_v13 }
 0x339   : > { %v4381_v42 = vadd.f32 %v4380_v31, %v4379_v30  ;;  %v4051_v16 = vsel %vm421_vm0, %v8925_v22, 0.0  ;;  %4724 = vst.msk [vmem:[%s8217_s6 + $0x120] sm:$0xff] %vm421_vm0, %v4660_v6  ;;  %v6073_v52 = vadd.f32 %v9734_v34, %v9733_v18  ;;  %v6074_v29 = vadd.f32 %v9736_v0, %v9735_v35  ;;  %v9741_v31 = vld [vmem:[#allocation31_spill] sm:$0xff]  ;;  %v9746_v18 = vld [vmem:[#allocation34_spill] sm:$0xff] }
 0x33a   : > { %4725 = vst.msk [vmem:[%s8217_s6 + $0x128] sm:$0xff] %vm421_vm0, %v4661_v44  ;;  %4726 = vst.msk [vmem:[%s8217_s6 + $0x130] sm:$0xff] %vm421_vm0, %v4662_v54  ;;  %v4052_v51 = vadd.f32 %v4051_v16, %v4050_v24  ;;  %v6075_v28 = vadd.f32 %v9738_v3, %v9737_v38  ;;  %v4046_v46 = vrot.slane %v4045_v33, 1  ;;  %v4062_v36 = vsel %vm421_vm0, %v8934_v57, 0.0 }
 0x33b   : > { %4727 = vst.msk [vmem:[%s8217_s6 + $0x138] sm:$0xff] %vm421_vm0, %v4663_v50  ;;  %v4382_v13 = vrot.slane %v4381_v42, 4  ;;  %v6076_v4 = vadd.f32 %v9740_v12, %v9739_v20  ;;  %v8955_v24 = vadd.f32 %v8483_v7, %v6073_v52  ;;  %v8958_v53 = vadd.f32 %v8483_v7, %v6074_v29 }
 0x33c   : > { %v4054_v21 = vadd.f32 %v4053_v45, %v4052_v51  ;;  %v8961_v61 = vadd.f32 %v8483_v7, %v6075_v28  ;;  %v4047_v1 = vadd.f32 %v4046_v46, %v4045_v33  ;;  %v6077_v56 = vadd.f32 %v9742_v47, %v9741_v31  ;;  %v9744_v33 = vld [vmem:[#allocation32_spill] sm:$0xff]  ;;  %v9745_v51 = vld [vmem:[#allocation35_spill] sm:$0xff] }
 0x33d   : > { %v4383_v60 = vadd.f32 %v4382_v13, %v4381_v42  ;;  %v4061_v48 = vsel %vm421_vm0, %v8955_v24, 0.0  ;;  %v4066_v45 = vsel %vm421_vm0, %v8958_v53, 0.0  ;;  %v8970_v5 = vadd.f32 %v8483_v7, %v6076_v4  ;;  %v9743_v42 = vld [vmem:[#allocation33_spill] sm:$0xff] }
 0x33e   : > { %v4055_v17 = vrot.slane %v4054_v21, 4  ;;  %v4100_v41 = vmul.f32 0.03125, %v4047_v1  ;;  %v4063_v6 = vadd.f32 %v4062_v36, %v4061_v48  ;;  %v4064_v44 = vsel %vm421_vm0, %v8961_v61, 0.0 }
 0x33f   : > { %v4384_v30 = vrot.slane %v4383_v60, 2  ;;  %v8975_v50 = vadd.f32 %v8483_v7, %v6077_v56  ;;  %v6078_v16 = vadd.f32 %v9744_v33, %v9743_v42  ;;  %v6079_v34 = vadd.f32 %v9746_v18, %v9745_v51 }
 0x340   : > { %v4056_v54 = vadd.f32 %v4055_v17, %v4054_v21  ;;  %v6444_v52 = vpop.eup %6443  ;;  %v8982_v0 = vsub.f32 %v8783_v23, %v4100_v41  ;;  %v8985_v29 = vsub.f32 %v8754_v27, %v4100_v41  ;;  %v8988_v38 = vsub.f32 %v8825_v9, %v4100_v41 }
 0x341   : > { %v4385_v35 = vadd.f32 %v4384_v30, %v4383_v60  ;;  %v4528_v3 = vmul.f32 %v6444_v52, %v8761_v39  ;;  %v4529_v28 = vmul.f32 %v6444_v52, %v8764_v15  ;;  %v4530_v13 = vmul.f32 %v6444_v52, %v8767_v49 }
 0x342   : > { %v4531_v46 = vmul.f32 %v6444_v52, %v8770_v32  ;;  %v8995_v20 = vsub.f32 %v8812_v25, %v4100_v41  ;;  %v4216_v23 = vmul.f32 %v8982_v0, %v8982_v0  ;;  %v4217_v27 = vmul.f32 %v8985_v29, %v8985_v29 }
 0x343   : > { %v4386_v36 = vrot.slane %v4385_v35, 1  ;;  %v4596_v9 = vmul.f32 %v8845_v37, %v4528_v3  ;;  %v4597_v39 = vmul.f32 %v8849_v19, %v4529_v28  ;;  %v4598_v15 = vmul.f32 %v8853_v62, %v4530_v13 }
 0x344   : > { %v4599_v49 = vmul.f32 %v8857_v14, %v4531_v46  ;;  %v4218_v25 = vmul.f32 %v8988_v38, %v8988_v38  ;;  %v4388_v12 = vsel %vm421_vm0, %v4216_v23, 0.0  ;;  %v4075_v4 = vsel %vm421_vm0, %v8970_v5, 0.0 }
 0x345   : > { %v4387_v32 = vadd.f32 %v4386_v36, %v4385_v35  ;;  %v4664_v21 = vadd.f32 %v8863_v11, %v4596_v9  ;;  %v4665_v60 = vadd.f32 %v8867_v10, %v4597_v39  ;;  %v4666_v1 = vadd.f32 %v8871_v43, %v4598_v15 }
 0x346   : > { %v4667_v31 = vadd.f32 %v8875_v63, %v4599_v49  ;;  %v4219_v56 = vmul.f32 %v8995_v20, %v8995_v20  ;;  %v4389_v17 = vsel %vm421_vm0, %v4217_v27, 0.0  ;;  %v4391_v48 = vsel %vm421_vm0, %v4218_v25, 0.0 }
 0x347   : > { %v4451_v47 = vmul.f32 0.03125, %v4387_v32  ;;  %4728 = vst.msk [vmem:[%s8217_s6 + $0x140] sm:$0xff] %vm421_vm0, %v4664_v21  ;;  %4729 = vst.msk [vmem:[%s8217_s6 + $0x148] sm:$0xff] %vm421_vm0, %v4665_v60  ;;  %v4390_v30 = vadd.f32 %v4389_v17, %v4388_v12  ;;  %v4057_v41 = vrot.slane %v4056_v54, 2  ;;  %v4065_v42 = vadd.f32 %v4064_v44, %v4063_v6 }
 0x348   : > { %4730 = vst.msk [vmem:[%s8217_s6 + $0x150] sm:$0xff] %vm421_vm0, %v4666_v1  ;;  %4731 = vst.msk [vmem:[%s8217_s6 + $0x158] sm:$0xff] %vm421_vm0, %v4667_v31  ;;  %v4074_v33 = vsel %vm421_vm0, %v8975_v50, 0.0  ;;  %v9029_v52 = vadd.f32 %v8483_v7, %v6078_v16  ;;  %v9032_v35 = vadd.f32 %v8483_v7, %v6079_v34  ;;  %v4393_v46 = vsel %vm421_vm0, %v4219_v56, 0.0 }
 0x349   : > { %v4467_v51 = vadd.f32 1e-06, %v4451_v47  ;;  %v4076_v18 = vadd.f32 %v4075_v4, %v4074_v33  ;;  %v4392_v3 = vadd.f32 %v4391_v48, %v4390_v30  ;;  %v4058_v28 = vadd.f32 %v4057_v41, %v4056_v54 }
 0x34a   : > { %v4067_v13 = vadd.f32 %v4066_v45, %v4065_v42  ;;  %v4077_v6 = vsel %vm421_vm0, %v9032_v35, 0.0  ;;  %v4079_v16 = vsel %vm421_vm0, %v9029_v52, 0.0 }
 0x34b   : > { %6445 = vrsqrt.f32 %v4467_v51  ;;  %v4394_v44 = vadd.f32 %v4393_v46, %v4392_v3  ;;  %v4059_v36 = vrot.slane %v4058_v28, 1  ;;  %v4078_v27 = vadd.f32 %v4077_v6, %v4076_v18 }
 0x34c   : > { %v4068_v23 = vrot.slane %v4067_v13, 4 }
 0x34d   : > { %v4395_v9 = vrot.slane %v4394_v44, 4  ;;  %v4060_v39 = vadd.f32 %v4059_v36, %v4058_v28  ;;  %v4080_v34 = vadd.f32 %v4079_v16, %v4078_v27 }
 0x34e   : > { %v4069_v7 = vadd.f32 %v4068_v23, %v4067_v13 }
 0x34f   : > { %v4396_v15 = vadd.f32 %v4395_v9, %v4394_v44  ;;  %v4101_v54 = vmul.f32 0.03125, %v4060_v39  ;;  %v4081_v49 = vrot.slane %v4080_v34, 4 }
 0x350   : > { %v4070_v45 = vrot.slane %v4069_v7, 2 }
 0x351   : > { %v4397_v32 = vrot.slane %v4396_v15, 2  ;;  %v9040_v25 = vsub.f32 %v8831_v26, %v4101_v54  ;;  %v9043_v12 = vsub.f32 %v8828_v59, %v4101_v54  ;;  %v9046_v4 = vsub.f32 %v8925_v22, %v4101_v54 }
 0x352   : > { %v9049_v21 = vsub.f32 %v8834_v58, %v4101_v54  ;;  %v4071_v60 = vadd.f32 %v4070_v45, %v4069_v7  ;;  %v4082_v1 = vadd.f32 %v4081_v49, %v4080_v34 }
 0x353   : > { %v4398_v31 = vadd.f32 %v4397_v32, %v4396_v15  ;;  %v4220_v47 = vmul.f32 %v9040_v25, %v9040_v25  ;;  %v4221_v56 = vmul.f32 %v9043_v12, %v9043_v12  ;;  %v4222_v59 = vmul.f32 %v9046_v4, %v9046_v4 }
 0x354   : > { %v4223_v22 = vmul.f32 %v9049_v21, %v9049_v21  ;;  %v4072_v17 = vrot.slane %v4071_v60, 1  ;;  %v4083_v18 = vrot.slane %v4082_v1, 2 }
 0x355   : > { %v6446_v26 = vpop.eup %6445  ;;  %v4399_v42 = vrot.slane %v4398_v31, 1  ;;  %v4401_v33 = vsel %vm421_vm0, %v4220_v47, 0.0  ;;  %v4402_v51 = vsel %vm421_vm0, %v4221_v56, 0.0  ;;  %v4404_v13 = vsel %vm421_vm0, %v4222_v59, 0.0 }
 0x356   : > { %v4532_v58 = vmul.f32 %v6446_v26, %v8879_v55  ;;  %v4533_v48 = vmul.f32 %v6446_v26, %v8882_v40  ;;  %v4534_v30 = vmul.f32 %v6446_v26, %v8885_v2  ;;  %v4535_v41 = vmul.f32 %v6446_v26, %v8896_v8 }
 0x357   : > { %v4400_v2 = vadd.f32 %v4399_v42, %v4398_v31  ;;  %v4403_v8 = vadd.f32 %v4402_v51, %v4401_v33  ;;  %v4073_v46 = vadd.f32 %v4072_v17, %v4071_v60  ;;  %v4084_v39 = vadd.f32 %v4083_v18, %v4082_v1 }
 0x358   : > { %v4600_v3 = vmul.f32 %v8845_v37, %v4532_v58  ;;  %v4601_v28 = vmul.f32 %v8849_v19, %v4533_v48  ;;  %v4602_v55 = vmul.f32 %v8853_v62, %v4534_v30  ;;  %v4603_v40 = vmul.f32 %v8857_v14, %v4535_v41 }
 0x359   : > { %v4452_v27 = vmul.f32 0.03125, %v4400_v2  ;;  %v4405_v16 = vadd.f32 %v4404_v13, %v4403_v8  ;;  %v4102_v9 = vmul.f32 0.03125, %v4073_v46  ;;  %v4406_v7 = vsel %vm421_vm0, %v4223_v22, 0.0 }
 0x35a   : > { %v4668_v6 = vadd.f32 %v8863_v11, %v4600_v3  ;;  %v4669_v44 = vadd.f32 %v8867_v10, %v4601_v28  ;;  %v4670_v36 = vadd.f32 %v8871_v43, %v4602_v55  ;;  %v4671_v23 = vadd.f32 %v8875_v63, %v4603_v40 }
 0x35b   : > { %v4468_v34 = vadd.f32 1e-06, %v4452_v27  ;;  %v4407_v15 = vadd.f32 %v4406_v7, %v4405_v16  ;;  %v9084_v54 = vsub.f32 %v8955_v24, %v4102_v9  ;;  %v9087_v45 = vsub.f32 %v8934_v57, %v4102_v9 }
 0x35c   : > { %4732 = vst.msk [vmem:[%s8217_s6 + $0x160] sm:$0xff] %vm421_vm0, %v4668_v6  ;;  %4733 = vst.msk [vmem:[%s8217_s6 + $0x168] sm:$0xff] %vm421_vm0, %v4669_v44  ;;  %v9090_v49 = vsub.f32 %v8961_v61, %v4102_v9  ;;  %v9093_v32 = vsub.f32 %v8958_v53, %v4102_v9  ;;  %v4085_v60 = vrot.slane %v4084_v39, 1 }
 0x35d   : > { %4734 = vst.msk [vmem:[%s8217_s6 + $0x170] sm:$0xff] %vm421_vm0, %v4670_v36  ;;  %4735 = vst.msk [vmem:[%s8217_s6 + $0x178] sm:$0xff] %vm421_vm0, %v4671_v23  ;;  %6447 = vrsqrt.f32 %v4468_v34  ;;  %v4408_v1 = vrot.slane %v4407_v15, 4  ;;  %v4224_v31 = vmul.f32 %v9084_v54, %v9084_v54  ;;  %v4225_v47 = vmul.f32 %v9087_v45, %v9087_v45 }
 0x35e   : > { %v4226_v24 = vmul.f32 %v9090_v49, %v9090_v49  ;;  %v4086_v57 = vadd.f32 %v4085_v60, %v4084_v39  ;;  %v4227_v61 = vmul.f32 %v9093_v32, %v9093_v32 }
 0x35f   : > { %v4409_v56 = vadd.f32 %v4408_v1, %v4407_v15  ;;  %v4414_v53 = vsel %vm421_vm0, %v4224_v31, 0.0  ;;  %v4415_v26 = vsel %vm421_vm0, %v4225_v47, 0.0 }
 0x360   : > { %v4416_v59 = vadd.f32 %v4415_v26, %v4414_v53  ;;  %v4103_v22 = vmul.f32 0.03125, %v4086_v57  ;;  %v4417_v58 = vsel %vm421_vm0, %v4226_v24, 0.0  ;;  %v4419_v51 = vsel %vm421_vm0, %v4227_v61, 0.0 }
 0x361   : > { %v4410_v17 = vrot.slane %v4409_v56, 2 }
 0x362   : > { %v4418_v48 = vadd.f32 %v4417_v58, %v4416_v59  ;;  %v9107_v30 = vsub.f32 %v8975_v50, %v4103_v22  ;;  %v9110_v41 = vsub.f32 %v8970_v5, %v4103_v22  ;;  %v9113_v42 = vsub.f32 %v9032_v35, %v4103_v22 }
 0x363   : > { %v4411_v33 = vadd.f32 %v4410_v17, %v4409_v56  ;;  %v9117_v18 = vsub.f32 %v9029_v52, %v4103_v22 }
 0x364   : > { %v4420_v3 = vadd.f32 %v4419_v51, %v4418_v48  ;;  %v4228_v28 = vmul.f32 %v9107_v30, %v9107_v30  ;;  %v4229_v50 = vmul.f32 %v9110_v41, %v9110_v41  ;;  %v4230_v5 = vmul.f32 %v9113_v42, %v9113_v42 }
 0x365   : > { %v4412_v55 = vrot.slane %v4411_v33, 1  ;;  %v4231_v35 = vmul.f32 %v9117_v18, %v9117_v18 }
 0x366   : > { %v4421_v40 = vrot.slane %v4420_v3, 4  ;;  %v4427_v2 = vsel %vm421_vm0, %v4228_v28, 0.0  ;;  %v4428_v52 = vsel %vm421_vm0, %v4229_v50, 0.0  ;;  %v4430_v6 = vsel %vm421_vm0, %v4230_v5, 0.0 }
 0x367   : > { %v6448_v8 = vpop.eup %6447  ;;  %v4413_v13 = vadd.f32 %v4412_v55, %v4411_v33  ;;  %v4429_v46 = vadd.f32 %v4428_v52, %v4427_v2  ;;  %v4432_v7 = vsel %vm421_vm0, %v4231_v35, 0.0 }
 0x368   : > { %v4536_v44 = vmul.f32 %v6448_v8, %v8982_v0  ;;  %v4537_v36 = vmul.f32 %v6448_v8, %v8985_v29  ;;  %v4538_v23 = vmul.f32 %v6448_v8, %v8988_v38  ;;  %v4539_v27 = vmul.f32 %v6448_v8, %v8995_v20 }
 0x369   : > { %v4453_v16 = vmul.f32 0.03125, %v4413_v13  ;;  %v4422_v9 = vadd.f32 %v4421_v40, %v4420_v3  ;;  %v4431_v39 = vadd.f32 %v4430_v6, %v4429_v46 }
 0x36a   : > { %v4604_v34 = vmul.f32 %v8845_v37, %v4536_v44  ;;  %v4605_v15 = vmul.f32 %v8849_v19, %v4537_v36  ;;  %v4606_v0 = vmul.f32 %v8853_v62, %v4538_v23  ;;  %v4607_v29 = vmul.f32 %v8857_v14, %v4539_v27 }
 0x36b   : > { %v4469_v38 = vadd.f32 1e-06, %v4453_v16  ;;  %v4423_v60 = vrot.slane %v4422_v9, 2  ;;  %v4433_v20 = vadd.f32 %v4432_v7, %v4431_v39 }
 0x36c   : > { %v4672_v1 = vadd.f32 %v8863_v11, %v4604_v34  ;;  %v4673_v31 = vadd.f32 %v8867_v10, %v4605_v15  ;;  %v4674_v47 = vadd.f32 %v8871_v43, %v4606_v0  ;;  %v4675_v24 = vadd.f32 %v8875_v63, %v4607_v29 }
 0x36d   : > { %6449 = vrsqrt.f32 %v4469_v38  ;;  %v4424_v57 = vadd.f32 %v4423_v60, %v4422_v9  ;;  %v4434_v56 = vrot.slane %v4433_v20, 4 }
 0x36e   : > { %4736 = vst.msk [vmem:[%s8217_s6 + $0x180] sm:$0xff] %vm421_vm0, %v4672_v1  ;;  %4737 = vst.msk [vmem:[%s8217_s6 + $0x188] sm:$0xff] %vm421_vm0, %v4673_v31 }
 0x36f   : > { %4738 = vst.msk [vmem:[%s8217_s6 + $0x190] sm:$0xff] %vm421_vm0, %v4674_v47  ;;  %4739 = vst.msk [vmem:[%s8217_s6 + $0x198] sm:$0xff] %vm421_vm0, %v4675_v24  ;;  %v4425_v61 = vrot.slane %v4424_v57, 1  ;;  %v4435_v53 = vadd.f32 %v4434_v56, %v4433_v20 }
 0x371   : > { %v4426_v26 = vadd.f32 %v4425_v61, %v4424_v57  ;;  %v4436_v59 = vrot.slane %v4435_v53, 2 }
 0x373   : > { %v4454_v22 = vmul.f32 0.03125, %v4426_v26  ;;  %v4437_v17 = vadd.f32 %v4436_v59, %v4435_v53 }
 0x375   : > { %v4470_v58 = vadd.f32 1e-06, %v4454_v22  ;;  %v4438_v48 = vrot.slane %v4437_v17, 1 }
 0x377   : > { %v6450_v33 = vpop.eup %6449  ;;  %6451 = vrsqrt.f32 %v4470_v58  ;;  %v4439_v51 = vadd.f32 %v4438_v48, %v4437_v17 }
 0x378   : > { %v4540_v3 = vmul.f32 %v6450_v33, %v9040_v25  ;;  %v4541_v28 = vmul.f32 %v6450_v33, %v9043_v12  ;;  %v4542_v50 = vmul.f32 %v6450_v33, %v9046_v4  ;;  %v4543_v5 = vmul.f32 %v6450_v33, %v9049_v21 }
 0x379   : > { %v4455_v55 = vmul.f32 0.03125, %v4439_v51 }
 0x37a   : > { %v4608_v35 = vmul.f32 %v8845_v37, %v4540_v3  ;;  %v4609_v40 = vmul.f32 %v8849_v19, %v4541_v28  ;;  %v4610_v2 = vmul.f32 %v8853_v62, %v4542_v50  ;;  %v4611_v52 = vmul.f32 %v8857_v14, %v4543_v5 }
 0x37b   : > { %v4471_v8 = vadd.f32 1e-06, %v4455_v55 }
 0x37c   : > { %v4676_v25 = vadd.f32 %v8863_v11, %v4608_v35  ;;  %v4677_v12 = vadd.f32 %v8867_v10, %v4609_v40  ;;  %v4678_v13 = vadd.f32 %v8871_v43, %v4610_v2  ;;  %v4679_v4 = vadd.f32 %v8875_v63, %v4611_v52 }
 0x37d   : > { %6453 = vrsqrt.f32 %v4471_v8 }
 0x37e   : > { %4740 = vst.msk [vmem:[%s8217_s6 + $0x1a0] sm:$0xff] %vm421_vm0, %v4676_v25  ;;  %4741 = vst.msk [vmem:[%s8217_s6 + $0x1a8] sm:$0xff] %vm421_vm0, %v4677_v12 }
 0x37f   : > { %4742 = vst.msk [vmem:[%s8217_s6 + $0x1b0] sm:$0xff] %vm421_vm0, %v4678_v13  ;;  %4743 = vst.msk [vmem:[%s8217_s6 + $0x1b8] sm:$0xff] %vm421_vm0, %v4679_v4 }
 0x381   : > { %v6452_v21 = vpop.eup %6451 }
 0x382   : > { %v4544_v46 = vmul.f32 %v6452_v21, %v9084_v54  ;;  %v4545_v6 = vmul.f32 %v6452_v21, %v9087_v45  ;;  %v4546_v44 = vmul.f32 %v6452_v21, %v9090_v49  ;;  %v4547_v36 = vmul.f32 %v6452_v21, %v9093_v32 }
 0x384   : > { %v4612_v23 = vmul.f32 %v8845_v37, %v4544_v46  ;;  %v4613_v27 = vmul.f32 %v8849_v19, %v4545_v6  ;;  %v4614_v16 = vmul.f32 %v8853_v62, %v4546_v44  ;;  %v4615_v9 = vmul.f32 %v8857_v14, %v4547_v36 }
 0x386   : > { %v4680_v39 = vadd.f32 %v8863_v11, %v4612_v23  ;;  %v4681_v54 = vadd.f32 %v8867_v10, %v4613_v27  ;;  %v4682_v45 = vadd.f32 %v8871_v43, %v4614_v16  ;;  %v4683_v49 = vadd.f32 %v8875_v63, %v4615_v9 }
 0x387   : > { %v6454_v7 = vpop.eup %6453 }
 0x388   : > { %4744 = vst.msk [vmem:[%s8217_s6 + $0x1c0] sm:$0xff] %vm421_vm0, %v4680_v39  ;;  %4745 = vst.msk [vmem:[%s8217_s6 + $0x1c8] sm:$0xff] %vm421_vm0, %v4681_v54  ;;  %v4548_v32 = vmul.f32 %v6454_v7, %v9107_v30  ;;  %v4549_v34 = vmul.f32 %v6454_v7, %v9110_v41  ;;  %v4550_v15 = vmul.f32 %v6454_v7, %v9113_v42 }
 0x389   : > { %4746 = vst.msk [vmem:[%s8217_s6 + $0x1d0] sm:$0xff] %vm421_vm0, %v4682_v45  ;;  %4747 = vst.msk [vmem:[%s8217_s6 + $0x1d8] sm:$0xff] %vm421_vm0, %v4683_v49  ;;  %v4551_v0 = vmul.f32 %v6454_v7, %v9117_v18 }
 0x38a   : > { %v4616_v29 = vmul.f32 %v8845_v37, %v4548_v32  ;;  %v4617_v38 = vmul.f32 %v8849_v19, %v4549_v34  ;;  %v4618_v30 = vmul.f32 %v8853_v62, %v4550_v15 }
 0x38b   : > { %v4619_v60 = vmul.f32 %v8857_v14, %v4551_v0 }
 0x38c   : > { %v4684_v41 = vadd.f32 %v8863_v11, %v4616_v29  ;;  %v4685_v37 = vadd.f32 %v8867_v10, %v4617_v38  ;;  %v4686_v19 = vadd.f32 %v8871_v43, %v4618_v30 }
 0x38d   : > { %v4687_v62 = vadd.f32 %v8875_v63, %v4619_v60 }
 0x38e   : > { %4748 = vst.msk [vmem:[%s8217_s6 + $0x1e0] sm:$0xff] %vm421_vm0, %v4684_v41  ;;  %4749 = vst.msk [vmem:[%s8217_s6 + $0x1e8] sm:$0xff] %vm421_vm0, %v4685_v37 }
 0x38f   : > { %4750 = vst.msk [vmem:[%s8217_s6 + $0x1f0] sm:$0xff] %vm421_vm0, %v4686_v19  ;;  %4751 = vst.msk [vmem:[%s8217_s6 + $0x1f8] sm:$0xff] %vm421_vm0, %v4687_v62 }
 0x390   : > { %6595 = shalt.err (!%p6592_p6)
}
 0x391   : > { %s6596_s27 = scalar_lea.hbm %s9204_s9, 8192  ;;  %s6600_s11 = scalar_lea.hbm %s9272_s5, 16384 }
 0x392   : > { %p6597_p12 = scmp.ne.s32.totalorder %s9204_s9, %s6596_s27  ;;  %p6601_p10 = scmp.lt.u32.totalorder %s9204_s9, %s9272_s5 }
 0x393   : > { %p6602_p3 = scmp.lt.u32.totalorder %s6600_s11, %s6596_s27  ;;  %p6604_p1 = scmp.lt.u32.totalorder %s6596_s27, %s9204_s9 }
 0x394   : > { %p6598_p4 = pnand %p6597_p12, %p9747_p0 }
 0x395   : > { %p6603_p13 = por %p6602_p3, %p6601_p10 }
 0x396   : > { %p6599_p9 = pneg %p6598_p4 }
 0x397   : > { %p6605_p11 = por %p6604_p1, %p6603_p13 }
 0x399   : > { %p6606_p7 = pnand %p6605_p11, %p6599_p9 }
 0x39b   : > { %6609 = shalt.err (!%p6606_p7)
}
 0x39c   : > { %s6681_s17 = smov 128   ;;  %s6682_s15 = smov 8  }
 0x39d   : > { %6346 = dma.vmem_to_hbm [thread:$0]  (%p9747_p0), %s9206_s14, 8192, %s9204_s9, %s4753_s21, %s6681_s17, %s6681_s17, %s6682_s15  }
 0x39e PF: > { %s4784_s13 = sand.u32 1, %s6652_s18   ;;  %p9748_p8 = scmp.ne.s32.totalorder %s9434_s28, 0 }
 0x39f   : > { %p9749_p2 = scmp.ge.s32.totalorder %s6672_s23, 2  ;;  %s4785_s16 = scalar_lea.sflag [#allocation4], %s4784_s13 }
 0x3a1   : > { %p6363_p5 = pnand %p9749_p2, %p9748_p8 }
 0x3a3   : > { %6647 = dma.done.wait (!%p6363_p5), %s4785_s16, 8192  }
 0x3a4   : > { %6649 = vsyncadd (!%p6363_p5), %s4785_s16, 4294959104  ;;  %s22_s23 = sadd.s32 1, %s6672_s23   ;;  %s9750_s29 = sld [smem:[#allocation14_spill]] }
 0x3a5   : > { %p19_p6 = scmp.ge.s32.totalorder %s22_s23, 4   ;;  %s9751_s18 = smov %s6656_s19 }
 0x3a6   : > { %s9752_s19 = smov %s6660_s20  ;;  %s9753_s20 = smov %s6764_s30 }
 0x3a7   : > { %s9754_s21 = smov %s6668_s22  ;;  %21 = sbr.rel (!%p19_p6) target bundleno = 10 (0xa), region = 111 }
 0x3aa   : > { %s9755_s22 = smov %s9750_s29 }
 0x3ae   :  { %4790 = vsyncpa [#allocation3], 1 }
 0x3af   :  { %4792 = vsyncpa [#allocation3 + $0x1], 1 }
 0x3b0   :  { %4793 = vsyncpa [#allocation6], 1 }
 0x3b1   :  { %4794 = vsyncpa [#allocation4], 1 }
 0x3b2   :  { %4796 = vsyncpa [#allocation4 + $0x1], 1 }

</bundles_post_ra>
